<compile_context>
chip_gen: v5e
topology: v5e:2x2
jax: 0.10.0
libtpu: 0.0.40
codegen_flags: <defaults>
</compile_context>

<pallas_src>
import functools

import jax
import jax.numpy as jnp
import numpy as np
from jax.experimental import pallas as pl
from jax.experimental.pallas import tpu as pltpu

POOL_OUT = 112                      # AdaptiveAvgPool2d target
PATCH = 16                          # synthetic backbone patch size
NUM_PATCH = (POOL_OUT // PATCH) ** 2        # 7*7 = 49
N_CHAN = 3
PATCH_DIM = N_CHAN * PATCH * PATCH          # 768
FEAT_DIM = 512                              # ArcFace embedding size


# ---------------------------------------------------------------------------
# Composite reduction matrices: pool(112x112) + mean over the 7x7 patch grid
# is linear per channel:  q_c = A' @ x_c @ B'   with A':(16,H), B':(W,16).
# ---------------------------------------------------------------------------
def _make_pool_matrix(in_size, out_size):
    f = in_size // out_size
    rows = jnp.arange(in_size) // f
    m = jnp.zeros((out_size, in_size), jnp.float32)
    return m.at[rows, jnp.arange(in_size)].set(1.0 / f)


def _make_patch_mean_matrices(H, W):
    a = _make_pool_matrix(H, POOL_OUT)            # (112, H)
    b = _make_pool_matrix(W, POOL_OUT).T          # (W, 112)
    npp = POOL_OUT // PATCH                       # 7
    a_p = a.reshape(npp, PATCH, H).mean(axis=0)   # (16, H): avg over patch rows
    b_p = b.reshape(W, npp, PATCH).mean(axis=1)   # (W, 16): avg over patch cols
    return a_p, b_p


# ---------------------------------------------------------------------------
# Kernel A: fused pool + patch-mean, GROUP images of y and y_hat per step.
#   q[c] = A' @ x_c @ B', computed as A' @ (x_c @ B') so the small (W,16)
#   matrix is the MXU weight and the image streams as activations.
# Grid = (B // GROUP,), "parallel" for megacore sharding. Memory-bound on
# the image reads; the tiny per-image output is negligible store traffic.
# ---------------------------------------------------------------------------
def _patch_mean_kernel(y_ref, yh_ref, a_ref, b_ref, oy_ref, oyh_ref,
                       *, group, chans):
    # y_ref/yh_ref: (G, C, H, W)  a_ref: (16, H)  b_ref: (W, 16)
    # oy_ref/oyh_ref: (G, C, 16, 16)
    a = a_ref[...]
    b = b_ref[...]

    def reduce_images(x_ref, o_ref):
        for g in range(group):                    # small static unroll
            for c in range(chans):                # C == 3
                # (H, W) @ (W, 16) -> (H, 16): image streams as activations.
                t = jnp.dot(x_ref[g, c], b, preferred_element_type=jnp.float32)
                # (16, H) @ (H, 16) -> (16, 16)
                q = jnp.dot(a, t, preferred_element_type=jnp.float32)
                o_ref[g, c] = q.astype(o_ref.dtype)

    reduce_images(y_ref, oy_ref)
    reduce_images(yh_ref, oyh_ref)


def _pick_group(batch):
    # Largest group <= 2 (each step already carries y AND y_hat, i.e. 2*G
    # images) that divides the batch and keeps >= 2 grid steps for megacore.
    for g in (2, 1):
        if batch % g == 0 and batch // g >= 2:
            return g
    return 1


def patch_means(y, y_hat, a_p, b_p):
    B, C, H, W = y.shape
    assert y_hat.shape == y.shape
    assert C == N_CHAN and H % POOL_OUT == 0 and W % POOL_OUT == 0
    G = _pick_group(B)

    # Explicit VMEM budget: double-buffered image blocks + small operands.
    in_bytes = 2 * G * C * H * W * 4
    aux_bytes = (PATCH * H + W * PATCH + 2 * G * C * PATCH * PATCH) * 4
    vmem_limit = int(min(max(2 * (in_bytes + aux_bytes) + (1 << 20), 32 << 20),
                         60 << 20))

    kernel = functools.partial(_patch_mean_kernel, group=G, chans=C)
    out_shape = jax.ShapeDtypeStruct((B, C, PATCH, PATCH), jnp.float32)
    return pl.pallas_call(
        kernel,
        out_shape=(out_shape, out_shape),
        grid_spec=pltpu.PrefetchScalarGridSpec(
            num_scalar_prefetch=0,
            grid=(B // G,),
            in_specs=[
                pl.BlockSpec((G, C, H, W), lambda n: (n, 0, 0, 0)),
                pl.BlockSpec((G, C, H, W), lambda n: (n, 0, 0, 0)),
                pl.BlockSpec((PATCH, H), lambda n: (0, 0)),
                pl.BlockSpec((W, PATCH), lambda n: (0, 0)),
            ],
            out_specs=[
                pl.BlockSpec((G, C, PATCH, PATCH), lambda n: (n, 0, 0, 0)),
                pl.BlockSpec((G, C, PATCH, PATCH), lambda n: (n, 0, 0, 0)),
            ],
        ),
        compiler_params=pltpu.CompilerParams(
            dimension_semantics=("parallel",),
            vmem_limit_bytes=vmem_limit),
    )(y, y_hat, a_p, b_p)


# ---------------------------------------------------------------------------
# Kernel B: single stacked embed + L2-normalize + identity loss, one launch.
#   f = normalize(Q @ W) with Q = [q_y ; q_yhat];  loss = mean_i (1 - <f_yh, f_y>)
# ---------------------------------------------------------------------------
def _embed_loss_kernel(q_ref, w_ref, o_ref):
    # q_ref: (2B, 768)   w_ref: (768, 512)   o_ref: (1, 1)
    q = q_ref[...]
    w = w_ref[...]
    f = jnp.dot(q, w, preferred_element_type=jnp.float32)          # (2B, 512)
    f = f * jax.lax.rsqrt(jnp.sum(f * f, axis=-1, keepdims=True) + 1e-12)
    half = q_ref.shape[0] // 2
    d = jnp.sum(f[:half] * f[half:], axis=-1, keepdims=True)       # (B, 1)
    loss = jnp.sum(1.0 - d) / half
    o_ref[...] = loss.reshape(1, 1).astype(o_ref.dtype)


def embed_and_loss(q, w_embed):
    N, D = q.shape
    out = pl.pallas_call(
        _embed_loss_kernel,
        out_shape=jax.ShapeDtypeStruct((1, 1), jnp.float32),
        grid_spec=pltpu.PrefetchScalarGridSpec(
            num_scalar_prefetch=0,
            grid=(1,),
            in_specs=[
                pl.BlockSpec((N, D), lambda i: (0, 0)),
                pl.BlockSpec((D, FEAT_DIM), lambda i: (0, 0)),
            ],
            out_specs=pl.BlockSpec((1, 1), lambda i: (0, 0)),
        ),
    )(q, w_embed)
    return out[0, 0]


# ---------------------------------------------------------------------------
# Full forward (mirrors IDLoss.forward's returned value)
# ---------------------------------------------------------------------------
def id_loss_forward(x, y, y_hat, w_embed):
    # x only feeds id_logs / sim_improvement in the reference forward; those
    # never reach the returned loss, so its features are not computed (dead).
    del x
    B = y.shape[0]
    H, W = y.shape[2], y.shape[3]
    a_p, b_p = _make_patch_mean_matrices(H, W)
    qy, qyh = patch_means(y, y_hat, a_p, b_p)            # (B, C, 16, 16) each
    # Tiny (12 KB) stack; ordering per image is c*256 + i*16 + j.
    q = jnp.concatenate([qy.reshape(B, PATCH_DIM),
                         qyh.reshape(B, PATCH_DIM)], axis=0)   # (2B, 768)
    return embed_and_loss(q, w_embed)


# ---------------------------------------------------------------------------
# Pure-JAX reference (un-fused: pool -> patchify -> per-patch embed -> mean)
# ---------------------------------------------------------------------------
def _ref_id_loss(x, y, y_hat, w_embed):
    del x

    def feats(img):
        N, C, H, W = img.shape
        fh, fw = H // POOL_OUT, W // POOL_OUT
        p = img.reshape(N, C, POOL_OUT, fh, POOL_OUT, fw).mean(axis=(3, 5))
        ph = POOL_OUT // PATCH
        pt = p.reshape(N, C, ph, PATCH, ph, PATCH)
        pt = pt.transpose(0, 2, 4, 1, 3, 5).reshape(N, ph * ph, C * PATCH * PATCH)
        e = jnp.einsum('npd,df->npf', pt, w_embed)         # embed each patch
        ft = e.mean(axis=1)                                # mean over patches
        return ft * jax.lax.rsqrt(
            jnp.sum(ft * ft, axis=-1, keepdims=True) + 1e-12)

    yf = feats(y)
    yhf = feats(y_hat)
    return jnp.mean(1.0 - jnp.sum(yhf * yf, axis=-1))


if __name__ == "__main__":
    B, C, H, W = 2, 3, 224, 224          # small batch; 224 = 2 * 112

    key = jax.random.PRNGKey(0)
    kx, ky, kyh, kw = jax.random.split(key, 4)
    x = jax.random.normal(kx, (B, C, H, W), jnp.float32)
    y = jax.random.normal(ky, (B, C, H, W), jnp.float32)
    y_hat = jax.random.normal(kyh, (B, C, H, W), jnp.float32)

    # deterministic synthetic "facenet" parameters
    w_embed = jax.random.normal(kw, (PATCH_DIM, FEAT_DIM), jnp.float32)
    w_embed = w_embed * (1.0 / np.sqrt(PATCH_DIM))

    loss = jax.jit(id_loss_forward)(x, y, y_hat, w_embed)
    loss = jax.block_until_ready(loss)

    loss_ref = jax.block_until_ready(_ref_id_loss(x, y, y_hat, w_embed))
    np.testing.assert_allclose(np.asarray(loss), np.asarray(loss_ref),
                               rtol=1e-3, atol=1e-3)
    print("KERNEL_OK")
</pallas_src>

<mosaic_0001>
module attributes {stable_mosaic.version = 11 : i64} {
  func.func @_patch_mean_kernel(%arg0: i32, %arg1: memref<1x3x224x224xf32, #tpu.memory_space<vmem>>, %arg2: memref<1x3x224x224xf32, #tpu.memory_space<vmem>>, %arg3: memref<16x224xf32, #tpu.memory_space<vmem>>, %arg4: memref<224x16xf32, #tpu.memory_space<vmem>>, %arg5: memref<1x3x16x16xf32, #tpu.memory_space<vmem>>, %arg6: memref<1x3x16x16xf32, #tpu.memory_space<vmem>>) attributes {dimension_semantics = [#tpu.dimension_semantics<parallel>], iteration_bounds = array<i64: 2>, scalar_prefetch = 0 : i64, scratch_operands = 0 : i64, tpu.core_type = #tpu.core_type<tc>, window_params = [{transform_indices = @transform_0, window_bounds = array<i64: 1, 3, 224, 224>}, {transform_indices = @transform_1, window_bounds = array<i64: 1, 3, 224, 224>}, {pipeline_mode = #tpu.pipeline_mode<synchronous>, transform_indices = @transform_2, window_bounds = array<i64: 16, 224>}, {pipeline_mode = #tpu.pipeline_mode<synchronous>, transform_indices = @transform_3, window_bounds = array<i64: 224, 16>}, {transform_indices = @transform_4, window_bounds = array<i64: 1, 3, 16, 16>}, {transform_indices = @transform_5, window_bounds = array<i64: 1, 3, 16, 16>}]} {
    %c0 = arith.constant 0 : index
    %c0_0 = arith.constant 0 : index
    %0 = vector.load %arg3[%c0, %c0_0] : memref<16x224xf32, #tpu.memory_space<vmem>>, vector<16x224xf32>
    %c0_1 = arith.constant 0 : index
    %c0_2 = arith.constant 0 : index
    %1 = vector.load %arg4[%c0_1, %c0_2] : memref<224x16xf32, #tpu.memory_space<vmem>>, vector<224x16xf32>
    %c0_3 = arith.constant 0 : index
    %c0_4 = arith.constant 0 : index
    %c0_5 = arith.constant 0 : index
    %c0_6 = arith.constant 0 : index
    %2 = vector.load %arg1[%c0_3, %c0_4, %c0_5, %c0_6] : memref<1x3x224x224xf32, #tpu.memory_space<vmem>>, vector<1x1x224x224xf32>
    %3 = vector.shape_cast %2 : vector<1x1x224x224xf32> to vector<224x224xf32>
    %cst = arith.constant dense<0.000000e+00> : vector<224x16xf32>
    %4 = tpu.matmul %3, %1, %cst {dimension_numbers = #tpu.dot_dimension_numbers<[1], [0], [0], [1], [0, 0, 1, 1], [], []>} : vector<224x224xf32>, vector<224x16xf32>, vector<224x16xf32> -> vector<224x16xf32>
    %cst_7 = arith.constant dense<0.000000e+00> : vector<16x16xf32>
    %5 = tpu.matmul %0, %4, %cst_7 {dimension_numbers = #tpu.dot_dimension_numbers<[1], [0], [0], [1], [0, 0, 1, 1], [], []>} : vector<16x224xf32>, vector<224x16xf32>, vector<16x16xf32> -> vector<16x16xf32>
    %c0_8 = arith.constant 0 : index
    %c0_9 = arith.constant 0 : index
    %c0_10 = arith.constant 0 : index
    %c0_11 = arith.constant 0 : index
    %6 = vector.load %arg5[%c0_8, %c0_9, %c0_10, %c0_11] : memref<1x3x16x16xf32, #tpu.memory_space<vmem>>, vector<1x1x16x16xf32>
    %7 = vector.shape_cast %6 : vector<1x1x16x16xf32> to vector<16x16xf32>
    %8 = vector.shape_cast %5 : vector<16x16xf32> to vector<1x1x16x16xf32>
    tpu.vector_store %arg5[%c0_8, %c0_9, %c0_10, %c0_11], %8 {strides = array<i32>} : memref<1x3x16x16xf32, #tpu.memory_space<vmem>>, vector<1x1x16x16xf32>,
    %c0_12 = arith.constant 0 : index
    %c1 = arith.constant 1 : index
    %c0_13 = arith.constant 0 : index
    %c0_14 = arith.constant 0 : index
    %9 = vector.load %arg1[%c0_12, %c1, %c0_13, %c0_14] : memref<1x3x224x224xf32, #tpu.memory_space<vmem>>, vector<1x1x224x224xf32>
    %10 = vector.shape_cast %9 : vector<1x1x224x224xf32> to vector<224x224xf32>
    %cst_15 = arith.constant dense<0.000000e+00> : vector<224x16xf32>
    %11 = tpu.matmul %10, %1, %cst_15 {dimension_numbers = #tpu.dot_dimension_numbers<[1], [0], [0], [1], [0, 0, 1, 1], [], []>} : vector<224x224xf32>, vector<224x16xf32>, vector<224x16xf32> -> vector<224x16xf32>
    %cst_16 = arith.constant dense<0.000000e+00> : vector<16x16xf32>
    %12 = tpu.matmul %0, %11, %cst_16 {dimension_numbers = #tpu.dot_dimension_numbers<[1], [0], [0], [1], [0, 0, 1, 1], [], []>} : vector<16x224xf32>, vector<224x16xf32>, vector<16x16xf32> -> vector<16x16xf32>
    %c0_17 = arith.constant 0 : index
    %c1_18 = arith.constant 1 : index
    %c0_19 = arith.constant 0 : index
    %c0_20 = arith.constant 0 : index
    %13 = vector.load %arg5[%c0_17, %c1_18, %c0_19, %c0_20] : memref<1x3x16x16xf32, #tpu.memory_space<vmem>>, vector<1x1x16x16xf32>
    %14 = vector.shape_cast %13 : vector<1x1x16x16xf32> to vector<16x16xf32>
    %15 = vector.shape_cast %12 : vector<16x16xf32> to vector<1x1x16x16xf32>
    tpu.vector_store %arg5[%c0_17, %c1_18, %c0_19, %c0_20], %15 {strides = array<i32>} : memref<1x3x16x16xf32, #tpu.memory_space<vmem>>, vector<1x1x16x16xf32>,
    %c0_21 = arith.constant 0 : index
    %c2 = arith.constant 2 : index
    %c0_22 = arith.constant 0 : index
    %c0_23 = arith.constant 0 : index
    %16 = vector.load %arg1[%c0_21, %c2, %c0_22, %c0_23] : memref<1x3x224x224xf32, #tpu.memory_space<vmem>>, vector<1x1x224x224xf32>
    %17 = vector.shape_cast %16 : vector<1x1x224x224xf32> to vector<224x224xf32>
    %cst_24 = arith.constant dense<0.000000e+00> : vector<224x16xf32>
    %18 = tpu.matmul %17, %1, %cst_24 {dimension_numbers = #tpu.dot_dimension_numbers<[1], [0], [0], [1], [0, 0, 1, 1], [], []>} : vector<224x224xf32>, vector<224x16xf32>, vector<224x16xf32> -> vector<224x16xf32>
    %cst_25 = arith.constant dense<0.000000e+00> : vector<16x16xf32>
    %19 = tpu.matmul %0, %18, %cst_25 {dimension_numbers = #tpu.dot_dimension_numbers<[1], [0], [0], [1], [0, 0, 1, 1], [], []>} : vector<16x224xf32>, vector<224x16xf32>, vector<16x16xf32> -> vector<16x16xf32>
    %c0_26 = arith.constant 0 : index
    %c2_27 = arith.constant 2 : index
    %c0_28 = arith.constant 0 : index
    %c0_29 = arith.constant 0 : index
    %20 = vector.load %arg5[%c0_26, %c2_27, %c0_28, %c0_29] : memref<1x3x16x16xf32, #tpu.memory_space<vmem>>, vector<1x1x16x16xf32>
    %21 = vector.shape_cast %20 : vector<1x1x16x16xf32> to vector<16x16xf32>
    %22 = vector.shape_cast %19 : vector<16x16xf32> to vector<1x1x16x16xf32>
    tpu.vector_store %arg5[%c0_26, %c2_27, %c0_28, %c0_29], %22 {strides = array<i32>} : memref<1x3x16x16xf32, #tpu.memory_space<vmem>>, vector<1x1x16x16xf32>,
    %c0_30 = arith.constant 0 : index
    %c0_31 = arith.constant 0 : index
    %c0_32 = arith.constant 0 : index
    %c0_33 = arith.constant 0 : index
    %23 = vector.load %arg2[%c0_30, %c0_31, %c0_32, %c0_33] : memref<1x3x224x224xf32, #tpu.memory_space<vmem>>, vector<1x1x224x224xf32>
    %24 = vector.shape_cast %23 : vector<1x1x224x224xf32> to vector<224x224xf32>
    %cst_34 = arith.constant dense<0.000000e+00> : vector<224x16xf32>
    %25 = tpu.matmul %24, %1, %cst_34 {dimension_numbers = #tpu.dot_dimension_numbers<[1], [0], [0], [1], [0, 0, 1, 1], [], []>} : vector<224x224xf32>, vector<224x16xf32>, vector<224x16xf32> -> vector<224x16xf32>
    %cst_35 = arith.constant dense<0.000000e+00> : vector<16x16xf32>
    %26 = tpu.matmul %0, %25, %cst_35 {dimension_numbers = #tpu.dot_dimension_numbers<[1], [0], [0], [1], [0, 0, 1, 1], [], []>} : vector<16x224xf32>, vector<224x16xf32>, vector<16x16xf32> -> vector<16x16xf32>
    %c0_36 = arith.constant 0 : index
    %c0_37 = arith.constant 0 : index
    %c0_38 = arith.constant 0 : index
    %c0_39 = arith.constant 0 : index
    %27 = vector.load %arg6[%c0_36, %c0_37, %c0_38, %c0_39] : memref<1x3x16x16xf32, #tpu.memory_space<vmem>>, vector<1x1x16x16xf32>
    %28 = vector.shape_cast %27 : vector<1x1x16x16xf32> to vector<16x16xf32>
    %29 = vector.shape_cast %26 : vector<16x16xf32> to vector<1x1x16x16xf32>
    tpu.vector_store %arg6[%c0_36, %c0_37, %c0_38, %c0_39], %29 {strides = array<i32>} : memref<1x3x16x16xf32, #tpu.memory_space<vmem>>, vector<1x1x16x16xf32>,
    %c0_40 = arith.constant 0 : index
    %c1_41 = arith.constant 1 : index
    %c0_42 = arith.constant 0 : index
    %c0_43 = arith.constant 0 : index
    %30 = vector.load %arg2[%c0_40, %c1_41, %c0_42, %c0_43] : memref<1x3x224x224xf32, #tpu.memory_space<vmem>>, vector<1x1x224x224xf32>
    %31 = vector.shape_cast %30 : vector<1x1x224x224xf32> to vector<224x224xf32>
    %cst_44 = arith.constant dense<0.000000e+00> : vector<224x16xf32>
    %32 = tpu.matmul %31, %1, %cst_44 {dimension_numbers = #tpu.dot_dimension_numbers<[1], [0], [0], [1], [0, 0, 1, 1], [], []>} : vector<224x224xf32>, vector<224x16xf32>, vector<224x16xf32> -> vector<224x16xf32>
    %cst_45 = arith.constant dense<0.000000e+00> : vector<16x16xf32>
    %33 = tpu.matmul %0, %32, %cst_45 {dimension_numbers = #tpu.dot_dimension_numbers<[1], [0], [0], [1], [0, 0, 1, 1], [], []>} : vector<16x224xf32>, vector<224x16xf32>, vector<16x16xf32> -> vector<16x16xf32>
    %c0_46 = arith.constant 0 : index
    %c1_47 = arith.constant 1 : index
    %c0_48 = arith.constant 0 : index
    %c0_49 = arith.constant 0 : index
    %34 = vector.load %arg6[%c0_46, %c1_47, %c0_48, %c0_49] : memref<1x3x16x16xf32, #tpu.memory_space<vmem>>, vector<1x1x16x16xf32>
    %35 = vector.shape_cast %34 : vector<1x1x16x16xf32> to vector<16x16xf32>
    %36 = vector.shape_cast %33 : vector<16x16xf32> to vector<1x1x16x16xf32>
    tpu.vector_store %arg6[%c0_46, %c1_47, %c0_48, %c0_49], %36 {strides = array<i32>} : memref<1x3x16x16xf32, #tpu.memory_space<vmem>>, vector<1x1x16x16xf32>,
    %c0_50 = arith.constant 0 : index
    %c2_51 = arith.constant 2 : index
    %c0_52 = arith.constant 0 : index
    %c0_53 = arith.constant 0 : index
    %37 = vector.load %arg2[%c0_50, %c2_51, %c0_52, %c0_53] : memref<1x3x224x224xf32, #tpu.memory_space<vmem>>, vector<1x1x224x224xf32>
    %38 = vector.shape_cast %37 : vector<1x1x224x224xf32> to vector<224x224xf32>
    %cst_54 = arith.constant dense<0.000000e+00> : vector<224x16xf32>
    %39 = tpu.matmul %38, %1, %cst_54 {dimension_numbers = #tpu.dot_dimension_numbers<[1], [0], [0], [1], [0, 0, 1, 1], [], []>} : vector<224x224xf32>, vector<224x16xf32>, vector<224x16xf32> -> vector<224x16xf32>
    %cst_55 = arith.constant dense<0.000000e+00> : vector<16x16xf32>
    %40 = tpu.matmul %0, %39, %cst_55 {dimension_numbers = #tpu.dot_dimension_numbers<[1], [0], [0], [1], [0, 0, 1, 1], [], []>} : vector<16x224xf32>, vector<224x16xf32>, vector<16x16xf32> -> vector<16x16xf32>
    %c0_56 = arith.constant 0 : index
    %c2_57 = arith.constant 2 : index
    %c0_58 = arith.constant 0 : index
    %c0_59 = arith.constant 0 : index
    %41 = vector.load %arg6[%c0_56, %c2_57, %c0_58, %c0_59] : memref<1x3x16x16xf32, #tpu.memory_space<vmem>>, vector<1x1x16x16xf32>
    %42 = vector.shape_cast %41 : vector<1x1x16x16xf32> to vector<16x16xf32>
    %43 = vector.shape_cast %40 : vector<16x16xf32> to vector<1x1x16x16xf32>
    tpu.vector_store %arg6[%c0_56, %c2_57, %c0_58, %c0_59], %43 {strides = array<i32>} : memref<1x3x16x16xf32, #tpu.memory_space<vmem>>, vector<1x1x16x16xf32>,
    return
  }
  func.func @transform_0(%arg0: i32) -> (i32, i32, i32, i32) {
    %c0_i32 = arith.constant 0 : i32
    %c0_i32_0 = arith.constant 0 : i32
    %c0_i32_1 = arith.constant 0 : i32
    %c0_i32_2 = arith.constant 0 : i32
    return %arg0, %c0_i32, %c0_i32_0, %c0_i32_1 : i32, i32, i32, i32
  }
  func.func @transform_1(%arg0: i32) -> (i32, i32, i32, i32) {
    %c0_i32 = arith.constant 0 : i32
    %c0_i32_0 = arith.constant 0 : i32
    %c0_i32_1 = arith.constant 0 : i32
    %c0_i32_2 = arith.constant 0 : i32
    return %arg0, %c0_i32, %c0_i32_0, %c0_i32_1 : i32, i32, i32, i32
  }
  func.func @transform_2(%arg0: i32) -> (i32, i32) {
    %c0_i32 = arith.constant 0 : i32
    %c0_i32_0 = arith.constant 0 : i32
    %c0_i32_1 = arith.constant 0 : i32
    return %c0_i32, %c0_i32_0 : i32, i32
  }
  func.func @transform_3(%arg0: i32) -> (i32, i32) {
    %c0_i32 = arith.constant 0 : i32
    %c0_i32_0 = arith.constant 0 : i32
    %c0_i32_1 = arith.constant 0 : i32
    return %c0_i32, %c0_i32_0 : i32, i32
  }
  func.func @transform_4(%arg0: i32) -> (i32, i32, i32, i32) {
    %c0_i32 = arith.constant 0 : i32
    %c0_i32_0 = arith.constant 0 : i32
    %c0_i32_1 = arith.constant 0 : i32
    %c0_i32_2 = arith.constant 0 : i32
    return %arg0, %c0_i32, %c0_i32_0, %c0_i32_1 : i32, i32, i32, i32
  }
  func.func @transform_5(%arg0: i32) -> (i32, i32, i32, i32) {
    %c0_i32 = arith.constant 0 : i32
    %c0_i32_0 = arith.constant 0 : i32
    %c0_i32_1 = arith.constant 0 : i32
    %c0_i32_2 = arith.constant 0 : i32
    return %arg0, %c0_i32, %c0_i32_0, %c0_i32_1 : i32, i32, i32, i32
  }
}

module attributes {stable_mosaic.version = 11 : i64} {
  func.func @_embed_loss_kernel(%arg0: i32, %arg1: memref<4x768xf32, #tpu.memory_space<vmem>>, %arg2: memref<768x512xf32, #tpu.memory_space<vmem>>, %arg3: memref<1x1xf32, #tpu.memory_space<vmem>>) attributes {dimension_semantics = [#tpu.dimension_semantics<arbitrary>], iteration_bounds = array<i64: 1>, scalar_prefetch = 0 : i64, scratch_operands = 0 : i64, tpu.core_type = #tpu.core_type<tc>, window_params = [{pipeline_mode = #tpu.pipeline_mode<synchronous>, transform_indices = @transform_0, window_bounds = array<i64: 4, 768>}, {pipeline_mode = #tpu.pipeline_mode<synchronous>, transform_indices = @transform_1, window_bounds = array<i64: 768, 512>}, {pipeline_mode = #tpu.pipeline_mode<synchronous>, transform_indices = @transform_2, window_bounds = array<i64: 1, 1>}]} {
    %c0 = arith.constant 0 : index
    %c0_0 = arith.constant 0 : index
    %0 = vector.load %arg1[%c0, %c0_0] : memref<4x768xf32, #tpu.memory_space<vmem>>, vector<4x768xf32>
    %c0_1 = arith.constant 0 : index
    %c0_2 = arith.constant 0 : index
    %1 = vector.load %arg2[%c0_1, %c0_2] : memref<768x512xf32, #tpu.memory_space<vmem>>, vector<768x512xf32>
    %cst = arith.constant dense<0.000000e+00> : vector<4x512xf32>
    %2 = tpu.matmul %0, %1, %cst {dimension_numbers = #tpu.dot_dimension_numbers<[1], [0], [0], [1], [0, 0, 1, 1], [], []>} : vector<4x768xf32>, vector<768x512xf32>, vector<4x512xf32> -> vector<4x512xf32>
    %3 = arith.mulf %2, %2 : vector<4x512xf32>
    %cst_3 = arith.constant dense<0.000000e+00> : vector<4xf32>
    %4 = vector.multi_reduction <add>, %3, %cst_3 [1] : vector<4x512xf32> to vector<4xf32>
    %5 = vector.shape_cast %4 : vector<4xf32> to vector<4x1xf32>
    %cst_4 = arith.constant 9.99999996E-13 : f32
    %6 = vector.broadcast %cst_4 : f32 to vector<4x1xf32>
    %7 = arith.addf %5, %6 : vector<4x1xf32>
    %8 = math.rsqrt %7 : vector<4x1xf32>
    %9 = vector.broadcast %8 : vector<4x1xf32> to vector<4x512xf32>
    %10 = arith.mulf %2, %9 : vector<4x512xf32>
    %11 = vector.extract_strided_slice %10 {offsets = [0, 0], sizes = [2, 512], strides = [1, 1]} : vector<4x512xf32> to vector<2x512xf32>
    %12 = vector.extract_strided_slice %10 {offsets = [2, 0], sizes = [2, 512], strides = [1, 1]} : vector<4x512xf32> to vector<2x512xf32>
    %13 = arith.mulf %11, %12 : vector<2x512xf32>
    %cst_5 = arith.constant dense<0.000000e+00> : vector<2xf32>
    %14 = vector.multi_reduction <add>, %13, %cst_5 [1] : vector<2x512xf32> to vector<2xf32>
    %15 = vector.shape_cast %14 : vector<2xf32> to vector<2x1xf32>
    %cst_6 = arith.constant 1.000000e+00 : f32
    %16 = vector.broadcast %cst_6 : f32 to vector<2x1xf32>
    %17 = arith.subf %16, %15 : vector<2x1xf32>
    %18 = vector.shape_cast %17 : vector<2x1xf32> to vector<1x2x1xf32>
    %cst_7 = arith.constant dense<0.000000e+00> : vector<1xf32>
    %19 = vector.multi_reduction <add>, %18, %cst_7 [1, 2] : vector<1x2x1xf32> to vector<1xf32>
    %20 = vector.shape_cast %19 : vector<1xf32> to vector<1x1x1xf32>
    %21 = vector.extract %20[0, 0, 0] : f32 from vector<1x1x1xf32>
    %cst_8 = arith.constant 2.000000e+00 : f32
    %22 = arith.divf %21, %cst_8 : f32
    %23 = vector.broadcast %22 : f32 to vector<1x1xf32>
    %c0_9 = arith.constant 0 : index
    %c0_10 = arith.constant 0 : index
    %24 = vector.load %arg3[%c0_9, %c0_10] : memref<1x1xf32, #tpu.memory_space<vmem>>, vector<1x1xf32>
    tpu.vector_store %arg3[%c0_9, %c0_10], %23 {strides = array<i32>} : memref<1x1xf32, #tpu.memory_space<vmem>>, vector<1x1xf32>,
    return
  }
  func.func @transform_0(%arg0: i32) -> (i32, i32) {
    %c0_i32 = arith.constant 0 : i32
    %c0_i32_0 = arith.constant 0 : i32
    %c0_i32_1 = arith.constant 0 : i32
    return %c0_i32, %c0_i32_0 : i32, i32
  }
  func.func @transform_1(%arg0: i32) -> (i32, i32) {
    %c0_i32 = arith.constant 0 : i32
    %c0_i32_0 = arith.constant 0 : i32
    %c0_i32_1 = arith.constant 0 : i32
    return %c0_i32, %c0_i32_0 : i32, i32
  }
  func.func @transform_2(%arg0: i32) -> (i32, i32) {
    %c0_i32 = arith.constant 0 : i32
    %c0_i32_0 = arith.constant 0 : i32
    %c0_i32_1 = arith.constant 0 : i32
    return %c0_i32, %c0_i32_0 : i32, i32
  }
}

</mosaic_0001>

<bundles_post_ra>
// kernel: id_loss_forward.2
= control target key start
LH: loop header
LB: loop body
LE: loop exit
PB: predicated region body
PF: predicated region fallthrough
CT: control target
= control target key end

     0   :  { %11 = vsyncpa [#allocation3], 0  ;;  %s4937_s0 = inlined_call_operand.vmem [shape: f32[2,3,224,224], index: 0, kind: input, shape index: {}]   ;;  %s4938_s1 = inlined_call_operand.hbm [shape: f32[2,3,224,224], index: 1, kind: input, shape index: {}]   ;;  %s4939_s2 = inlined_call_operand.vmem [shape: f32[16,224], index: 2, kind: input, shape index: {}]   ;;  %s4940_s3 = inlined_call_operand.vmem [shape: f32[224,16], index: 3, kind: input, shape index: {}]   ;;  %s4941_s4 = inlined_call_operand.vmem [shape: f32[2,3,16,16], index: 4, kind: output, shape index: {0}]   ;;  %s4942_s5 = inlined_call_operand.vmem [shape: f32[2,3,16,16], index: 5, kind: output, shape index: {1}]  }
   0x1   :  { %13 = vsyncpa [#allocation3 + $0x1], 0  ;;  %s3408_s18 = smov 0   ;;  %s3410_s19 = smov 0  }
   0x2   :  { %s3412_s20 = smov 0   ;;  %s3414_s21 = smov 0  }
   0x3 LB: > { %s3427_s22 = sadd.s32 4294967295, %s3374_s21   ;;  %s3430_s23 = sadd.s32 1, %s3374_s21   ;;  %s3374_s21 = sphi %s3414_s21, %s4972_s21   ;;  %s3370_s20 = sphi %s3412_s20, %s4971_s20   ;;  %s3366_s19 = sphi %s3410_s19, %s4970_s19   ;;  %s3362_s18 = sphi %s3408_s18, %s4969_s18  }
   0x4   : > { %s49_s24 = ssub.s32 %s3374_s21, %s3430_s23  ;;  %s52_s25 = sadd.s32 1, %s3370_s20 }
   0x5   : > { %p50_p0 = scmp.eq.s32.totalorder %s49_s24, 0  ;;  %p59_p1 = scmp.ne.s32.totalorder %s3370_s20, %s3366_s19 }
   0x6   : > { %p60_p2 = scmp.eq.s32.totalorder %s3374_s21, 0  ;;  %p65_p3 = scmp.ne.s32.totalorder %s3366_s19, %s3362_s18 }
   0x7   : > { %s3440_s26 = scalar_select %p50_p0, %s3370_s20, %s52_s25  }
   0x8   : > { %p61_p4 = por %p60_p2, %p59_p1  ;;  %p66_p5 = scmp.eq.s32.totalorder %s3427_s22, 0 }
   0x9   : > { %p3213_p6 = scmp.lt.s32.totalorder %s3374_s21, 2  ;;  %s197_s28 = sand.u32 1, %s3370_s20  }
   0xa   : > { %p3444_p7 = por %p66_p5, %p65_p3  ;;  %s3202_s29 = smul.u32 1344, %s197_s28 }
   0xb   : > { %s3203_s30 = smul.u32 1344, %s3374_s21  ;;  %p3450_p8 = pnand %p3213_p6, %p61_p4 }
   0xc   : > { %s201_s10 = scalar_lea.vmem [#allocation2], %s3202_s29  ;;  %p2784_p9 = scmp.ge.s32.totalorder %s3374_s21, 1 }
   0xd   : > { %s206_s9 = scalar_lea.hbm %s4938_s1, %s3203_s30  ;;  %s209_s11 = sshll.u32 %s201_s10, 4  ;;  %s210_s11 = int_to_ptr.vmem [resolvable:$true] %s209_s11 }
   0xe   : > { %s207_s12 = sshll.u32 %s206_s9, 4  ;;  %s198_s13 = scalar_lea.sflag [#allocation3], %s197_s28  ;;  %s208_s12 = int_to_ptr.hbm [resolvable:$true] %s207_s12 }
   0xf   : > { %s3310_s14 = sshra.s32 %s208_s12, 4  ;;  %p3314_p11 = pneg %p3450_p8  ;;  %s3311_s14 = int_to_ptr.hbm [resolvable:$true] %s3310_s14 }
  0x10   : > { %s3312_s15 = scalar_lea.hbm %s3311_s14, 1344  ;;  %s3317_s18 = scalar_lea.hbm %s4938_s1, 2688 }
  0x11   : > { %p3313_p10 = scmp.ne.s32.totalorder %s3311_s14, %s3312_s15  ;;  %p3318_p0 = scmp.lt.s32.totalorder %s3311_s14, %s4938_s1 }
  0x12   : > { %p3319_p1 = scmp.lt.s32.totalorder %s3317_s18, %s3312_s15 }
  0x13   : > { %p3315_p12 = pnand %p3314_p11, %p3313_p10 }
  0x14   : > { %p3320_p2 = por %p3319_p1, %p3318_p0 }
  0x15   : > { %p3316_p13 = pneg %p3315_p12 }
  0x17   : > { %p3321_p3 = pnand %p3320_p2, %p3316_p13 }
  0x19   : > { %3324 = shalt.err (!%p3321_p3)
}
  0x1a   : > { %s3376_s28 = smov 256   ;;  %s3377_s29 = smov 16  }
  0x1b   : > { %3212 = dma.hbm_to_vmem [thread:$0]  (!%p3450_p8), %s208_s12, 21504, %s210_s11, %s198_s13, %s3376_s28, %s3376_s28, %s3377_s29  }
  0x1c   : > { %p217_p4 = scmp.lt.s32.totalorder %s3374_s21, 3 }
  0x1e   : > { %p218_p5 = pnand %p2784_p9, %p217_p4 }
  0x20   : > { %221 = sbr.rel (%p218_p5) target bundleno = 2477 (0x9ad), region = 36 }
  0x25   : > { %s223_s30 = sand.u32 1, %s3366_s19  }
  0x26   : > { %s3204_s7 = smul.u32 1344, %s223_s30  ;;  %s224_s8 = scalar_lea.sflag [#allocation3], %s223_s30 }
  0x28   : > { %s3472_s9 = scalar_lea.vmem [#allocation2], %s3204_s7 }
  0x29   : > { %3357 = dma.done.wait (%p3444_p7), %s224_s8, 21504  }
  0x2a   : > { %3359 = vsyncadd (%p3444_p7), %s224_s8, 4294945792  ;;  %v3481_v0 = vld [vmem:[%s4940_s3 + $0x78] sm:$0xff]  ;;  %v3486_v1 = vld [vmem:[%s4940_s3 + $0x70] sm:$0xff]  ;;  %p265_p6 = scmp.lt.s32.totalorder %s3427_s22, 1  ;;  %vm368_vm0 = vcmask 785408   ;;  %vm707_vm1 = vcmask 130048  }
  0x2b   : > { %453 = vmatpush.msra.mxu0 %v3481_v0  ;;  %v3492_v2 = vld [vmem:[%s4940_s3 + $0xd8] sm:$0xff]  ;;  %v3497_v3 = vld [vmem:[%s4940_s3 + $0x68] sm:$0xff]  ;;  %v3503_v4 = vld [vmem:[%s4940_s3 + $0xd0] sm:$0xff] }
  0x2c   : > { %558 = vmatpush.msra.mxu1 %v3492_v2  ;;  %v3509_v5 = vld [vmem:[%s4940_s3 + $0xc8] sm:$0xff]  ;;  %v3514_v6 = vld [vmem:[%s4940_s3 + $0x60] sm:$0xff]  ;;  %v3526_v8 = vld [vmem:[%s4940_s3 + $0x58] sm:$0xff]  ;;  %s4974_s22 = smov (!%p265_p6, %s3427_s22), 1 }
  0x2d   : > { %454 = vmatpush.msra.mxu0 %v3486_v1  ;;  %v3521_v7 = vld [vmem:[%s4940_s3 + $0xc0] sm:$0xff]  ;;  %v3533_v9 = vld [vmem:[%s4940_s3 + $0xb8] sm:$0xff]  ;;  %v3539_v10 = vld [vmem:[%s4940_s3 + $0x50] sm:$0xff]  ;;  %s3205_s7 = smul.u32 1344, %s4974_s22 }
  0x2e   : > { %559 = vmatpush.msra.mxu1 %v3503_v4  ;;  %v3546_v11 = vld [vmem:[%s4940_s3 + $0xb0] sm:$0xff]  ;;  %v3551_v12 = vld [vmem:[%s4940_s3 + $0x48] sm:$0xff]  ;;  %v3566_v14 = vld [vmem:[%s4940_s3 + $0x40] sm:$0xff]  ;;  %s3206_s24 = smul.u32 48, %s4974_s22 }
  0x2f   : > { %455 = vmatpush.msra.mxu0 %v3497_v3  ;;  %v3558_v13 = vld [vmem:[%s4940_s3 + $0xa8] sm:$0xff]  ;;  %v3573_v15 = vld [vmem:[%s4940_s3 + $0xa0] sm:$0xff]  ;;  %v3578_v16 = vld [vmem:[%s4940_s3 + $0x38] sm:$0xff]  ;;  %s3615_s16 = scalar_lea.vmem %s4937_s0, %s3205_s7 }
  0x30   : > { %560 = vmatpush.msra.mxu1 %v3509_v5  ;;  %v3585_v17 = vld [vmem:[%s4940_s3 + $0x98] sm:$0xff]  ;;  %v3591_v18 = vld [vmem:[%s4940_s3 + $0x30] sm:$0xff]  ;;  %v3603_v20 = vld [vmem:[%s4940_s3 + $0x28] sm:$0xff]  ;;  %s3905_s29 = scalar_lea.vmem %s4941_s4, %s3206_s24  ;;  %s4672_s28 = scalar_lea.vmem %s4942_s5, %s3206_s24 }
  0x31   : > { %456 = vmatpush.msra.mxu0 %v3514_v6  ;;  %v3598_v19 = vld [vmem:[%s4940_s3 + $0x90] sm:$0xff]  ;;  %4957 = vst [vmem:[#allocation5_spill] sm:$0xff] %v3603_v20  ;;  %v3610_v21 = vld [vmem:[%s4940_s3 + $0x88] sm:$0xff]  ;;  %v3620_v22 = vld [vmem:[%s4940_s3 + $0x20] sm:$0xff] }
  0x32   : > { %561 = vmatpush.msra.mxu1 %v3521_v7  ;;  %4958 = vst [vmem:[#allocation6_spill] sm:$0xff] %v3620_v22  ;;  %v3627_v23 = vld [vmem:[%s4940_s3 + $0x80] sm:$0xff]  ;;  %v3632_v24 = vld [vmem:[%s4940_s3 + $0x18] sm:$0xff]  ;;  %v313_v25 = vld [vmem:[%s3615_s16 + $0x8] sm:$0xff] }
  0x33   : > { %457 = vmatpush.msra.mxu0 %v3526_v8  ;;  %4959 = vst [vmem:[#allocation7_spill] sm:$0xff] %v3632_v24  ;;  %v3640_v26 = vld [vmem:[%s4940_s3 + $0x10] sm:$0xff]  ;;  %v3648_v27 = vld [vmem:[%s4940_s3 + $0x8] sm:$0xff]  ;;  %v3654_v28 = vld [vmem:[%s4940_s3] sm:$0xff] }
  0x34   : > { %562 = vmatpush.msra.mxu1 %v3533_v9  ;;  %4960 = vst [vmem:[#allocation8_spill] sm:$0xff] %v3640_v26  ;;  %v312_v29 = vld [vmem:[%s3615_s16] sm:$0xff]  ;;  %v315_v30 = vld [vmem:[%s3615_s16 + $0x18] sm:$0xff]  ;;  %v314_v31 = vld [vmem:[%s3615_s16 + $0x10] sm:$0xff] }
  0x35   : > { %458 = vmatpush.msra.mxu0 %v3539_v10  ;;  %4961 = vst [vmem:[#allocation9_spill] sm:$0xff] %v3648_v27  ;;  %v317_v32 = vld [vmem:[%s3615_s16 + $0x28] sm:$0xff]  ;;  %v316_v33 = vld [vmem:[%s3615_s16 + $0x20] sm:$0xff]  ;;  %v319_v34 = vld [vmem:[%s3615_s16 + $0x38] sm:$0xff] }
  0x36   : > { %563 = vmatpush.msra.mxu1 %v3546_v11  ;;  %4962 = vst [vmem:[#allocation10_spill] sm:$0xff] %v3654_v28  ;;  %v318_v35 = vld [vmem:[%s3615_s16 + $0x30] sm:$0xff]  ;;  %v321_v36 = vld [vmem:[%s3615_s16 + $0x48] sm:$0xff]  ;;  %v320_v37 = vld [vmem:[%s3615_s16 + $0x40] sm:$0xff] }
  0x37   : > { %459 = vmatpush.msra.mxu0 %v3551_v12  ;;  %v323_v38 = vld [vmem:[%s3615_s16 + $0x58] sm:$0xff]  ;;  %v322_v39 = vld [vmem:[%s3615_s16 + $0x50] sm:$0xff]  ;;  %v325_v40 = vld [vmem:[%s3615_s16 + $0x68] sm:$0xff] }
  0x38   : > { %564 = vmatpush.msra.mxu1 %v3558_v13  ;;  %v324_v41 = vld [vmem:[%s3615_s16 + $0x60] sm:$0xff]  ;;  %v327_v42 = vld [vmem:[%s3615_s16 + $0x78] sm:$0xff]  ;;  %v326_v43 = vld [vmem:[%s3615_s16 + $0x70] sm:$0xff] }
  0x39   : > { %460 = vmatpush.msra.mxu0 %v3566_v14  ;;  %v329_v44 = vld [vmem:[%s3615_s16 + $0x88] sm:$0xff]  ;;  %v328_v45 = vld [vmem:[%s3615_s16 + $0x80] sm:$0xff]  ;;  %v331_v46 = vld [vmem:[%s3615_s16 + $0x98] sm:$0xff] }
  0x3a   : > { %565 = vmatpush.msra.mxu1 %v3573_v15  ;;  %v330_v47 = vld [vmem:[%s3615_s16 + $0x90] sm:$0xff]  ;;  %v333_v48 = vld [vmem:[%s3615_s16 + $0xa8] sm:$0xff]  ;;  %v332_v49 = vld [vmem:[%s3615_s16 + $0xa0] sm:$0xff] }
  0x3b   : > { %461 = vmatpush.msra.mxu0 %v3578_v16  ;;  %v335_v50 = vld [vmem:[%s3615_s16 + $0xb8] sm:$0xff]  ;;  %v334_v51 = vld [vmem:[%s3615_s16 + $0xb0] sm:$0xff]  ;;  %v337_v52 = vld [vmem:[%s3615_s16 + $0xc8] sm:$0xff] }
  0x3c   : > { %566 = vmatpush.msra.mxu1 %v3585_v17  ;;  %v336_v53 = vld [vmem:[%s3615_s16 + $0xc0] sm:$0xff]  ;;  %v339_v54 = vld [vmem:[%s3615_s16 + $0xd8] sm:$0xff]  ;;  %v338_v55 = vld [vmem:[%s3615_s16 + $0xd0] sm:$0xff] }
  0x3d   : > { %462 = vmatpush.msra.mxu0 %v3591_v18  ;;  %v341_v56 = vld [vmem:[%s3615_s16 + $0xe8] sm:$0xff]  ;;  %v340_v57 = vld [vmem:[%s3615_s16 + $0xe0] sm:$0xff]  ;;  %v343_v58 = vld [vmem:[%s3615_s16 + $0xf8] sm:$0xff] }
  0x3e   : > { %567 = vmatpush.msra.mxu1 %v3598_v19  ;;  %v342_v59 = vld [vmem:[%s3615_s16 + $0xf0] sm:$0xff]  ;;  %v345_v61 = vld [vmem:[%s3615_s16 + $0x108] sm:$0xff]  ;;  %v344_v63 = vld [vmem:[%s3615_s16 + $0x100] sm:$0xff] }
  0x3f   : > { %463 = vmatpush.msra.mxu0 %v3603_v20 }
  0x40   : > { %568 = vmatpush.msra.mxu1 %v3610_v21 }
  0x41   : > { %464 = vmatpush.msra.mxu0 %v3620_v22 }
  0x42   : > { %569 = vmatpush.msra.mxu1 %v3627_v23 }
  0x43   : > { %465 = vmatpush.msra.mxu0 %v3632_v24  ;;  %2788 = vmatmul.msk.f32.vlgmr.msra.gmra.mxu1 %vm368_vm0, %v313_v25 }
  0x45   : > { %466 = vmatpush.msra.mxu0 %v3640_v26 }
  0x47   : > { %467 = vmatpush.msra.mxu0 %v3648_v27 }
  0x49   : > { %468 = vmatpush.msra.mxu0 %v3654_v28 }
  0x4a   : > { %469 = vmatmul.f32.vlgmr.msra.gmra.mxu0 %v312_v29  ;;  %v347_v29 = vld [vmem:[%s3615_s16 + $0x118] sm:$0xff] }
  0x4b   : > { %2789 = vmatmul.msk.f32.gmra.mxu1 %vm368_vm0, %v315_v30 }
  0x52   : > { %472 = vmatmul.f32.gmra.mxu0 %v314_v31  ;;  %v346_v31 = vld [vmem:[%s3615_s16 + $0x110] sm:$0xff] }
  0x53   : > { %2790 = vmatmul.msk.f32.gmra.mxu1 %vm368_vm0, %v317_v32 }
  0x5a   : > { %475 = vmatmul.f32.gmra.mxu0 %v316_v33  ;;  %v349_v33 = vld [vmem:[%s3615_s16 + $0x128] sm:$0xff] }
  0x5b   : > { %2791 = vmatmul.msk.f32.gmra.mxu1 %vm368_vm0, %v319_v34 }
  0x62   : > { %478 = vmatmul.f32.gmra.mxu0 %v318_v35  ;;  %v348_v35 = vld [vmem:[%s3615_s16 + $0x120] sm:$0xff] }
  0x63   : > { %2792 = vmatmul.msk.f32.gmra.mxu1 %vm368_vm0, %v321_v36 }
  0x6a   : > { %481 = vmatmul.f32.gmra.mxu0 %v320_v37  ;;  %v351_v37 = vld [vmem:[%s3615_s16 + $0x138] sm:$0xff] }
  0x6b   : > { %2793 = vmatmul.msk.f32.gmra.mxu1 %vm368_vm0, %v323_v38 }
  0x72   : > { %484 = vmatmul.f32.gmra.mxu0 %v322_v39  ;;  %v350_v39 = vld [vmem:[%s3615_s16 + $0x130] sm:$0xff] }
  0x73   : > { %2794 = vmatmul.msk.f32.gmra.mxu1 %vm368_vm0, %v325_v40 }
  0x7a   : > { %487 = vmatmul.f32.gmra.mxu0 %v324_v41  ;;  %v353_v41 = vld [vmem:[%s3615_s16 + $0x148] sm:$0xff] }
  0x7b   : > { %2795 = vmatmul.msk.f32.gmra.mxu1 %vm368_vm0, %v327_v42 }
  0x82   : > { %490 = vmatmul.f32.gmra.mxu0 %v326_v43  ;;  %v352_v43 = vld [vmem:[%s3615_s16 + $0x140] sm:$0xff] }
  0x83   : > { %2796 = vmatmul.msk.f32.gmra.mxu1 %vm368_vm0, %v329_v44 }
  0x8a   : > { %493 = vmatmul.f32.gmra.mxu0 %v328_v45  ;;  %v355_v45 = vld [vmem:[%s3615_s16 + $0x158] sm:$0xff] }
  0x8b   : > { %2797 = vmatmul.msk.f32.gmra.mxu1 %vm368_vm0, %v331_v46 }
  0x92   : > { %496 = vmatmul.f32.gmra.mxu0 %v330_v47  ;;  %v354_v47 = vld [vmem:[%s3615_s16 + $0x150] sm:$0xff] }
  0x93   : > { %2798 = vmatmul.msk.f32.gmra.mxu1 %vm368_vm0, %v333_v48 }
  0x9a   : > { %499 = vmatmul.f32.gmra.mxu0 %v332_v49  ;;  %v357_v49 = vld [vmem:[%s3615_s16 + $0x168] sm:$0xff] }
  0x9b   : > { %2799 = vmatmul.msk.f32.gmra.mxu1 %vm368_vm0, %v335_v50 }
  0xa2   : > { %502 = vmatmul.f32.gmra.mxu0 %v334_v51  ;;  %v356_v51 = vld [vmem:[%s3615_s16 + $0x160] sm:$0xff] }
  0xa3   : > { %2800 = vmatmul.msk.f32.gmra.mxu1 %vm368_vm0, %v337_v52 }
  0xaa   : > { %505 = vmatmul.f32.gmra.mxu0 %v336_v53  ;;  %v359_v53 = vld [vmem:[%s3615_s16 + $0x178] sm:$0xff] }
  0xab   : > { %2801 = vmatmul.msk.f32.gmra.mxu1 %vm368_vm0, %v339_v54 }
  0xb2   : > { %508 = vmatmul.f32.gmra.mxu0 %v338_v55  ;;  %v358_v55 = vld [vmem:[%s3615_s16 + $0x170] sm:$0xff] }
  0xb3   : > { %2802 = vmatmul.msk.f32.gmra.mxu1 %vm368_vm0, %v341_v56 }
  0xba   : > { %511 = vmatmul.f32.gmra.mxu0 %v340_v57  ;;  %v361_v57 = vld [vmem:[%s3615_s16 + $0x188] sm:$0xff] }
  0xbb   : > { %2803 = vmatmul.msk.f32.gmra.mxu1 %vm368_vm0, %v343_v58 }
  0xc0   : > { %v3704_v60 = vpop.f32.mrf.mxu1 }
  0xc2   : > { %514 = vmatmul.f32.gmra.mxu0 %v342_v59  ;;  %v360_v59 = vld [vmem:[%s3615_s16 + $0x180] sm:$0xff] }
  0xc3   : > { %2804 = vmatmul.msk.f32.gmra.mxu1 %vm368_vm0, %v345_v61 }
  0xc7   : > { %v3708_v62 = vpop.f32.mrf.mxu0 }
  0xc8   : > { %v3711_v25 = vpop.f32.mrf.mxu1 }
  0xca   : > { %517 = vmatmul.f32.gmra.mxu0 %v344_v63  ;;  %v363_v63 = vld [vmem:[%s3615_s16 + $0x198] sm:$0xff] }
  0xcb   : > { %2805 = vmatmul.msk.f32.gmra.mxu1 %vm368_vm0, %v347_v29 }
  0xcf   : > { %v3715_v30 = vpop.f32.mrf.mxu0 }
  0xd0   : > { %v3718_v32 = vpop.f32.mrf.mxu1 }
  0xd2   : > { %520 = vmatmul.f32.gmra.mxu0 %v346_v31  ;;  %v362_v31 = vld [vmem:[%s3615_s16 + $0x190] sm:$0xff] }
  0xd3   : > { %2806 = vmatmul.msk.f32.gmra.mxu1 %vm368_vm0, %v349_v33 }
  0xd7   : > { %v3722_v34 = vpop.f32.mrf.mxu0 }
  0xd8   : > { %v3725_v36 = vpop.f32.mrf.mxu1 }
  0xda   : > { %523 = vmatmul.f32.gmra.mxu0 %v348_v35  ;;  %v365_v35 = vld [vmem:[%s3615_s16 + $0x1a8] sm:$0xff] }
  0xdb   : > { %2807 = vmatmul.msk.f32.gmra.mxu1 %vm368_vm0, %v351_v37 }
  0xdf   : > { %v3729_v38 = vpop.f32.mrf.mxu0 }
  0xe0   : > { %v3732_v40 = vpop.f32.mrf.mxu1 }
  0xe2   : > { %526 = vmatmul.f32.gmra.mxu0 %v350_v39  ;;  %v364_v39 = vld [vmem:[%s3615_s16 + $0x1a0] sm:$0xff] }
  0xe3   : > { %2808 = vmatmul.msk.f32.gmra.mxu1 %vm368_vm0, %v353_v41 }
  0xe7   : > { %v3736_v42 = vpop.f32.mrf.mxu0 }
  0xe8   : > { %v3739_v44 = vpop.f32.mrf.mxu1 }
  0xea   : > { %529 = vmatmul.f32.gmra.mxu0 %v352_v43  ;;  %v367_v43 = vld [vmem:[%s3615_s16 + $0x1b8] sm:$0xff] }
  0xeb   : > { %2809 = vmatmul.msk.f32.gmra.mxu1 %vm368_vm0, %v355_v45 }
  0xef   : > { %v3743_v46 = vpop.f32.mrf.mxu0 }
  0xf0   : > { %v3746_v48 = vpop.f32.mrf.mxu1 }
  0xf2   : > { %532 = vmatmul.f32.gmra.mxu0 %v354_v47  ;;  %v366_v47 = vld [vmem:[%s3615_s16 + $0x1b0] sm:$0xff] }
  0xf3   : > { %2810 = vmatmul.msk.f32.gmra.mxu1 %vm368_vm0, %v357_v49 }
  0xf7   : > { %v3750_v50 = vpop.f32.mrf.mxu0 }
  0xf8   : > { %v592_v52 = vpop.f32.mrf.mxu1 }
  0xfa   : > { %535 = vmatmul.f32.gmra.mxu0 %v356_v51 }
  0xfb   : > { %2811 = vmatmul.msk.f32.gmra.mxu1 %vm368_vm0, %v359_v53 }
  0xff   : > { %v491_v54 = vpop.f32.mrf.mxu0 }
 0x100   : > { %v595_v56 = vpop.f32.mrf.mxu1 }
 0x102   : > { %538 = vmatmul.f32.gmra.mxu0 %v358_v55 }
 0x103   : > { %2812 = vmatmul.msk.f32.gmra.mxu1 %vm368_vm0, %v361_v57 }
 0x107   : > { %v494_v58 = vpop.f32.mrf.mxu0 }
 0x108   : > { %v598_v61 = vpop.f32.mrf.mxu1 }
 0x10a   : > { %541 = vmatmul.f32.gmra.mxu0 %v360_v59 }
 0x10b   : > { %2813 = vmatmul.msk.f32.gmra.mxu1 %vm368_vm0, %v363_v63 }
 0x10f   : > { %v497_v29 = vpop.f32.mrf.mxu0 }
 0x110   : > { %v601_v33 = vpop.f32.mrf.mxu1  ;;  %v599_v20 = vadd.f32 %v598_v61, %v497_v29  ;;  %v3813_v29 = vld [vmem:[%s4939_s2 + $0x10] sm:$0xff] }
 0x112   : > { %544 = vmatmul.f32.gmra.mxu0 %v362_v31 }
 0x113   : > { %2814 = vmatmul.msk.f32.gmra.mxu1 %vm368_vm0, %v365_v35 }
 0x117   : > { %v500_v37 = vpop.f32.mrf.mxu0 }
 0x118   : > { %v604_v41 = vpop.f32.mrf.mxu1  ;;  %v602_v22 = vadd.f32 %v601_v33, %v500_v37 }
 0x11a   : > { %547 = vmatmul.f32.gmra.mxu0 %v364_v39 }
 0x11b   : > { %2815 = vmatmul.msk.f32.gmra.mxu1 %vm368_vm0, %v367_v43 }
 0x11f   : > { %v503_v45 = vpop.f32.mrf.mxu0 }
 0x120   : > { %v607_v49 = vpop.f32.mrf.mxu1 }
 0x122   : > { %550 = vmatmul.f32.gmra.mxu0 %v366_v47  ;;  %v605_v47 = vadd.f32 %v604_v41, %v503_v45  ;;  %v587_v41 = vadd.f32 %v3739_v44, %v3743_v46  ;;  %v572_v44 = vadd.f32 %v3704_v60, %v3708_v62 }
 0x127   : > { %v506_v51 = vpop.f32.mrf.mxu0 }
 0x128   : > { %v610_v53 = vpop.f32.mrf.mxu1  ;;  %v608_v43 = vadd.f32 %v607_v49, %v506_v51  ;;  %v590_v49 = vadd.f32 %v3746_v48, %v3750_v50  ;;  %v575_v48 = vadd.f32 %v3711_v25, %v3715_v30 }
 0x12f   : > { %v509_v55 = vpop.f32.mrf.mxu0 }
 0x130   : > { %v613_v57 = vpop.f32.mrf.mxu1  ;;  %v611_v39 = vadd.f32 %v610_v53, %v509_v55  ;;  %v3824_v53 = vld [vmem:[%s4939_s2 + $0x8] sm:$0xff] }
 0x131   : > { %v2819_v55 = vld [vmem:[%s3615_s16 + $0x1c8] sm:$0xff] }
 0x137   : > { %v512_v59 = vpop.f32.mrf.mxu0 }
 0x138   : > { %v616_v63 = vpop.f32.mrf.mxu1  ;;  %v614_v27 = vadd.f32 %v613_v57, %v512_v59  ;;  %v4965_v57 = vld [vmem:[#allocation7_spill] sm:$0xff]  ;;  %v4966_v59 = vld [vmem:[#allocation8_spill] sm:$0xff] }
 0x13f   : > { %v515_v31 = vpop.f32.mrf.mxu0 }
 0x140   : > { %v617_v28 = vadd.f32 %v616_v63, %v515_v31  ;;  %v3768_v35 = vpop.f32.mrf.mxu1  ;;  %v596_v63 = vadd.f32 %v595_v56, %v494_v58  ;;  %v581_v56 = vadd.f32 %v3725_v36, %v3729_v38 }
 0x142   : > { %661 = vmatpush.msra.mxu2 %v617_v28  ;;  %v593_v28 = vadd.f32 %v592_v52, %v491_v54  ;;  %v578_v54 = vadd.f32 %v3718_v32, %v3722_v34 }
 0x144   : > { %662 = vmatpush.msra.mxu2 %v614_v27 }
 0x146   : > { %663 = vmatpush.msra.mxu2 %v611_v39  ;;  %v2818_v39 = vld [vmem:[%s3615_s16 + $0x1c0] sm:$0xff] }
 0x147   : > { %v3770_v26 = vpop.f32.mrf.mxu0 }
 0x148   : > { %664 = vmatpush.msra.mxu2 %v608_v43  ;;  %v3772_v24 = vpop.f32.mrf.mxu1  ;;  %v620_v51 = vadd.f32 %v3768_v35, %v3770_v26  ;;  %v2821_v26 = vld [vmem:[%s3615_s16 + $0x1d8] sm:$0xff]  ;;  %v4967_v35 = vld [vmem:[#allocation9_spill] sm:$0xff]  ;;  %v4968_v43 = vld [vmem:[#allocation10_spill] sm:$0xff] }
 0x14a   : > { %665 = vmatpush.msra.mxu2 %v605_v47  ;;  %v2827_v47 = vld [vmem:[%s3615_s16 + $0x208] sm:$0xff] }
 0x14c   : > { %666 = vmatpush.msra.mxu2 %v602_v22  ;;  %v584_v22 = vadd.f32 %v3732_v40, %v3736_v42 }
 0x14e   : > { %667 = vmatpush.msra.mxu2 %v599_v20 }
 0x14f   : > { %v3774_v31 = vpop.f32.mrf.mxu0 }
 0x150   : > { %668 = vmatpush.msra.mxu2 %v596_v63  ;;  %v3776_v27 = vpop.f32.mrf.mxu1  ;;  %v623_v45 = vadd.f32 %v3772_v24, %v3774_v31  ;;  %v3837_v24 = vld [vmem:[%s4939_s2 + $0x18] sm:$0xff]  ;;  %v2820_v63 = vld [vmem:[%s3615_s16 + $0x1d0] sm:$0xff] }
 0x151   : > { %v2829_v31 = vld [vmem:[%s3615_s16 + $0x218] sm:$0xff] }
 0x152   : > { %669 = vmatpush.msra.mxu2 %v593_v28  ;;  %v2822_v28 = vld [vmem:[%s3615_s16 + $0x1e0] sm:$0xff] }
 0x154   : > { %670 = vmatpush.msra.mxu2 %v590_v49  ;;  %v2824_v49 = vld [vmem:[%s3615_s16 + $0x1f0] sm:$0xff] }
 0x156   : > { %671 = vmatpush.msra.mxu2 %v587_v41  ;;  %v2833_v41 = vld [vmem:[%s3615_s16 + $0x238] sm:$0xff] }
 0x157   : > { %v524_v20 = vpop.f32.mrf.mxu0 }
 0x158   : > { %672 = vmatpush.msra.mxu2 %v584_v22  ;;  %v628_v52 = vpop.f32.mrf.mxu1  ;;  %v626_v37 = vadd.f32 %v3776_v27, %v524_v20  ;;  %v2831_v27 = vld [vmem:[%s3615_s16 + $0x228] sm:$0xff]  ;;  %v2826_v22 = vld [vmem:[%s3615_s16 + $0x200] sm:$0xff] }
 0x159   : > { %v2835_v20 = vld [vmem:[%s3615_s16 + $0x248] sm:$0xff] }
 0x15a   : > { %673 = vmatpush.msra.mxu2 %v581_v56  ;;  %v2828_v56 = vld [vmem:[%s3615_s16 + $0x210] sm:$0xff] }
 0x15c   : > { %674 = vmatpush.msra.mxu2 %v578_v54  ;;  %v2830_v54 = vld [vmem:[%s3615_s16 + $0x220] sm:$0xff] }
 0x15e   : > { %675 = vmatpush.msra.mxu2 %v575_v48  ;;  %v2839_v48 = vld [vmem:[%s3615_s16 + $0x268] sm:$0xff] }
 0x15f   : > { %v527_v46 = vpop.f32.mrf.mxu0 }
 0x160   : > { %676 = vmatpush.msra.mxu2 %v572_v44  ;;  %v631_v40 = vpop.f32.mrf.mxu1  ;;  %v629_v33 = vadd.f32 %v628_v52, %v527_v46  ;;  %v2837_v52 = vld [vmem:[%s3615_s16 + $0x258] sm:$0xff]  ;;  %v2832_v44 = vld [vmem:[%s3615_s16 + $0x230] sm:$0xff] }
 0x161   : > { %v2841_v46 = vld [vmem:[%s3615_s16 + $0x278] sm:$0xff] }
 0x162   : > { %956 = vmatpush.msrb.mxu2 %v3492_v2 }
 0x164   : > { %957 = vmatpush.msrb.mxu2 %v3503_v4 }
 0x166   : > { %958 = vmatpush.msrb.mxu2 %v3509_v5 }
 0x167   : > { %v530_v36 = vpop.f32.mrf.mxu0 }
 0x168   : > { %959 = vmatpush.msrb.mxu2 %v3521_v7  ;;  %v634_v32 = vpop.f32.mrf.mxu1  ;;  %v632_v61 = vadd.f32 %v631_v40, %v530_v36  ;;  %v2834_v40 = vld [vmem:[%s3615_s16 + $0x240] sm:$0xff]  ;;  %v2843_v36 = vld [vmem:[%s3615_s16 + $0x288] sm:$0xff] }
 0x16a   : > { %960 = vmatpush.msrb.mxu2 %v3533_v9 }
 0x16c   : > { %961 = vmatpush.msrb.mxu2 %v3546_v11 }
 0x16e   : > { %962 = vmatpush.msrb.mxu2 %v3558_v13 }
 0x16f   : > { %v533_v60 = vpop.f32.mrf.mxu0 }
 0x170   : > { %963 = vmatpush.msrb.mxu2 %v3573_v15  ;;  %v637_v62 = vpop.f32.mrf.mxu1  ;;  %v635_v58 = vadd.f32 %v634_v32, %v533_v60  ;;  %v2836_v32 = vld [vmem:[%s3615_s16 + $0x250] sm:$0xff]  ;;  %v2845_v60 = vld [vmem:[%s3615_s16 + $0x298] sm:$0xff] }
 0x172   : > { %964 = vmatpush.msrb.mxu2 %v3585_v17 }
 0x174   : > { %965 = vmatpush.msrb.mxu2 %v3598_v19 }
 0x176   : > { %966 = vmatpush.msrb.mxu2 %v3610_v21 }
 0x177   : > { %v536_v2 = vpop.f32.mrf.mxu0 }
 0x178   : > { %967 = vmatpush.msrb.mxu2 %v3627_v23  ;;  %v640_v4 = vpop.f32.mrf.mxu1  ;;  %v3807_v23 = vld [vmem:[%s4939_s2] sm:$0xff]  ;;  %v638_v50 = vadd.f32 %v637_v62, %v536_v2  ;;  %v2847_v2 = vld [vmem:[%s3615_s16 + $0x2a8] sm:$0xff] }
 0x179   : > { %677 = vmatmul.f32.vlgmr.msra.gmra.mxu2 %v3807_v23  ;;  %v2838_v62 = vld [vmem:[%s3615_s16 + $0x260] sm:$0xff] }
 0x17f   : > { %v539_v5 = vpop.f32.mrf.mxu0 }
 0x180   : > { %v643_v7 = vpop.f32.mrf.mxu1  ;;  %v641_v42 = vadd.f32 %v640_v4, %v539_v5  ;;  %v2840_v5 = vld [vmem:[%s3615_s16 + $0x270] sm:$0xff] }
 0x181   : > { %680 = vmatmul.f32.gmra.mxu2 %v3813_v29 }
 0x187   : > { %v542_v9 = vpop.f32.mrf.mxu0 }
 0x188   : > { %v646_v11 = vpop.f32.mrf.mxu1  ;;  %v644_v21 = vadd.f32 %v643_v7, %v542_v9  ;;  %v2849_v7 = vld [vmem:[%s3615_s16 + $0x2b8] sm:$0xff] }
 0x189   : > { %2874 = vmatmul.msk.f32.vlgmr.msrb.gmra.mxu2 %vm368_vm0, %v2819_v55 }
 0x18f   : > { %v545_v25 = vpop.f32.mrf.mxu0 }
 0x190   : > { %v649_v13 = vpop.f32.mrf.mxu1  ;;  %v647_v19 = vadd.f32 %v646_v11, %v545_v25  ;;  %v2842_v11 = vld [vmem:[%s3615_s16 + $0x280] sm:$0xff]  ;;  %v2851_v25 = vld [vmem:[%s3615_s16 + $0x2c8] sm:$0xff] }
 0x191   : > { %2875 = vmatmul.msk.f32.gmra.mxu2 %vm368_vm0, %v2821_v26 }
 0x197   : > { %v548_v30 = vpop.f32.mrf.mxu0 }
 0x198   : > { %v652_v34 = vpop.f32.mrf.mxu1  ;;  %v650_v17 = vadd.f32 %v649_v13, %v548_v30  ;;  %v2844_v30 = vld [vmem:[%s3615_s16 + $0x290] sm:$0xff] }
 0x19f   : > { %v551_v15 = vpop.f32.mrf.mxu0 }
 0x1a0   : > { %v653_v38 = vadd.f32 %v652_v34, %v551_v15 }
 0x1a2   : > { %688 = vmatpush.msra.mxu3 %v653_v38  ;;  %v2853_v38 = vld [vmem:[%s3615_s16 + $0x2d8] sm:$0xff] }
 0x1a4   : > { %689 = vmatpush.msra.mxu3 %v650_v17 }
 0x1a6   : > { %690 = vmatpush.msra.mxu3 %v647_v19  ;;  %v2846_v19 = vld [vmem:[%s3615_s16 + $0x2a0] sm:$0xff] }
 0x1a8   : > { %691 = vmatpush.msra.mxu3 %v644_v21 }
 0x1aa   : > { %692 = vmatpush.msra.mxu3 %v641_v42 }
 0x1ac   : > { %693 = vmatpush.msra.mxu3 %v638_v50  ;;  %v2855_v50 = vld [vmem:[%s3615_s16 + $0x2e8] sm:$0xff] }
 0x1ae   : > { %694 = vmatpush.msra.mxu3 %v635_v58 }
 0x1b0   : > { %695 = vmatpush.msra.mxu3 %v632_v61  ;;  %v2848_v61 = vld [vmem:[%s3615_s16 + $0x2b0] sm:$0xff] }
 0x1b2   : > { %696 = vmatpush.msra.mxu3 %v629_v33  ;;  %v2857_v33 = vld [vmem:[%s3615_s16 + $0x2f8] sm:$0xff] }
 0x1b4   : > { %697 = vmatpush.msra.mxu3 %v626_v37 }
 0x1b6   : > { %698 = vmatpush.msra.mxu3 %v623_v45  ;;  %v2850_v45 = vld [vmem:[%s3615_s16 + $0x2c0] sm:$0xff] }
 0x1b8   : > { %699 = vmatpush.msra.mxu3 %v620_v51  ;;  %v2859_v51 = vld [vmem:[%s3615_s16 + $0x308] sm:$0xff] }
 0x1b9   : > { %2816 = vmatmul.msk.f32.vlgmr.msra.gmra.mxu3 %vm368_vm0, %v3824_v53 }
 0x1ba   : > { %851 = vmatpush.msrb.mxu3 %v3481_v0  ;;  %v2823_v0 = vld [vmem:[%s3615_s16 + $0x1e8] sm:$0xff] }
 0x1bb   : > { %2876 = vmatmul.msk.f32.gmra.mxu2 %vm368_vm0, %v2823_v0 }
 0x1bc   : > { %852 = vmatpush.msrb.mxu3 %v3486_v1  ;;  %v4963_v1 = vld [vmem:[#allocation5_spill] sm:$0xff] }
 0x1be   : > { %853 = vmatpush.msrb.mxu3 %v3497_v3  ;;  %v4964_v3 = vld [vmem:[#allocation6_spill] sm:$0xff] }
 0x1c0   : > { %854 = vmatpush.msrb.mxu3 %v3514_v6  ;;  %v2825_v6 = vld [vmem:[%s3615_s16 + $0x1f8] sm:$0xff] }
 0x1c1   : > { %2817 = vmatmul.msk.f32.gmra.mxu3 %vm368_vm0, %v3837_v24 }
 0x1c2   : > { %855 = vmatpush.msrb.mxu3 %v3526_v8 }
 0x1c3   : > { %2877 = vmatmul.msk.f32.gmra.mxu2 %vm368_vm0, %v2825_v6  ;;  %v2852_v6 = vld [vmem:[%s3615_s16 + $0x2d0] sm:$0xff] }
 0x1c4   : > { %856 = vmatpush.msrb.mxu3 %v3539_v10 }
 0x1c6   : > { %857 = vmatpush.msrb.mxu3 %v3551_v12 }
 0x1c8   : > { %858 = vmatpush.msrb.mxu3 %v3566_v14 }
 0x1ca   : > { %859 = vmatpush.msrb.mxu3 %v3578_v16 }
 0x1cb   : > { %2878 = vmatmul.msk.f32.gmra.mxu2 %vm368_vm0, %v2827_v47 }
 0x1cc   : > { %860 = vmatpush.msrb.mxu3 %v3591_v18 }
 0x1ce   : > { %861 = vmatpush.msrb.mxu3 %v4963_v1 }
 0x1d0   : > { %862 = vmatpush.msrb.mxu3 %v4964_v3 }
 0x1d2   : > { %863 = vmatpush.msrb.mxu3 %v4965_v57 }
 0x1d3   : > { %2879 = vmatmul.msk.f32.gmra.mxu2 %vm368_vm0, %v2829_v31 }
 0x1d4   : > { %864 = vmatpush.msrb.mxu3 %v4966_v59 }
 0x1d6   : > { %865 = vmatpush.msrb.mxu3 %v4967_v35 }
 0x1d8   : > { %866 = vmatpush.msrb.mxu3 %v4968_v43 }
 0x1d9   : > { %867 = vmatmul.f32.vlgmr.msrb.gmra.mxu3 %v2818_v39  ;;  %v2861_v39 = vld [vmem:[%s3615_s16 + $0x318] sm:$0xff] }
 0x1db   : > { %2880 = vmatmul.msk.f32.gmra.mxu2 %vm368_vm0, %v2831_v27  ;;  %v2863_v27 = vld [vmem:[%s3615_s16 + $0x328] sm:$0xff] }
 0x1e1   : > { %870 = vmatmul.f32.gmra.mxu3 %v2820_v63 }
 0x1e3   : > { %2881 = vmatmul.msk.f32.gmra.mxu2 %vm368_vm0, %v2833_v41 }
 0x1e9   : > { %873 = vmatmul.f32.gmra.mxu3 %v2822_v28  ;;  %v2854_v28 = vld [vmem:[%s3615_s16 + $0x2e0] sm:$0xff] }
 0x1eb   : > { %2882 = vmatmul.msk.f32.gmra.mxu2 %vm368_vm0, %v2835_v20  ;;  %v2856_v20 = vld [vmem:[%s3615_s16 + $0x2f0] sm:$0xff] }
 0x1f1   : > { %876 = vmatmul.f32.gmra.mxu3 %v2824_v49 }
 0x1f3   : > { %2883 = vmatmul.msk.f32.gmra.mxu2 %vm368_vm0, %v2837_v52 }
 0x1f9   : > { %879 = vmatmul.f32.gmra.mxu3 %v2826_v22 }
 0x1fb   : > { %2884 = vmatmul.msk.f32.gmra.mxu2 %vm368_vm0, %v2839_v48 }
 0x1fc   : > { %v678_v4 = vpop.f32.mrf.mxu2 }
 0x201   : > { %882 = vmatmul.f32.gmra.mxu3 %v2828_v56  ;;  %v2865_v56 = vld [vmem:[%s3615_s16 + $0x338] sm:$0xff] }
 0x203   : > { %2885 = vmatmul.msk.f32.gmra.mxu2 %vm368_vm0, %v2841_v46  ;;  %v2867_v46 = vld [vmem:[%s3615_s16 + $0x348] sm:$0xff] }
 0x204   : > { %v681_v9 = vpop.f32.mrf.mxu2 }
 0x209   : > { %885 = vmatmul.f32.gmra.mxu3 %v2830_v54 }
 0x20b   : > { %2886 = vmatmul.msk.f32.gmra.mxu2 %vm368_vm0, %v2843_v36 }
 0x20c   : > { %v969_v13 = vpop.f32.mrf.mxu2 }
 0x211   : > { %888 = vmatmul.f32.gmra.mxu3 %v2832_v44  ;;  %v2858_v44 = vld [vmem:[%s3615_s16 + $0x300] sm:$0xff] }
 0x213   : > { %2887 = vmatmul.msk.f32.gmra.mxu2 %vm368_vm0, %v2845_v60  ;;  %v2869_v60 = vld [vmem:[%s3615_s16 + $0x358] sm:$0xff] }
 0x214   : > { %v972_v17 = vpop.f32.mrf.mxu2 }
 0x219   : > { %891 = vmatmul.f32.gmra.mxu3 %v2834_v40 }
 0x21b   : > { %2888 = vmatmul.msk.f32.gmra.mxu2 %vm368_vm0, %v2847_v2 }
 0x221   : > { %894 = vmatmul.f32.gmra.mxu3 %v2836_v32  ;;  %v2860_v32 = vld [vmem:[%s3615_s16 + $0x310] sm:$0xff] }
 0x223   : > { %2889 = vmatmul.msk.f32.gmra.mxu2 %vm368_vm0, %v2849_v7 }
 0x229   : > { %897 = vmatmul.f32.gmra.mxu3 %v2838_v62 }
 0x22b   : > { %2890 = vmatmul.msk.f32.gmra.mxu2 %vm368_vm0, %v2851_v25  ;;  %v2873_v25 = vld [vmem:[%s3615_s16 + $0x378] sm:$0xff] }
 0x231   : > { %900 = vmatmul.f32.gmra.mxu3 %v2840_v5  ;;  %v2871_v5 = vld [vmem:[%s3615_s16 + $0x368] sm:$0xff] }
 0x233   : > { %2891 = vmatmul.msk.f32.gmra.mxu2 %vm368_vm0, %v2853_v38 }
 0x239   : > { %903 = vmatmul.f32.gmra.mxu3 %v2842_v11  ;;  %v2864_v11 = vld [vmem:[%s3615_s16 + $0x330] sm:$0xff] }
 0x23b   : > { %2892 = vmatmul.msk.f32.gmra.mxu2 %vm368_vm0, %v2855_v50 }
 0x23c   : > { %v701_v34 = vpop.f32.mrf.mxu3 }
 0x23d   : > { %v702_v15 = vadd.f32 %v701_v34, %v678_v4  ;;  %v2862_v4 = vld [vmem:[%s3615_s16 + $0x320] sm:$0xff] }
 0x23e   : > { %v975_v58 = vpop.f32.mrf.mxu2  ;;  %v2866_v34 = vld [vmem:[%s3615_s16 + $0x340] sm:$0xff] }
 0x23f   : > { %708 = vst.msk [vmem:[%s3905_s29] sm:$0xff] %vm707_vm1, %v702_v15 }
 0x241   : > { %906 = vmatmul.f32.gmra.mxu3 %v2844_v30 }
 0x243   : > { %2893 = vmatmul.msk.f32.gmra.mxu2 %vm368_vm0, %v2857_v33 }
 0x244   : > { %v704_v21 = vpop.f32.mrf.mxu3 }
 0x245   : > { %v705_v42 = vadd.f32 %v704_v21, %v681_v9  ;;  %v2870_v21 = vld [vmem:[%s3615_s16 + $0x360] sm:$0xff] }
 0x246   : > { %v978_v37 = vpop.f32.mrf.mxu2 }
 0x247   : > { %709 = vst.msk [vmem:[%s3905_s29 + $0x8] sm:$0xff] %vm707_vm1, %v705_v42 }
 0x249   : > { %909 = vmatmul.f32.gmra.mxu3 %v2846_v19 }
 0x24b   : > { %2894 = vmatmul.msk.f32.gmra.mxu2 %vm368_vm0, %v2859_v51 }
 0x24e   : > { %v3922_v26 = vpop.f32.mrf.mxu2 }
 0x251   : > { %912 = vmatmul.f32.gmra.mxu3 %v2848_v61 }
 0x253   : > { %2895 = vmatmul.msk.f32.gmra.mxu2 %vm368_vm0, %v2861_v39 }
 0x256   : > { %v3929_v63 = vpop.f32.mrf.mxu2 }
 0x259   : > { %915 = vmatmul.f32.gmra.mxu3 %v2850_v45 }
 0x25b   : > { %2896 = vmatmul.msk.f32.gmra.mxu2 %vm368_vm0, %v2863_v27 }
 0x25c   : > { %v868_v55 = vpop.f32.mrf.mxu3 }
 0x25d   : > { %v3924_v0 = vadd.f32 %v969_v13, %v868_v55 }
 0x25e   : > { %v3936_v41 = vpop.f32.mrf.mxu2 }
 0x261   : > { %918 = vmatmul.f32.gmra.mxu3 %v2852_v6 }
 0x263   : > { %2897 = vmatmul.msk.f32.gmra.mxu2 %vm368_vm0, %v2865_v56 }
 0x264   : > { %v871_v47 = vpop.f32.mrf.mxu3 }
 0x265   : > { %v3931_v31 = vadd.f32 %v972_v17, %v871_v47  ;;  %v2868_v17 = vld [vmem:[%s3615_s16 + $0x350] sm:$0xff] }
 0x266   : > { %v3943_v54 = vpop.f32.mrf.mxu2 }
 0x269   : > { %921 = vmatmul.f32.gmra.mxu3 %v2854_v28 }
 0x26b   : > { %2898 = vmatmul.msk.f32.gmra.mxu2 %vm368_vm0, %v2867_v46 }
 0x26c   : > { %v874_v49 = vpop.f32.mrf.mxu3 }
 0x26d   : > { %v3938_v22 = vadd.f32 %v975_v58, %v874_v49  ;;  %v2872_v58 = vld [vmem:[%s3615_s16 + $0x370] sm:$0xff] }
 0x26e   : > { %v993_v36 = vpop.f32.mrf.mxu2 }
 0x271   : > { %924 = vmatmul.f32.gmra.mxu3 %v2856_v20 }
 0x273   : > { %2899 = vmatmul.msk.f32.gmra.mxu2 %vm368_vm0, %v2869_v60 }
 0x274   : > { %v877_v52 = vpop.f32.mrf.mxu3 }
 0x275   : > { %v3945_v48 = vadd.f32 %v978_v37, %v877_v52 }
 0x276   : > { %v996_v2 = vpop.f32.mrf.mxu2 }
 0x279   : > { %927 = vmatmul.f32.gmra.mxu3 %v2858_v44 }
 0x27b   : > { %2900 = vmatmul.msk.f32.gmra.mxu2 %vm368_vm0, %v2871_v5 }
 0x27c   : > { %v3950_v40 = vpop.f32.mrf.mxu3 }
 0x27e   : > { %v999_v9 = vpop.f32.mrf.mxu2 }
 0x281   : > { %930 = vmatmul.f32.gmra.mxu3 %v2860_v32 }
 0x283   : > { %2901 = vmatmul.msk.f32.gmra.mxu2 %vm368_vm0, %v2873_v25 }
 0x284   : > { %v883_v62 = vpop.f32.mrf.mxu3 }
 0x286   : > { %v1002_v30 = vpop.f32.mrf.mxu2 }
 0x289   : > { %933 = vmatmul.f32.gmra.mxu3 %v2862_v4 }
 0x28c   : > { %v886_v7 = vpop.f32.mrf.mxu3 }
 0x28d   : > { %v988_v25 = vadd.f32 %v3936_v41, %v886_v7 }
 0x28e   : > { %v1005_v38 = vpop.f32.mrf.mxu2 }
 0x291   : > { %936 = vmatmul.f32.gmra.mxu3 %v2864_v11 }
 0x294   : > { %v889_v13 = vpop.f32.mrf.mxu3 }
 0x295   : > { %v991_v11 = vadd.f32 %v3943_v54, %v889_v13 }
 0x296   : > { %v1008_v42 = vpop.f32.mrf.mxu2 }
 0x299   : > { %939 = vmatmul.f32.gmra.mxu3 %v2866_v34  ;;  %v985_v34 = vadd.f32 %v3929_v63, %v883_v62  ;;  %v3991_v63 = vld [vmem:[%s4940_s3 + $0x78] sm:$0xff] }
 0x29c   : > { %v892_v15 = vpop.f32.mrf.mxu3 }
 0x29d   : > { %v994_v4 = vadd.f32 %v993_v36, %v892_v15 }
 0x29e   : > { %v1011_v61 = vpop.f32.mrf.mxu2 }
 0x2a1   : > { %942 = vmatmul.f32.gmra.mxu3 %v2868_v17 }
 0x2a4   : > { %v895_v19 = vpop.f32.mrf.mxu3 }
 0x2a5   : > { %v997_v32 = vadd.f32 %v996_v2, %v895_v19  ;;  %v2906_v19 = vld [vmem:[%s3615_s16 + $0x380] sm:$0xff] }
 0x2a6   : > { %v1014_v37 = vpop.f32.mrf.mxu2 }
 0x2a9   : > { %945 = vmatmul.f32.gmra.mxu3 %v2870_v21 }
 0x2ac   : > { %v898_v50 = vpop.f32.mrf.mxu3 }
 0x2ad   : > { %v1000_v46 = vadd.f32 %v999_v9, %v898_v50  ;;  %v982_v9 = vadd.f32 %v3922_v26, %v3950_v40  ;;  %v3998_v26 = vld [vmem:[%s4940_s3 + $0x70] sm:$0xff] }
 0x2ae   : > { %v3965_v55 = vpop.f32.mrf.mxu2 }
 0x2b1   : > { %948 = vmatmul.f32.gmra.mxu3 %v2872_v58  ;;  %v2908_v58 = vld [vmem:[%s3615_s16 + $0x390] sm:$0xff] }
 0x2b4   : > { %v901_v33 = vpop.f32.mrf.mxu3 }
 0x2b5   : > { %v1003_v44 = vadd.f32 %v1002_v30, %v901_v33  ;;  %v4038_v33 = vld [vmem:[%s4940_s3 + $0xd8] sm:$0xff] }
 0x2b6   : > { %v3967_v39 = vpop.f32.mrf.mxu2 }
 0x2bc   : > { %v904_v45 = vpop.f32.mrf.mxu3 }
 0x2bd   : > { %v1006_v56 = vadd.f32 %v1005_v38, %v904_v45  ;;  %v4052_v45 = vld [vmem:[%s4940_s3 + $0xc8] sm:$0xff] }
 0x2be   : > { %v3969_v49 = vpop.f32.mrf.mxu2 }
 0x2c4   : > { %v907_v51 = vpop.f32.mrf.mxu3 }
 0x2c5   : > { %v1009_v20 = vadd.f32 %v1008_v42, %v907_v51  ;;  %v2910_v51 = vld [vmem:[%s3615_s16 + $0x3a0] sm:$0xff] }
 0x2c6   : > { %v3973_v60 = vpop.f32.mrf.mxu2 }
 0x2cc   : > { %v910_v6 = vpop.f32.mrf.mxu3 }
 0x2cd   : > { %v1012_v27 = vadd.f32 %v1011_v61, %v910_v6  ;;  %v4073_v6 = vld [vmem:[%s4940_s3 + $0xb0] sm:$0xff] }
 0x2ce   : > { %v1029_v30 = vpop.f32.mrf.mxu2 }
 0x2d4   : > { %v913_v47 = vpop.f32.mrf.mxu3 }
 0x2d5   : > { %v1015_v28 = vadd.f32 %v1014_v37, %v913_v47  ;;  %v4046_v37 = vld [vmem:[%s4940_s3 + $0xd0] sm:$0xff] }
 0x2d6   : > { %v1032_v41 = vpop.f32.mrf.mxu2  ;;  %v2912_v47 = vld [vmem:[%s3615_s16 + $0x3b0] sm:$0xff] }
 0x2d7   : > { %1053 = vmatpush.msrb.mxu1 %v1015_v28  ;;  %v4092_v28 = vld [vmem:[%s4940_s3 + $0x98] sm:$0xff] }
 0x2d9   : > { %1054 = vmatpush.msrb.mxu1 %v1012_v27  ;;  %v4098_v27 = vld [vmem:[%s4940_s3 + $0x90] sm:$0xff] }
 0x2db   : > { %1055 = vmatpush.msrb.mxu1 %v1009_v20  ;;  %v2907_v20 = vld [vmem:[%s3615_s16 + $0x388] sm:$0xff] }
 0x2dc   : > { %v3971_v52 = vpop.f32.mrf.mxu3 }
 0x2dd   : > { %1056 = vmatpush.msrb.mxu1 %v1006_v56  ;;  %v1018_v61 = vadd.f32 %v3965_v55, %v3971_v52  ;;  %v4065_v55 = vld [vmem:[%s4940_s3 + $0xb8] sm:$0xff]  ;;  %v2914_v56 = vld [vmem:[%s3615_s16 + $0x3c0] sm:$0xff] }
 0x2de   : > { %v4112_v52 = vld [vmem:[%s4940_s3 + $0x80] sm:$0xff] }
 0x2df   : > { %1057 = vmatpush.msrb.mxu1 %v1003_v44  ;;  %v2909_v44 = vld [vmem:[%s3615_s16 + $0x398] sm:$0xff] }
 0x2e1   : > { %1058 = vmatpush.msrb.mxu1 %v1000_v46  ;;  %v2916_v46 = vld [vmem:[%s3615_s16 + $0x3d0] sm:$0xff] }
 0x2e3   : > { %1059 = vmatpush.msrb.mxu1 %v997_v32  ;;  %v2911_v32 = vld [vmem:[%s3615_s16 + $0x3a8] sm:$0xff] }
 0x2e4   : > { %v3975_v5 = vpop.f32.mrf.mxu3 }
 0x2e5   : > { %1060 = vmatpush.msrb.mxu1 %v994_v4  ;;  %v1021_v50 = vadd.f32 %v3967_v39, %v3975_v5  ;;  %v4079_v39 = vld [vmem:[%s4940_s3 + $0xa8] sm:$0xff]  ;;  %v2913_v4 = vld [vmem:[%s3615_s16 + $0x3b8] sm:$0xff]  ;;  %v2920_v5 = vld [vmem:[%s3615_s16 + $0x3f0] sm:$0xff] }
 0x2e7   : > { %1061 = vmatpush.msrb.mxu1 %v991_v11  ;;  %v2915_v11 = vld [vmem:[%s3615_s16 + $0x3c8] sm:$0xff] }
 0x2e9   : > { %1062 = vmatpush.msrb.mxu1 %v988_v25  ;;  %v2922_v25 = vld [vmem:[%s3615_s16 + $0x400] sm:$0xff] }
 0x2eb   : > { %1063 = vmatpush.msrb.mxu1 %v985_v34  ;;  %v2917_v34 = vld [vmem:[%s3615_s16 + $0x3d8] sm:$0xff] }
 0x2ec   : > { %v3982_v2 = vpop.f32.mrf.mxu3 }
 0x2ed   : > { %1064 = vmatpush.msrb.mxu1 %v982_v9  ;;  %v1024_v42 = vadd.f32 %v3969_v49, %v3982_v2  ;;  %v4104_v49 = vld [vmem:[%s4940_s3 + $0x88] sm:$0xff]  ;;  %v2924_v9 = vld [vmem:[%s3615_s16 + $0x410] sm:$0xff] }
 0x2ee   : > { %v2919_v2 = vld [vmem:[%s3615_s16 + $0x3e8] sm:$0xff] }
 0x2ef   : > { %1065 = vmatpush.msrb.mxu1 %v3945_v48  ;;  %v1035_v48 = vpop.f32.mrf.mxu2 }
 0x2f1   : > { %1066 = vmatpush.msrb.mxu1 %v3938_v22  ;;  %v4010_v22 = vld [vmem:[%s4940_s3 + $0x60] sm:$0xff] }
 0x2f3   : > { %1067 = vmatpush.msrb.mxu1 %v3931_v31 }
 0x2f4   : > { %v925_v54 = vpop.f32.mrf.mxu3 }
 0x2f5   : > { %1068 = vmatpush.msrb.mxu1 %v3924_v0  ;;  %v4004_v0 = vld [vmem:[%s4940_s3 + $0x68] sm:$0xff]  ;;  %v1027_v21 = vadd.f32 %v3973_v60, %v925_v54  ;;  %v2918_v60 = vld [vmem:[%s3615_s16 + $0x3e0] sm:$0xff]  ;;  %v2921_v54 = vld [vmem:[%s3615_s16 + $0x3f8] sm:$0xff] }
 0x2f6   : > { %1069 = vmatmul.f32.vlgmr.msrb.gmra.mxu1 %v3807_v23 }
 0x2f7   : > { %1243 = vmatpush.msra.mxu1 %v3991_v63  ;;  %v1038_v36 = vpop.f32.mrf.mxu2 }
 0x2f9   : > { %1244 = vmatpush.msra.mxu1 %v3998_v26 }
 0x2fb   : > { %1245 = vmatpush.msra.mxu1 %v4004_v0 }
 0x2fc   : > { %v928_v31 = vpop.f32.mrf.mxu3 }
 0x2fd   : > { %1246 = vmatpush.msra.mxu1 %v4010_v22  ;;  %v1030_v17 = vadd.f32 %v1029_v30, %v928_v31  ;;  %v2926_v30 = vld [vmem:[%s3615_s16 + $0x420] sm:$0xff]  ;;  %v2923_v31 = vld [vmem:[%s3615_s16 + $0x408] sm:$0xff] }
 0x2fe   : > { %1072 = vmatmul.f32.gmra.mxu1 %v3813_v29 }
 0x2ff   : > { %1247 = vmatpush.msra.mxu1 %v3526_v8 }
 0x301   : > { %1248 = vmatpush.msra.mxu1 %v3539_v10  ;;  %v1041_v10 = vpop.f32.mrf.mxu2 }
 0x303   : > { %1249 = vmatpush.msra.mxu1 %v3551_v12 }
 0x304   : > { %v931_v40 = vpop.f32.mrf.mxu3 }
 0x305   : > { %1250 = vmatpush.msra.mxu1 %v3566_v14  ;;  %v1033_v38 = vadd.f32 %v1032_v41, %v931_v40  ;;  %v2928_v41 = vld [vmem:[%s3615_s16 + $0x430] sm:$0xff]  ;;  %v2925_v40 = vld [vmem:[%s3615_s16 + $0x418] sm:$0xff] }
 0x307   : > { %1251 = vmatpush.msra.mxu1 %v3578_v16 }
 0x309   : > { %1252 = vmatpush.msra.mxu1 %v3591_v18  ;;  %v1044_v14 = vpop.f32.mrf.mxu2 }
 0x30b   : > { %1253 = vmatpush.msra.mxu1 %v4963_v1 }
 0x30c   : > { %v934_v62 = vpop.f32.mrf.mxu3 }
 0x30d   : > { %1254 = vmatpush.msra.mxu1 %v4964_v3 }
 0x30f   : > { %1255 = vmatpush.msra.mxu1 %v4965_v57 }
 0x311   : > { %1256 = vmatpush.msra.mxu1 %v4966_v59  ;;  %v1047_v18 = vpop.f32.mrf.mxu2 }
 0x313   : > { %1257 = vmatpush.msra.mxu1 %v4967_v35 }
 0x314   : > { %v937_v8 = vpop.f32.mrf.mxu3 }
 0x315   : > { %1258 = vmatpush.msra.mxu1 %v4968_v43  ;;  %v1039_v35 = vadd.f32 %v1038_v36, %v937_v8  ;;  %v1036_v43 = vadd.f32 %v1035_v48, %v934_v62  ;;  %v2930_v48 = vld [vmem:[%s3615_s16 + $0x440] sm:$0xff]  ;;  %v2932_v36 = vld [vmem:[%s3615_s16 + $0x450] sm:$0xff]  ;;  %v2927_v8 = vld [vmem:[%s3615_s16 + $0x428] sm:$0xff] }
 0x316   : > { %1259 = vmatmul.f32.vlgmr.msra.gmra.mxu1 %v2906_v19 }
 0x319   : > { %v1050_v13 = vpop.f32.mrf.mxu2 }
 0x31c   : > { %v940_v12 = vpop.f32.mrf.mxu3 }
 0x31d   : > { %v1042_v59 = vadd.f32 %v1041_v10, %v940_v12  ;;  %v2934_v10 = vld [vmem:[%s3615_s16 + $0x460] sm:$0xff] }
 0x31e   : > { %1262 = vmatmul.f32.gmra.mxu1 %v2908_v58 }
 0x324   : > { %v943_v16 = vpop.f32.mrf.mxu3 }
 0x325   : > { %v1045_v57 = vadd.f32 %v1044_v14, %v943_v16  ;;  %v2929_v14 = vld [vmem:[%s3615_s16 + $0x438] sm:$0xff]  ;;  %v2936_v16 = vld [vmem:[%s3615_s16 + $0x470] sm:$0xff] }
 0x326   : > { %1265 = vmatmul.f32.gmra.mxu1 %v2910_v51 }
 0x32c   : > { %v946_v7 = vpop.f32.mrf.mxu3 }
 0x32d   : > { %v1048_v3 = vadd.f32 %v1047_v18, %v946_v7  ;;  %v2931_v18 = vld [vmem:[%s3615_s16 + $0x448] sm:$0xff] }
 0x32e   : > { %1268 = vmatmul.f32.gmra.mxu1 %v2912_v47  ;;  %v2946_v47 = vld [vmem:[%s3615_s16 + $0x4c0] sm:$0xff] }
 0x334   : > { %v949_v1 = vpop.f32.mrf.mxu3 }
 0x335   : > { %v1051_v15 = vadd.f32 %v1050_v13, %v949_v1  ;;  %v2938_v13 = vld [vmem:[%s3615_s16 + $0x480] sm:$0xff]  ;;  %v2933_v1 = vld [vmem:[%s3615_s16 + $0x458] sm:$0xff] }
 0x336   : > { %1271 = vmatmul.f32.gmra.mxu1 %v2914_v56  ;;  %v2941_v56 = vld [vmem:[%s3615_s16 + $0x498] sm:$0xff] }
 0x337   : > { %1080 = vmatpush.msrb.mxu0 %v1051_v15 }
 0x339   : > { %1081 = vmatpush.msrb.mxu0 %v1048_v3  ;;  %v2940_v3 = vld [vmem:[%s3615_s16 + $0x490] sm:$0xff] }
 0x33b   : > { %1082 = vmatpush.msrb.mxu0 %v1045_v57 }
 0x33d   : > { %1083 = vmatpush.msrb.mxu0 %v1042_v59 }
 0x33e   : > { %1274 = vmatmul.f32.gmra.mxu1 %v2916_v46  ;;  %v2948_v46 = vld [vmem:[%s3615_s16 + $0x4d0] sm:$0xff] }
 0x33f   : > { %1084 = vmatpush.msrb.mxu0 %v1039_v35  ;;  %v2935_v35 = vld [vmem:[%s3615_s16 + $0x468] sm:$0xff] }
 0x341   : > { %1085 = vmatpush.msrb.mxu0 %v1036_v43 }
 0x343   : > { %1086 = vmatpush.msrb.mxu0 %v1033_v38  ;;  %v2942_v38 = vld [vmem:[%s3615_s16 + $0x4a0] sm:$0xff] }
 0x345   : > { %1087 = vmatpush.msrb.mxu0 %v1030_v17 }
 0x346   : > { %1277 = vmatmul.f32.gmra.mxu1 %v2918_v60  ;;  %v2943_v60 = vld [vmem:[%s3615_s16 + $0x4a8] sm:$0xff] }
 0x347   : > { %1088 = vmatpush.msrb.mxu0 %v1027_v21  ;;  %v2937_v21 = vld [vmem:[%s3615_s16 + $0x478] sm:$0xff] }
 0x349   : > { %1089 = vmatpush.msrb.mxu0 %v1024_v42 }
 0x34b   : > { %1090 = vmatpush.msrb.mxu0 %v1021_v50  ;;  %v2944_v50 = vld [vmem:[%s3615_s16 + $0x4b0] sm:$0xff] }
 0x34d   : > { %1091 = vmatpush.msrb.mxu0 %v1018_v61  ;;  %v2939_v61 = vld [vmem:[%s3615_s16 + $0x488] sm:$0xff] }
 0x34e   : > { %2902 = vmatmul.msk.f32.vlgmr.msrb.gmra.mxu0 %vm368_vm0, %v3824_v53  ;;  %v4059_v53 = vld [vmem:[%s4940_s3 + $0xc0] sm:$0xff]  ;;  %1280 = vmatmul.f32.gmra.mxu1 %v2920_v5 }
 0x34f   : > { %1348 = vmatpush.msra.mxu0 %v4038_v33  ;;  %v2950_v5 = vld [vmem:[%s3615_s16 + $0x4e0] sm:$0xff] }
 0x351   : > { %1349 = vmatpush.msra.mxu0 %v4046_v37 }
 0x353   : > { %1350 = vmatpush.msra.mxu0 %v4052_v45 }
 0x355   : > { %1351 = vmatpush.msra.mxu0 %v4059_v53 }
 0x356   : > { %2903 = vmatmul.msk.f32.gmra.mxu0 %vm368_vm0, %v3837_v24  ;;  %v4086_v24 = vld [vmem:[%s4940_s3 + $0xa0] sm:$0xff]  ;;  %1283 = vmatmul.f32.gmra.mxu1 %v2922_v25  ;;  %v2945_v25 = vld [vmem:[%s3615_s16 + $0x4b8] sm:$0xff] }
 0x357   : > { %1352 = vmatpush.msra.mxu0 %v4065_v55 }
 0x359   : > { %1353 = vmatpush.msra.mxu0 %v4073_v6 }
 0x35b   : > { %1354 = vmatpush.msra.mxu0 %v4079_v39 }
 0x35d   : > { %1355 = vmatpush.msra.mxu0 %v4086_v24 }
 0x35e   : > { %1286 = vmatmul.f32.gmra.mxu1 %v2924_v9  ;;  %v2952_v9 = vld [vmem:[%s3615_s16 + $0x4f0] sm:$0xff] }
 0x35f   : > { %1356 = vmatpush.msra.mxu0 %v4092_v28 }
 0x361   : > { %1357 = vmatpush.msra.mxu0 %v4098_v27 }
 0x363   : > { %1358 = vmatpush.msra.mxu0 %v4104_v49 }
 0x365   : > { %1359 = vmatpush.msra.mxu0 %v4112_v52 }
 0x366   : > { %2962 = vmatmul.msk.f32.vlgmr.msra.gmra.mxu0 %vm368_vm0, %v2907_v20  ;;  %1289 = vmatmul.f32.gmra.mxu1 %v2926_v30  ;;  %v2947_v30 = vld [vmem:[%s3615_s16 + $0x4c8] sm:$0xff] }
 0x36e   : > { %2963 = vmatmul.msk.f32.gmra.mxu0 %vm368_vm0, %v2909_v44  ;;  %1292 = vmatmul.f32.gmra.mxu1 %v2928_v41  ;;  %v2954_v41 = vld [vmem:[%s3615_s16 + $0x500] sm:$0xff] }
 0x373   : > { %v1070_v62 = vpop.f32.mrf.mxu1 }
 0x376   : > { %2964 = vmatmul.msk.f32.gmra.mxu0 %vm368_vm0, %v2911_v32  ;;  %1295 = vmatmul.f32.gmra.mxu1 %v2930_v48  ;;  %v2949_v48 = vld [vmem:[%s3615_s16 + $0x4d8] sm:$0xff] }
 0x37b   : > { %v1073_v12 = vpop.f32.mrf.mxu1 }
 0x37e   : > { %2965 = vmatmul.msk.f32.gmra.mxu0 %vm368_vm0, %v2913_v4  ;;  %1298 = vmatmul.f32.gmra.mxu1 %v2932_v36  ;;  %v2956_v36 = vld [vmem:[%s3615_s16 + $0x510] sm:$0xff] }
 0x386   : > { %2966 = vmatmul.msk.f32.gmra.mxu0 %vm368_vm0, %v2915_v11  ;;  %1301 = vmatmul.f32.gmra.mxu1 %v2934_v10 }
 0x38e   : > { %2967 = vmatmul.msk.f32.gmra.mxu0 %vm368_vm0, %v2917_v34  ;;  %1304 = vmatmul.f32.gmra.mxu1 %v2936_v16  ;;  %v2953_v16 = vld [vmem:[%s3615_s16 + $0x4f8] sm:$0xff] }
 0x393   : > { %v4150_v7 = vpop.f32.mrf.mxu1 }
 0x396   : > { %2968 = vmatmul.msk.f32.gmra.mxu0 %vm368_vm0, %v2919_v2  ;;  %1307 = vmatmul.f32.gmra.mxu1 %v2938_v13  ;;  %v2960_v13 = vld [vmem:[%s3615_s16 + $0x530] sm:$0xff] }
 0x39b   : > { %v4155_v15 = vpop.f32.mrf.mxu1 }
 0x39e   : > { %2969 = vmatmul.msk.f32.gmra.mxu0 %vm368_vm0, %v2921_v54  ;;  %1310 = vmatmul.f32.gmra.mxu1 %v2940_v3  ;;  %v2955_v3 = vld [vmem:[%s3615_s16 + $0x508] sm:$0xff] }
 0x3a3   : > { %v4162_v43 = vpop.f32.mrf.mxu1 }
 0x3a6   : > { %2970 = vmatmul.msk.f32.gmra.mxu0 %vm368_vm0, %v2923_v31  ;;  %1313 = vmatmul.f32.gmra.mxu1 %v2942_v38 }
 0x3ab   : > { %v4169_v42 = vpop.f32.mrf.mxu1 }
 0x3ae   : > { %2971 = vmatmul.msk.f32.gmra.mxu0 %vm368_vm0, %v2925_v40  ;;  %1316 = vmatmul.f32.gmra.mxu1 %v2944_v50 }
 0x3b3   : > { %v4176_v51 = vpop.f32.mrf.mxu1 }
 0x3b6   : > { %2972 = vmatmul.msk.f32.gmra.mxu0 %vm368_vm0, %v2927_v8  ;;  %1319 = vmatmul.f32.gmra.mxu1 %v2946_v47  ;;  %v2951_v8 = vld [vmem:[%s3615_s16 + $0x4e8] sm:$0xff] }
 0x3bb   : > { %v4183_v44 = vpop.f32.mrf.mxu1 }
 0x3be   : > { %2973 = vmatmul.msk.f32.gmra.mxu0 %vm368_vm0, %v2929_v14  ;;  %1322 = vmatmul.f32.gmra.mxu1 %v2948_v46 }
 0x3c3   : > { %v4190_v4 = vpop.f32.mrf.mxu1 }
 0x3c6   : > { %2974 = vmatmul.msk.f32.gmra.mxu0 %vm368_vm0, %v2931_v18  ;;  %1325 = vmatmul.f32.gmra.mxu1 %v2950_v5 }
 0x3cb   : > { %v1093_v57 = vpop.f32.mrf.mxu0  ;;  %v4197_v34 = vpop.f32.mrf.mxu1 }
 0x3cc   : > { %v1094_v59 = vadd.f32 %v1093_v57, %v1070_v62 }
 0x3ce   : > { %2975 = vmatmul.msk.f32.gmra.mxu0 %vm368_vm0, %v2933_v1  ;;  %2904 = vst.msk [vmem:[%s3905_s29 + $0x10] sm:$0xff] %vm707_vm1, %v1094_v59  ;;  %1328 = vmatmul.f32.gmra.mxu1 %v2952_v9 }
 0x3d3   : > { %v1096_v17 = vpop.f32.mrf.mxu0  ;;  %v1284_v54 = vpop.f32.mrf.mxu1 }
 0x3d4   : > { %v1097_v19 = vadd.f32 %v1096_v17, %v1073_v12  ;;  %v2958_v12 = vld [vmem:[%s3615_s16 + $0x520] sm:$0xff] }
 0x3d6   : > { %2976 = vmatmul.msk.f32.gmra.mxu0 %vm368_vm0, %v2935_v35  ;;  %2905 = vst.msk [vmem:[%s3905_s29 + $0x18] sm:$0xff] %vm707_vm1, %v1097_v19  ;;  %1331 = vmatmul.f32.gmra.mxu1 %v2954_v41  ;;  %v2957_v35 = vld [vmem:[%s3615_s16 + $0x518] sm:$0xff]  ;;  %v2959_v19 = vld [vmem:[%s3615_s16 + $0x528] sm:$0xff] }
 0x3db   : > { %v1287_v40 = vpop.f32.mrf.mxu1 }
 0x3de   : > { %2977 = vmatmul.msk.f32.gmra.mxu0 %vm368_vm0, %v2937_v21  ;;  %1334 = vmatmul.f32.gmra.mxu1 %v2956_v36 }
 0x3e3   : > { %v4173_v58 = vpop.f32.mrf.mxu0  ;;  %v1290_v10 = vpop.f32.mrf.mxu1 }
 0x3e6   : > { %2978 = vmatmul.msk.f32.gmra.mxu0 %vm368_vm0, %v2939_v61  ;;  %1337 = vmatmul.f32.gmra.mxu1 %v2958_v12  ;;  %v2961_v61 = vld [vmem:[%s3615_s16 + $0x538] sm:$0xff] }
 0x3eb   : > { %v4180_v20 = vpop.f32.mrf.mxu0  ;;  %v1293_v18 = vpop.f32.mrf.mxu1 }
 0x3ee   : > { %2979 = vmatmul.msk.f32.gmra.mxu0 %vm368_vm0, %v2941_v56  ;;  %1340 = vmatmul.f32.gmra.mxu1 %v2960_v13 }
 0x3f3   : > { %v4187_v32 = vpop.f32.mrf.mxu0  ;;  %v1296_v57 = vpop.f32.mrf.mxu1 }
 0x3f6   : > { %2980 = vmatmul.msk.f32.gmra.mxu0 %vm368_vm0, %v2943_v60 }
 0x3fb   : > { %v4194_v11 = vpop.f32.mrf.mxu0  ;;  %v1299_v38 = vpop.f32.mrf.mxu1 }
 0x3fe   : > { %2981 = vmatmul.msk.f32.gmra.mxu0 %vm368_vm0, %v2945_v25 }
 0x403   : > { %v4201_v2 = vpop.f32.mrf.mxu0  ;;  %v1302_v21 = vpop.f32.mrf.mxu1 }
 0x406   : > { %2982 = vmatmul.msk.f32.gmra.mxu0 %vm368_vm0, %v2947_v30 }
 0x40b   : > { %v4206_v31 = vpop.f32.mrf.mxu0  ;;  %v1305_v47 = vpop.f32.mrf.mxu1 }
 0x40e   : > { %2983 = vmatmul.msk.f32.gmra.mxu0 %vm368_vm0, %v2949_v48 }
 0x413   : > { %v1379_v62 = vpop.f32.mrf.mxu0  ;;  %v4225_v60 = vpop.f32.mrf.mxu1 }
 0x416   : > { %2984 = vmatmul.msk.f32.gmra.mxu0 %vm368_vm0, %v2951_v8 }
 0x41b   : > { %v1382_v14 = vpop.f32.mrf.mxu0  ;;  %v4227_v25 = vpop.f32.mrf.mxu1 }
 0x41e   : > { %2985 = vmatmul.msk.f32.gmra.mxu0 %vm368_vm0, %v2953_v16 }
 0x423   : > { %v1385_v1 = vpop.f32.mrf.mxu0  ;;  %v4229_v48 = vpop.f32.mrf.mxu1 }
 0x426   : > { %2986 = vmatmul.msk.f32.gmra.mxu0 %vm368_vm0, %v2955_v3 }
 0x42b   : > { %v1388_v59 = vpop.f32.mrf.mxu0 }
 0x42c   : > { %v1389_v3 = vadd.f32 %v1388_v59, %v1287_v40  ;;  %v1374_v40 = vadd.f32 %v4201_v2, %v4176_v51  ;;  %v1362_v51 = vadd.f32 %v4173_v58, %v4150_v7  ;;  %v4265_v7 = vld [vmem:[%s4940_s3 + $0x58] sm:$0xff] }
 0x42d   : > { %v4314_v59 = vld [vmem:[%s4940_s3 + $0x18] sm:$0xff] }
 0x42e   : > { %2987 = vmatmul.msk.f32.gmra.mxu0 %vm368_vm0, %v2957_v35  ;;  %v4233_v35 = vpop.f32.mrf.mxu1 }
 0x433   : > { %v1391_v17 = vpop.f32.mrf.mxu0 }
 0x434   : > { %v1392_v13 = vadd.f32 %v1391_v17, %v1290_v10  ;;  %v4326_v17 = vld [vmem:[%s4940_s3 + $0x8] sm:$0xff] }
 0x436   : > { %2988 = vmatmul.msk.f32.gmra.mxu0 %vm368_vm0, %v2959_v19  ;;  %v1386_v19 = vadd.f32 %v1385_v1, %v1284_v54  ;;  %v4245_v54 = vpop.f32.mrf.mxu1  ;;  %v1371_v1 = vadd.f32 %v4194_v11, %v4169_v42  ;;  %v4278_v42 = vld [vmem:[%s4940_s3 + $0x48] sm:$0xff] }
 0x43b   : > { %v1394_v50 = vpop.f32.mrf.mxu0 }
 0x43c   : > { %v1395_v16 = vadd.f32 %v1394_v50, %v1293_v18  ;;  %v1377_v18 = vadd.f32 %v4206_v31, %v4183_v44  ;;  %v1365_v44 = vadd.f32 %v4180_v20, %v4155_v15  ;;  %v4290_v20 = vld [vmem:[%s4940_s3 + $0x38] sm:$0xff]  ;;  %v4302_v31 = vld [vmem:[%s4940_s3 + $0x28] sm:$0xff] }
 0x43e   : > { %2989 = vmatmul.msk.f32.gmra.mxu0 %vm368_vm0, %v2961_v61  ;;  %v1383_v61 = vadd.f32 %v1382_v14, %v4197_v34  ;;  %v1323_v2 = vpop.f32.mrf.mxu1  ;;  %v4308_v14 = vld [vmem:[%s4940_s3 + $0x20] sm:$0xff] }
 0x443   : > { %v1397_v56 = vpop.f32.mrf.mxu0 }
 0x444   : > { %v1398_v8 = vadd.f32 %v1397_v56, %v1296_v57  ;;  %v1380_v57 = vadd.f32 %v1379_v62, %v4190_v4  ;;  %v1368_v4 = vadd.f32 %v4187_v32, %v4162_v43  ;;  %v4296_v32 = vld [vmem:[%s4940_s3 + $0x30] sm:$0xff]  ;;  %v4332_v56 = vld [vmem:[%s4940_s3] sm:$0xff] }
 0x446   : > { %v1326_v15 = vpop.f32.mrf.mxu1 }
 0x44b   : > { %v1400_v46 = vpop.f32.mrf.mxu0 }
 0x44c   : > { %v1401_v36 = vadd.f32 %v1400_v46, %v1299_v38  ;;  %v4320_v38 = vld [vmem:[%s4940_s3 + $0x10] sm:$0xff] }
 0x44e   : > { %v1329_v11 = vpop.f32.mrf.mxu1 }
 0x453   : > { %v1403_v5 = vpop.f32.mrf.mxu0 }
 0x454   : > { %v1404_v41 = vadd.f32 %v1403_v5, %v1302_v21 }
 0x45b   : > { %v1406_v9 = vpop.f32.mrf.mxu0 }
 0x45c   : > { %v1407_v30 = vadd.f32 %v1406_v9, %v1305_v47  ;;  %v1332_v47 = vpop.f32.mrf.mxu1 }
 0x45e   : > { %1445 = vmatpush.msra.mxu2 %v1407_v30 }
 0x460   : > { %1446 = vmatpush.msra.mxu2 %v1404_v41 }
 0x462   : > { %1447 = vmatpush.msra.mxu2 %v1401_v36 }
 0x463   : > { %v4231_v12 = vpop.f32.mrf.mxu0 }
 0x464   : > { %1448 = vmatpush.msra.mxu2 %v1398_v8  ;;  %v1335_v5 = vpop.f32.mrf.mxu1 }
 0x466   : > { %1449 = vmatpush.msra.mxu2 %v1395_v16 }
 0x468   : > { %1450 = vmatpush.msra.mxu2 %v1392_v13 }
 0x46a   : > { %1451 = vmatpush.msra.mxu2 %v1389_v3 }
 0x46b   : > { %v4235_v21 = vpop.f32.mrf.mxu0 }
 0x46c   : > { %1452 = vmatpush.msra.mxu2 %v1386_v19  ;;  %v1338_v30 = vpop.f32.mrf.mxu1 }
 0x46e   : > { %1453 = vmatpush.msra.mxu2 %v1383_v61 }
 0x470   : > { %1454 = vmatpush.msra.mxu2 %v1380_v57 }
 0x472   : > { %1455 = vmatpush.msra.mxu2 %v1377_v18 }
 0x473   : > { %v4243_v10 = vpop.f32.mrf.mxu0 }
 0x474   : > { %1456 = vmatpush.msra.mxu2 %v1374_v40  ;;  %v1341_v36 = vpop.f32.mrf.mxu1 }
 0x476   : > { %1457 = vmatpush.msra.mxu2 %v1371_v1  ;;  %v1494_v1 = vld [vmem:[%s3472_s9] sm:$0xff] }
 0x478   : > { %1458 = vmatpush.msra.mxu2 %v1368_v4 }
 0x47a   : > { %1459 = vmatpush.msra.mxu2 %v1365_v44  ;;  %v1416_v44 = vadd.f32 %v4243_v10, %v4229_v48  ;;  %v1500_v48 = vld [vmem:[%s3472_s9 + $0x30] sm:$0xff]  ;;  %v1497_v10 = vld [vmem:[%s3472_s9 + $0x18] sm:$0xff] }
 0x47b   : > { %v4255_v34 = vpop.f32.mrf.mxu0 }
 0x47c   : > { %1460 = vmatpush.msra.mxu2 %v1362_v51  ;;  %v1419_v4 = vadd.f32 %v4255_v34, %v4233_v35  ;;  %v1413_v51 = vadd.f32 %v4235_v21, %v4227_v25  ;;  %v4350_v35 = vld [vmem:[%s4939_s2 + $0x8] sm:$0xff]  ;;  %v4362_v25 = vld [vmem:[%s4939_s2 + $0x18] sm:$0xff]  ;;  %v1502_v21 = vld [vmem:[%s3472_s9 + $0x40] sm:$0xff] }
 0x47d   : > { %1461 = vmatmul.f32.vlgmr.msra.gmra.mxu2 %v3807_v23  ;;  %v4272_v23 = vld [vmem:[%s4940_s3 + $0x50] sm:$0xff] }
 0x47e   : > { %1634 = vmatpush.msrb.mxu2 %v3991_v63  ;;  %v1504_v34 = vld [vmem:[%s3472_s9 + $0x50] sm:$0xff] }
 0x480   : > { %1635 = vmatpush.msrb.mxu2 %v3998_v26 }
 0x482   : > { %1636 = vmatpush.msrb.mxu2 %v4004_v0 }
 0x483   : > { %v1421_v43 = vpop.f32.mrf.mxu0 }
 0x484   : > { %1637 = vmatpush.msrb.mxu2 %v4010_v22  ;;  %v1422_v40 = vadd.f32 %v1421_v43, %v4245_v54  ;;  %v1410_v54 = vadd.f32 %v4231_v12, %v4225_v60  ;;  %v1498_v60 = vld [vmem:[%s3472_s9 + $0x20] sm:$0xff]  ;;  %v1495_v12 = vld [vmem:[%s3472_s9 + $0x8] sm:$0xff] }
 0x485   : > { %1464 = vmatmul.f32.gmra.mxu2 %v3813_v29  ;;  %v4284_v29 = vld [vmem:[%s4940_s3 + $0x40] sm:$0xff]  ;;  %v1499_v43 = vld [vmem:[%s3472_s9 + $0x28] sm:$0xff] }
 0x486   : > { %1638 = vmatpush.msrb.mxu2 %v4265_v7 }
 0x488   : > { %1639 = vmatpush.msrb.mxu2 %v4272_v23 }
 0x48a   : > { %1640 = vmatpush.msrb.mxu2 %v4278_v42 }
 0x48b   : > { %v1424_v58 = vpop.f32.mrf.mxu0 }
 0x48c   : > { %1641 = vmatpush.msrb.mxu2 %v4284_v29  ;;  %v1425_v18 = vadd.f32 %v1424_v58, %v1323_v2  ;;  %v1496_v2 = vld [vmem:[%s3472_s9 + $0x10] sm:$0xff]  ;;  %v1514_v58 = vld [vmem:[%s3472_s9 + $0xa0] sm:$0xff] }
 0x48e   : > { %1642 = vmatpush.msrb.mxu2 %v4290_v20 }
 0x490   : > { %1643 = vmatpush.msrb.mxu2 %v4296_v32 }
 0x492   : > { %1644 = vmatpush.msrb.mxu2 %v4302_v31 }
 0x493   : > { %v1427_v62 = vpop.f32.mrf.mxu0 }
 0x494   : > { %1645 = vmatpush.msrb.mxu2 %v4308_v14  ;;  %v1428_v57 = vadd.f32 %v1427_v62, %v1326_v15  ;;  %v1505_v15 = vld [vmem:[%s3472_s9 + $0x58] sm:$0xff]  ;;  %v1520_v62 = vld [vmem:[%s3472_s9 + $0xd0] sm:$0xff] }
 0x496   : > { %1646 = vmatpush.msrb.mxu2 %v4314_v59 }
 0x498   : > { %1647 = vmatpush.msrb.mxu2 %v4320_v38 }
 0x49a   : > { %1648 = vmatpush.msrb.mxu2 %v4326_v17 }
 0x49b   : > { %v1430_v50 = vpop.f32.mrf.mxu0 }
 0x49c   : > { %1649 = vmatpush.msrb.mxu2 %v4332_v56  ;;  %v1431_v61 = vadd.f32 %v1430_v50, %v1329_v11  ;;  %v1518_v11 = vld [vmem:[%s3472_s9 + $0xc0] sm:$0xff]  ;;  %v1524_v50 = vld [vmem:[%s3472_s9 + $0xf0] sm:$0xff] }
 0x49d   : > { %1650 = vmatmul.f32.vlgmr.msrb.gmra.mxu2 %v1494_v1  ;;  %v1527_v1 = vld [vmem:[%s3472_s9 + $0x108] sm:$0xff] }
 0x4a3   : > { %v1433_v46 = vpop.f32.mrf.mxu0 }
 0x4a4   : > { %v1434_v19 = vadd.f32 %v1433_v46, %v1332_v47  ;;  %v1526_v46 = vld [vmem:[%s3472_s9 + $0x100] sm:$0xff] }
 0x4a5   : > { %1653 = vmatmul.f32.gmra.mxu2 %v1496_v2 }
 0x4ab   : > { %v1436_v9 = vpop.f32.mrf.mxu0 }
 0x4ac   : > { %v1437_v3 = vadd.f32 %v1436_v9, %v1335_v5  ;;  %v1521_v9 = vld [vmem:[%s3472_s9 + $0xd8] sm:$0xff] }
 0x4ad   : > { %1656 = vmatmul.f32.gmra.mxu2 %v1498_v60  ;;  %v1536_v60 = vld [vmem:[%s3472_s9 + $0x150] sm:$0xff] }
 0x4b3   : > { %v1439_v41 = vpop.f32.mrf.mxu0 }
 0x4b4   : > { %v1440_v13 = vadd.f32 %v1439_v41, %v1338_v30  ;;  %v1528_v30 = vld [vmem:[%s3472_s9 + $0x110] sm:$0xff] }
 0x4b5   : > { %1659 = vmatmul.f32.gmra.mxu2 %v1500_v48 }
 0x4bb   : > { %v1442_v8 = vpop.f32.mrf.mxu0 }
 0x4bc   : > { %v1443_v16 = vadd.f32 %v1442_v8, %v1341_v36  ;;  %v1523_v36 = vld [vmem:[%s3472_s9 + $0xe8] sm:$0xff] }
 0x4bd   : > { %1662 = vmatmul.f32.gmra.mxu2 %v1502_v21 }
 0x4be   : > { %1472 = vmatpush.msra.mxu3 %v1443_v16  ;;  %v1530_v16 = vld [vmem:[%s3472_s9 + $0x120] sm:$0xff] }
 0x4c0   : > { %1473 = vmatpush.msra.mxu3 %v1440_v13 }
 0x4c2   : > { %1474 = vmatpush.msra.mxu3 %v1437_v3 }
 0x4c4   : > { %1475 = vmatpush.msra.mxu3 %v1434_v19  ;;  %v1525_v19 = vld [vmem:[%s3472_s9 + $0xf8] sm:$0xff] }
 0x4c5   : > { %1665 = vmatmul.f32.gmra.mxu2 %v1504_v34  ;;  %v1538_v34 = vld [vmem:[%s3472_s9 + $0x160] sm:$0xff] }
 0x4c6   : > { %1476 = vmatpush.msra.mxu3 %v1431_v61 }
 0x4c8   : > { %1477 = vmatpush.msra.mxu3 %v1428_v57  ;;  %v1532_v57 = vld [vmem:[%s3472_s9 + $0x130] sm:$0xff] }
 0x4ca   : > { %1478 = vmatpush.msra.mxu3 %v1425_v18 }
 0x4cc   : > { %1479 = vmatpush.msra.mxu3 %v1422_v40 }
 0x4ce   : > { %1480 = vmatpush.msra.mxu3 %v1419_v4  ;;  %v1534_v4 = vld [vmem:[%s3472_s9 + $0x140] sm:$0xff] }
 0x4d0   : > { %1481 = vmatpush.msra.mxu3 %v1416_v44 }
 0x4d2   : > { %1482 = vmatpush.msra.mxu3 %v1413_v51 }
 0x4d4   : > { %1483 = vmatpush.msra.mxu3 %v1410_v54  ;;  %v1529_v54 = vld [vmem:[%s3472_s9 + $0x118] sm:$0xff] }
 0x4d5   : > { %2990 = vmatmul.msk.f32.vlgmr.msra.gmra.mxu3 %vm368_vm0, %v4350_v35 }
 0x4d6   : > { %1739 = vmatpush.msrb.mxu3 %v4038_v33 }
 0x4d8   : > { %1740 = vmatpush.msrb.mxu3 %v4046_v37 }
 0x4da   : > { %1741 = vmatpush.msrb.mxu3 %v4052_v45 }
 0x4dc   : > { %1742 = vmatpush.msrb.mxu3 %v4059_v53 }
 0x4dd   : > { %2991 = vmatmul.msk.f32.gmra.mxu3 %vm368_vm0, %v4362_v25 }
 0x4de   : > { %1743 = vmatpush.msrb.mxu3 %v4065_v55 }
 0x4e0   : > { %1744 = vmatpush.msrb.mxu3 %v4073_v6 }
 0x4e2   : > { %1745 = vmatpush.msrb.mxu3 %v4079_v39 }
 0x4e4   : > { %1746 = vmatpush.msrb.mxu3 %v4086_v24 }
 0x4e6   : > { %1747 = vmatpush.msrb.mxu3 %v4092_v28 }
 0x4e8   : > { %1748 = vmatpush.msrb.mxu3 %v4098_v27 }
 0x4ea   : > { %1749 = vmatpush.msrb.mxu3 %v4104_v49 }
 0x4ec   : > { %1750 = vmatpush.msrb.mxu3 %v4112_v52 }
 0x4ed   : > { %2994 = vmatmul.msk.f32.vlgmr.msrb.gmra.mxu3 %vm368_vm0, %v1495_v12 }
 0x4ee   : > { %2025 = vmatpush.msra.mxu3 %v3991_v63  ;;  %v1506_v63 = vld [vmem:[%s3472_s9 + $0x60] sm:$0xff] }
 0x4ef   : > { %1668 = vmatmul.f32.gmra.mxu2 %v1506_v63 }
 0x4f0   : > { %2026 = vmatpush.msra.mxu3 %v3998_v26  ;;  %v1501_v26 = vld [vmem:[%s3472_s9 + $0x38] sm:$0xff] }
 0x4f2   : > { %2027 = vmatpush.msra.mxu3 %v4004_v0  ;;  %v1508_v0 = vld [vmem:[%s3472_s9 + $0x70] sm:$0xff] }
 0x4f4   : > { %2028 = vmatpush.msra.mxu3 %v4010_v22  ;;  %v1503_v22 = vld [vmem:[%s3472_s9 + $0x48] sm:$0xff] }
 0x4f5   : > { %2995 = vmatmul.msk.f32.gmra.mxu3 %vm368_vm0, %v1497_v10  ;;  %v1531_v10 = vld [vmem:[%s3472_s9 + $0x128] sm:$0xff] }
 0x4f6   : > { %2029 = vmatpush.msra.mxu3 %v4265_v7  ;;  %v1510_v7 = vld [vmem:[%s3472_s9 + $0x80] sm:$0xff] }
 0x4f7   : > { %1671 = vmatmul.f32.gmra.mxu2 %v1508_v0  ;;  %v1533_v0 = vld [vmem:[%s3472_s9 + $0x138] sm:$0xff] }
 0x4f8   : > { %2030 = vmatpush.msra.mxu3 %v4272_v23  ;;  %v1512_v23 = vld [vmem:[%s3472_s9 + $0x90] sm:$0xff] }
 0x4fa   : > { %2031 = vmatpush.msra.mxu3 %v4278_v42  ;;  %v1507_v42 = vld [vmem:[%s3472_s9 + $0x68] sm:$0xff] }
 0x4fc   : > { %2032 = vmatpush.msra.mxu3 %v4284_v29  ;;  %v1509_v29 = vld [vmem:[%s3472_s9 + $0x78] sm:$0xff] }
 0x4fd   : > { %2996 = vmatmul.msk.f32.gmra.mxu3 %vm368_vm0, %v1499_v43 }
 0x4fe   : > { %2033 = vmatpush.msra.mxu3 %v4290_v20  ;;  %v1516_v20 = vld [vmem:[%s3472_s9 + $0xb0] sm:$0xff] }
 0x4ff   : > { %1674 = vmatmul.f32.gmra.mxu2 %v1510_v7 }
 0x500   : > { %2034 = vmatpush.msra.mxu3 %v4296_v32  ;;  %v1511_v32 = vld [vmem:[%s3472_s9 + $0x88] sm:$0xff] }
 0x502   : > { %2035 = vmatpush.msra.mxu3 %v4302_v31  ;;  %v1513_v31 = vld [vmem:[%s3472_s9 + $0x98] sm:$0xff] }
 0x504   : > { %2036 = vmatpush.msra.mxu3 %v4308_v14  ;;  %v1515_v14 = vld [vmem:[%s3472_s9 + $0xa8] sm:$0xff] }
 0x505   : > { %2997 = vmatmul.msk.f32.gmra.mxu3 %vm368_vm0, %v1501_v26 }
 0x506   : > { %2037 = vmatpush.msra.mxu3 %v4314_v59  ;;  %v1522_v59 = vld [vmem:[%s3472_s9 + $0xe0] sm:$0xff] }
 0x507   : > { %1677 = vmatmul.f32.gmra.mxu2 %v1512_v23 }
 0x508   : > { %2038 = vmatpush.msra.mxu3 %v4320_v38  ;;  %v1462_v38 = vpop.f32.mrf.mxu2 }
 0x50a   : > { %2039 = vmatpush.msra.mxu3 %v4326_v17  ;;  %v1517_v17 = vld [vmem:[%s3472_s9 + $0xb8] sm:$0xff] }
 0x50c   : > { %2040 = vmatpush.msra.mxu3 %v4332_v56  ;;  %v1519_v56 = vld [vmem:[%s3472_s9 + $0xc8] sm:$0xff] }
 0x50d   : > { %2998 = vmatmul.msk.f32.gmra.mxu3 %vm368_vm0, %v1503_v22  ;;  %v1540_v22 = vld [vmem:[%s3472_s9 + $0x170] sm:$0xff] }
 0x50f   : > { %1680 = vmatmul.f32.gmra.mxu2 %v1514_v58  ;;  %v1542_v58 = vld [vmem:[%s3472_s9 + $0x180] sm:$0xff] }
 0x510   : > { %v1465_v47 = vpop.f32.mrf.mxu2 }
 0x515   : > { %2999 = vmatmul.msk.f32.gmra.mxu3 %vm368_vm0, %v1505_v15 }
 0x517   : > { %1683 = vmatmul.f32.gmra.mxu2 %v1516_v20 }
 0x51d   : > { %3000 = vmatmul.msk.f32.gmra.mxu3 %vm368_vm0, %v1507_v42  ;;  %v1535_v42 = vld [vmem:[%s3472_s9 + $0x148] sm:$0xff] }
 0x51f   : > { %1686 = vmatmul.f32.gmra.mxu2 %v1518_v11  ;;  %v1544_v11 = vld [vmem:[%s3472_s9 + $0x190] sm:$0xff] }
 0x520   : > { %v1651_v5 = vpop.f32.mrf.mxu2 }
 0x525   : > { %3001 = vmatmul.msk.f32.gmra.mxu3 %vm368_vm0, %v1509_v29 }
 0x527   : > { %1689 = vmatmul.f32.gmra.mxu2 %v1520_v62 }
 0x528   : > { %v1654_v41 = vpop.f32.mrf.mxu2 }
 0x52d   : > { %3002 = vmatmul.msk.f32.gmra.mxu3 %vm368_vm0, %v1511_v32  ;;  %v1537_v32 = vld [vmem:[%s3472_s9 + $0x158] sm:$0xff] }
 0x52f   : > { %1692 = vmatmul.f32.gmra.mxu2 %v1522_v59  ;;  %v1546_v59 = vld [vmem:[%s3472_s9 + $0x1a0] sm:$0xff] }
 0x530   : > { %v1657_v3 = vpop.f32.mrf.mxu2 }
 0x535   : > { %3003 = vmatmul.msk.f32.gmra.mxu3 %vm368_vm0, %v1513_v31 }
 0x537   : > { %1695 = vmatmul.f32.gmra.mxu2 %v1524_v50  ;;  %v1541_v50 = vld [vmem:[%s3472_s9 + $0x178] sm:$0xff] }
 0x538   : > { %v1660_v40 = vpop.f32.mrf.mxu2 }
 0x53d   : > { %3004 = vmatmul.msk.f32.gmra.mxu3 %vm368_vm0, %v1515_v14  ;;  %v1539_v14 = vld [vmem:[%s3472_s9 + $0x168] sm:$0xff] }
 0x53f   : > { %1698 = vmatmul.f32.gmra.mxu2 %v1526_v46 }
 0x540   : > { %v4445_v51 = vpop.f32.mrf.mxu2 }
 0x545   : > { %3005 = vmatmul.msk.f32.gmra.mxu3 %vm368_vm0, %v1517_v17 }
 0x547   : > { %1701 = vmatmul.f32.gmra.mxu2 %v1528_v30 }
 0x548   : > { %v4452_v12 = vpop.f32.mrf.mxu2 }
 0x54d   : > { %3006 = vmatmul.msk.f32.gmra.mxu3 %vm368_vm0, %v1519_v56 }
 0x54f   : > { %1704 = vmatmul.f32.gmra.mxu2 %v1530_v16 }
 0x555   : > { %3007 = vmatmul.msk.f32.gmra.mxu3 %vm368_vm0, %v1521_v9 }
 0x557   : > { %1707 = vmatmul.f32.gmra.mxu2 %v1532_v57 }
 0x558   : > { %v1485_v8 = vpop.f32.mrf.mxu3 }
 0x559   : > { %v1486_v13 = vadd.f32 %v1485_v8, %v1462_v38  ;;  %v1547_v8 = vld [vmem:[%s3472_s9 + $0x1a8] sm:$0xff] }
 0x55b   : > { %2992 = vst.msk [vmem:[%s3905_s29 + $0x20] sm:$0xff] %vm707_vm1, %v1486_v13 }
 0x55d   : > { %3008 = vmatmul.msk.f32.gmra.mxu3 %vm368_vm0, %v1523_v36 }
 0x55f   : > { %1710 = vmatmul.f32.gmra.mxu2 %v1534_v4 }
 0x560   : > { %v1488_v61 = vpop.f32.mrf.mxu3 }
 0x561   : > { %v1489_v18 = vadd.f32 %v1488_v61, %v1465_v47  ;;  %v1548_v47 = vld [vmem:[%s3472_s9 + $0x1b0] sm:$0xff] }
 0x563   : > { %2993 = vst.msk [vmem:[%s3905_s29 + $0x28] sm:$0xff] %vm707_vm1, %v1489_v18 }
 0x565   : > { %3009 = vmatmul.msk.f32.gmra.mxu3 %vm368_vm0, %v1525_v19 }
 0x567   : > { %1713 = vmatmul.f32.gmra.mxu2 %v1536_v60 }
 0x56d   : > { %3010 = vmatmul.msk.f32.gmra.mxu3 %vm368_vm0, %v1527_v1 }
 0x56f   : > { %1716 = vmatmul.f32.gmra.mxu2 %v1538_v34 }
 0x570   : > { %v1752_v44 = vpop.f32.mrf.mxu3 }
 0x571   : > { %v4447_v2 = vadd.f32 %v1752_v44, %v1651_v5  ;;  %v1543_v5 = vld [vmem:[%s3472_s9 + $0x188] sm:$0xff] }
 0x572   : > { %v4459_v63 = vpop.f32.mrf.mxu2 }
 0x575   : > { %3011 = vmatmul.msk.f32.gmra.mxu3 %vm368_vm0, %v1529_v54 }
 0x577   : > { %1719 = vmatmul.f32.gmra.mxu2 %v1540_v22 }
 0x578   : > { %v1755_v48 = vpop.f32.mrf.mxu3 }
 0x579   : > { %v4454_v21 = vadd.f32 %v1755_v48, %v1654_v41  ;;  %v1545_v41 = vld [vmem:[%s3472_s9 + $0x198] sm:$0xff] }
 0x57a   : > { %v4466_v15 = vpop.f32.mrf.mxu2 }
 0x57d   : > { %3012 = vmatmul.msk.f32.gmra.mxu3 %vm368_vm0, %v1531_v10 }
 0x57f   : > { %1722 = vmatmul.f32.gmra.mxu2 %v1542_v58 }
 0x580   : > { %v1758_v43 = vpop.f32.mrf.mxu3 }
 0x581   : > { %v4461_v26 = vadd.f32 %v1758_v43, %v1657_v3  ;;  %v1549_v3 = vld [vmem:[%s3472_s9 + $0x1b8] sm:$0xff] }
 0x582   : > { %v1675_v20 = vpop.f32.mrf.mxu2 }
 0x585   : > { %3013 = vmatmul.msk.f32.gmra.mxu3 %vm368_vm0, %v1533_v0 }
 0x587   : > { %1725 = vmatmul.f32.gmra.mxu2 %v1544_v11 }
 0x588   : > { %v1761_v7 = vpop.f32.mrf.mxu3 }
 0x589   : > { %v4468_v23 = vadd.f32 %v1761_v7, %v1660_v40 }
 0x58a   : > { %v1678_v62 = vpop.f32.mrf.mxu2 }
 0x58d   : > { %3014 = vmatmul.msk.f32.gmra.mxu3 %vm368_vm0, %v1535_v42 }
 0x58f   : > { %1728 = vmatmul.f32.gmra.mxu2 %v1546_v59  ;;  %v3024_v59 = vld [vmem:[%s3472_s9 + $0x1c0] sm:$0xff] }
 0x590   : > { %v4473_v29 = vpop.f32.mrf.mxu3 }
 0x592   : > { %v1681_v17 = vpop.f32.mrf.mxu2 }
 0x595   : > { %3015 = vmatmul.msk.f32.gmra.mxu3 %vm368_vm0, %v1537_v32 }
 0x597   : > { %1731 = vmatmul.f32.gmra.mxu2 %v1548_v47 }
 0x598   : > { %v1767_v31 = vpop.f32.mrf.mxu3 }
 0x59a   : > { %v1684_v46 = vpop.f32.mrf.mxu2 }
 0x59d   : > { %3016 = vmatmul.msk.f32.gmra.mxu3 %vm368_vm0, %v1539_v14 }
 0x5a0   : > { %v1770_v38 = vpop.f32.mrf.mxu3 }
 0x5a2   : > { %v1687_v30 = vpop.f32.mrf.mxu2 }
 0x5a5   : > { %3017 = vmatmul.msk.f32.gmra.mxu3 %vm368_vm0, %v1541_v50  ;;  %v1771_v50 = vadd.f32 %v1770_v38, %v4459_v63  ;;  %v3038_v38 = vld [vmem:[%s3472_s9 + $0x230] sm:$0xff] }
 0x5a8   : > { %v1773_v56 = vpop.f32.mrf.mxu3 }
 0x5a9   : > { %v1774_v14 = vadd.f32 %v1773_v56, %v4466_v15  ;;  %v3026_v15 = vld [vmem:[%s3472_s9 + $0x1d0] sm:$0xff]  ;;  %v3031_v56 = vld [vmem:[%s3472_s9 + $0x1f8] sm:$0xff] }
 0x5aa   : > { %v1690_v16 = vpop.f32.mrf.mxu2 }
 0x5ad   : > { %3018 = vmatmul.msk.f32.gmra.mxu3 %vm368_vm0, %v1543_v5  ;;  %v3040_v5 = vld [vmem:[%s3472_s9 + $0x240] sm:$0xff] }
 0x5b0   : > { %v1776_v9 = vpop.f32.mrf.mxu3 }
 0x5b1   : > { %v1777_v32 = vadd.f32 %v1776_v9, %v1675_v20 }
 0x5b2   : > { %v1693_v19 = vpop.f32.mrf.mxu2 }
 0x5b5   : > { %3019 = vmatmul.msk.f32.gmra.mxu3 %vm368_vm0, %v1545_v41 }
 0x5b8   : > { %v1779_v36 = vpop.f32.mrf.mxu3 }
 0x5b9   : > { %v1780_v42 = vadd.f32 %v1779_v36, %v1678_v62  ;;  %v1765_v62 = vadd.f32 %v4473_v29, %v4445_v51  ;;  %v3028_v51 = vld [vmem:[%s3472_s9 + $0x1e0] sm:$0xff]  ;;  %v3042_v36 = vld [vmem:[%s3472_s9 + $0x250] sm:$0xff] }
 0x5ba   : > { %v1696_v57 = vpop.f32.mrf.mxu2  ;;  %v4528_v29 = vld [vmem:[%s4939_s2] sm:$0xff] }
 0x5bd   : > { %3020 = vmatmul.msk.f32.gmra.mxu3 %vm368_vm0, %v1547_v8 }
 0x5c0   : > { %v1782_v13 = vpop.f32.mrf.mxu3 }
 0x5c1   : > { %v1783_v7 = vadd.f32 %v1782_v13, %v1681_v17  ;;  %v1768_v17 = vadd.f32 %v1767_v31, %v4452_v12 }
 0x5c2   : > { %v4492_v1 = vpop.f32.mrf.mxu2 }
 0x5c5   : > { %3021 = vmatmul.msk.f32.gmra.mxu3 %vm368_vm0, %v1549_v3 }
 0x5c8   : > { %v1785_v61 = vpop.f32.mrf.mxu3 }
 0x5c9   : > { %v1786_v22 = vadd.f32 %v1785_v61, %v1684_v46  ;;  %v3044_v61 = vld [vmem:[%s3472_s9 + $0x260] sm:$0xff] }
 0x5ca   : > { %v4494_v44 = vpop.f32.mrf.mxu2 }
 0x5cd   : > { %2041 = vmatmul.f32.vlgmr.msra.gmra.mxu3 %v3024_v59  ;;  %v3050_v59 = vld [vmem:[%s3472_s9 + $0x290] sm:$0xff] }
 0x5d0   : > { %v1788_v18 = vpop.f32.mrf.mxu3 }
 0x5d1   : > { %v1789_v43 = vadd.f32 %v1788_v18, %v1687_v30  ;;  %v3033_v30 = vld [vmem:[%s3472_s9 + $0x208] sm:$0xff] }
 0x5d2   : > { %v4496_v10 = vpop.f32.mrf.mxu2 }
 0x5d5   : > { %2044 = vmatmul.f32.gmra.mxu3 %v3026_v15 }
 0x5d8   : > { %v1791_v40 = vpop.f32.mrf.mxu3 }
 0x5d9   : > { %v1792_v34 = vadd.f32 %v1791_v40, %v1690_v16  ;;  %v3035_v16 = vld [vmem:[%s3472_s9 + $0x218] sm:$0xff]  ;;  %v3037_v40 = vld [vmem:[%s3472_s9 + $0x228] sm:$0xff] }
 0x5da   : > { %v4500_v58 = vpop.f32.mrf.mxu2 }
 0x5dd   : > { %2047 = vmatmul.f32.gmra.mxu3 %v3028_v51 }
 0x5e0   : > { %v1794_v4 = vpop.f32.mrf.mxu3 }
 0x5e1   : > { %v1795_v48 = vadd.f32 %v1794_v4, %v1693_v19 }
 0x5e2   : > { %v4512_v47 = vpop.f32.mrf.mxu2 }
 0x5e8   : > { %v1797_v54 = vpop.f32.mrf.mxu3 }
 0x5e9   : > { %v1798_v60 = vadd.f32 %v1797_v54, %v1696_v57 }
 0x5ea   : > { %v4523_v63 = vpop.f32.mrf.mxu2 }
 0x5eb   : > { %1836 = vmatpush.msrb.mxu0 %v1798_v60  ;;  %v3046_v60 = vld [vmem:[%s3472_s9 + $0x270] sm:$0xff] }
 0x5ed   : > { %1837 = vmatpush.msrb.mxu0 %v1795_v48 }
 0x5ef   : > { %1838 = vmatpush.msrb.mxu0 %v1792_v34 }
 0x5f0   : > { %v4498_v0 = vpop.f32.mrf.mxu3 }
 0x5f1   : > { %1839 = vmatpush.msrb.mxu0 %v1789_v43  ;;  %v3039_v43 = vld [vmem:[%s3472_s9 + $0x238] sm:$0xff] }
 0x5f3   : > { %1840 = vmatpush.msrb.mxu0 %v1786_v22 }
 0x5f5   : > { %1841 = vmatpush.msrb.mxu0 %v1783_v7  ;;  %v3048_v7 = vld [vmem:[%s3472_s9 + $0x280] sm:$0xff] }
 0x5f7   : > { %1842 = vmatpush.msrb.mxu0 %v1780_v42 }
 0x5f8   : > { %v4502_v11 = vpop.f32.mrf.mxu3 }
 0x5f9   : > { %1843 = vmatpush.msrb.mxu0 %v1777_v32  ;;  %v1804_v32 = vadd.f32 %v4502_v11, %v4494_v44  ;;  %v3052_v44 = vld [vmem:[%s3472_s9 + $0x2a0] sm:$0xff]  ;;  %v3047_v11 = vld [vmem:[%s3472_s9 + $0x278] sm:$0xff] }
 0x5fb   : > { %1844 = vmatpush.msrb.mxu0 %v1774_v14  ;;  %v3041_v14 = vld [vmem:[%s3472_s9 + $0x248] sm:$0xff] }
 0x5fd   : > { %1845 = vmatpush.msrb.mxu0 %v1771_v50  ;;  %v3049_v50 = vld [vmem:[%s3472_s9 + $0x288] sm:$0xff] }
 0x5ff   : > { %1846 = vmatpush.msrb.mxu0 %v1768_v17 }
 0x600   : > { %v4510_v20 = vpop.f32.mrf.mxu3 }
 0x601   : > { %1847 = vmatpush.msrb.mxu0 %v1765_v62  ;;  %v1807_v42 = vadd.f32 %v4510_v20, %v4496_v10  ;;  %v3043_v10 = vld [vmem:[%s3472_s9 + $0x258] sm:$0xff] }
 0x602   : > { %v3051_v62 = vld [vmem:[%s3472_s9 + $0x298] sm:$0xff] }
 0x603   : > { %1848 = vmatpush.msrb.mxu0 %v4468_v23 }
 0x605   : > { %1849 = vmatpush.msrb.mxu0 %v4461_v26 }
 0x607   : > { %1850 = vmatpush.msrb.mxu0 %v4454_v21 }
 0x608   : > { %v4518_v12 = vpop.f32.mrf.mxu3 }
 0x609   : > { %1851 = vmatpush.msrb.mxu0 %v4447_v2  ;;  %v4541_v2 = vld [vmem:[%s4939_s2 + $0x10] sm:$0xff]  ;;  %v1810_v22 = vadd.f32 %v4518_v12, %v4500_v58  ;;  %v1801_v58 = vadd.f32 %v4498_v0, %v4492_v1  ;;  %v3045_v1 = vld [vmem:[%s3472_s9 + $0x268] sm:$0xff] }
 0x60a   : > { %1852 = vmatmul.f32.vlgmr.msrb.gmra.mxu0 %v4528_v29  ;;  %v3054_v0 = vld [vmem:[%s3472_s9 + $0x2b0] sm:$0xff]  ;;  %v3053_v12 = vld [vmem:[%s3472_s9 + $0x2a8] sm:$0xff] }
 0x60b   : > { %2130 = vmatpush.msra.mxu0 %v4038_v33  ;;  %v3030_v33 = vld [vmem:[%s3472_s9 + $0x1f0] sm:$0xff] }
 0x60c   : > { %2050 = vmatmul.f32.gmra.mxu3 %v3030_v33  ;;  %v3055_v33 = vld [vmem:[%s3472_s9 + $0x2b8] sm:$0xff] }
 0x60d   : > { %2131 = vmatpush.msra.mxu0 %v4046_v37  ;;  %v1717_v37 = vpop.f32.mrf.mxu2 }
 0x60f   : > { %2132 = vmatpush.msra.mxu0 %v4052_v45 }
 0x610   : > { %v4533_v21 = vpop.f32.mrf.mxu3 }
 0x611   : > { %2133 = vmatpush.msra.mxu0 %v4059_v53  ;;  %v3032_v53 = vld [vmem:[%s3472_s9 + $0x200] sm:$0xff]  ;;  %v1813_v34 = vadd.f32 %v4533_v21, %v4512_v47 }
 0x612   : > { %1855 = vmatmul.f32.gmra.mxu0 %v4541_v2  ;;  %v3060_v47 = vld [vmem:[%s3472_s9 + $0x2e0] sm:$0xff] }
 0x613   : > { %2134 = vmatpush.msra.mxu0 %v4065_v55  ;;  %v3025_v55 = vld [vmem:[%s3472_s9 + $0x1c8] sm:$0xff] }
 0x614   : > { %2053 = vmatmul.f32.gmra.mxu3 %v3032_v53 }
 0x615   : > { %2135 = vmatpush.msra.mxu0 %v4073_v6  ;;  %v1720_v26 = vpop.f32.mrf.mxu2 }
 0x617   : > { %2136 = vmatpush.msra.mxu0 %v4079_v39  ;;  %v3034_v39 = vld [vmem:[%s3472_s9 + $0x210] sm:$0xff] }
 0x618   : > { %v1815_v45 = vpop.f32.mrf.mxu3 }
 0x619   : > { %2137 = vmatpush.msra.mxu0 %v4086_v24  ;;  %v3027_v24 = vld [vmem:[%s3472_s9 + $0x1d8] sm:$0xff]  ;;  %v1816_v48 = vadd.f32 %v1815_v45, %v4523_v63  ;;  %v3062_v63 = vld [vmem:[%s3472_s9 + $0x2f0] sm:$0xff]  ;;  %v3064_v45 = vld [vmem:[%s3472_s9 + $0x300] sm:$0xff] }
 0x61b   : > { %2138 = vmatpush.msra.mxu0 %v4092_v28 }
 0x61c   : > { %2056 = vmatmul.f32.gmra.mxu3 %v3034_v39 }
 0x61d   : > { %2139 = vmatpush.msra.mxu0 %v4098_v27  ;;  %v1723_v23 = vpop.f32.mrf.mxu2  ;;  %v3036_v27 = vld [vmem:[%s3472_s9 + $0x220] sm:$0xff] }
 0x61f   : > { %2140 = vmatpush.msra.mxu0 %v4104_v49  ;;  %v3029_v49 = vld [vmem:[%s3472_s9 + $0x1e8] sm:$0xff] }
 0x620   : > { %v1818_v6 = vpop.f32.mrf.mxu3 }
 0x621   : > { %2141 = vmatpush.msra.mxu0 %v4112_v52  ;;  %v1819_v54 = vadd.f32 %v1818_v6, %v1717_v37  ;;  %v3066_v6 = vld [vmem:[%s3472_s9 + $0x310] sm:$0xff] }
 0x622   : > { %3080 = vmatmul.msk.f32.vlgmr.msra.gmra.mxu0 %vm368_vm0, %v3025_v55  ;;  %v3057_v55 = vld [vmem:[%s3472_s9 + $0x2c8] sm:$0xff] }
 0x624   : > { %2059 = vmatmul.f32.gmra.mxu3 %v3036_v27 }
 0x625   : > { %v1726_v52 = vpop.f32.mrf.mxu2 }
 0x628   : > { %v1821_v28 = vpop.f32.mrf.mxu3 }
 0x629   : > { %v1822_v4 = vadd.f32 %v1821_v28, %v1720_v26 }
 0x62a   : > { %3081 = vmatmul.msk.f32.gmra.mxu0 %vm368_vm0, %v3027_v24  ;;  %v3059_v24 = vld [vmem:[%s3472_s9 + $0x2d8] sm:$0xff] }
 0x62c   : > { %2062 = vmatmul.f32.gmra.mxu3 %v3038_v38 }
 0x62d   : > { %v1729_v9 = vpop.f32.mrf.mxu2 }
 0x630   : > { %v1824_v31 = vpop.f32.mrf.mxu3 }
 0x631   : > { %v1825_v18 = vadd.f32 %v1824_v31, %v1723_v23  ;;  %v3068_v23 = vld [vmem:[%s3472_s9 + $0x320] sm:$0xff] }
 0x632   : > { %3082 = vmatmul.msk.f32.gmra.mxu0 %vm368_vm0, %v3029_v49  ;;  %v3061_v49 = vld [vmem:[%s3472_s9 + $0x2e8] sm:$0xff] }
 0x634   : > { %2065 = vmatmul.f32.gmra.mxu3 %v3040_v5  ;;  %v3072_v5 = vld [vmem:[%s3472_s9 + $0x340] sm:$0xff] }
 0x635   : > { %v1732_v8 = vpop.f32.mrf.mxu2 }
 0x638   : > { %v1827_v46 = vpop.f32.mrf.mxu3 }
 0x639   : > { %v1828_v57 = vadd.f32 %v1827_v46, %v1726_v52  ;;  %v3070_v52 = vld [vmem:[%s3472_s9 + $0x330] sm:$0xff] }
 0x63a   : > { %3083 = vmatmul.msk.f32.gmra.mxu0 %vm368_vm0, %v3031_v56  ;;  %v3063_v56 = vld [vmem:[%s3472_s9 + $0x2f8] sm:$0xff] }
 0x63c   : > { %2068 = vmatmul.f32.gmra.mxu3 %v3042_v36  ;;  %v3074_v36 = vld [vmem:[%s3472_s9 + $0x350] sm:$0xff] }
 0x640   : > { %v1830_v41 = vpop.f32.mrf.mxu3 }
 0x641   : > { %v1831_v3 = vadd.f32 %v1830_v41, %v1729_v9 }
 0x642   : > { %3084 = vmatmul.msk.f32.gmra.mxu0 %vm368_vm0, %v3033_v30  ;;  %v3065_v30 = vld [vmem:[%s3472_s9 + $0x308] sm:$0xff] }
 0x644   : > { %2071 = vmatmul.f32.gmra.mxu3 %v3044_v61  ;;  %v3069_v61 = vld [vmem:[%s3472_s9 + $0x328] sm:$0xff] }
 0x648   : > { %v1833_v13 = vpop.f32.mrf.mxu3 }
 0x649   : > { %v1834_v19 = vadd.f32 %v1833_v13, %v1732_v8 }
 0x64a   : > { %3085 = vmatmul.msk.f32.gmra.mxu0 %vm368_vm0, %v3035_v16  ;;  %v3067_v16 = vld [vmem:[%s3472_s9 + $0x318] sm:$0xff] }
 0x64b   : > { %1863 = vmatpush.msrb.mxu1 %v1834_v19 }
 0x64c   : > { %2074 = vmatmul.f32.gmra.mxu3 %v3046_v60 }
 0x64d   : > { %1864 = vmatpush.msrb.mxu1 %v1831_v3  ;;  %v3076_v3 = vld [vmem:[%s3472_s9 + $0x360] sm:$0xff] }
 0x64f   : > { %1865 = vmatpush.msrb.mxu1 %v1828_v57 }
 0x650   : > { %v4604_v17 = vpop.f32.mrf.mxu3 }
 0x651   : > { %1866 = vmatpush.msrb.mxu1 %v1825_v18 }
 0x652   : > { %3086 = vmatmul.msk.f32.gmra.mxu0 %vm368_vm0, %v3037_v40  ;;  %v3078_v40 = vld [vmem:[%s3472_s9 + $0x370] sm:$0xff] }
 0x653   : > { %1867 = vmatpush.msrb.mxu1 %v1822_v4 }
 0x654   : > { %2077 = vmatmul.f32.gmra.mxu3 %v3048_v7 }
 0x655   : > { %1868 = vmatpush.msrb.mxu1 %v1819_v54  ;;  %v3071_v54 = vld [vmem:[%s3472_s9 + $0x338] sm:$0xff] }
 0x657   : > { %1869 = vmatpush.msrb.mxu1 %v1816_v48 }
 0x658   : > { %v4609_v20 = vpop.f32.mrf.mxu3 }
 0x659   : > { %1870 = vmatpush.msrb.mxu1 %v1813_v34 }
 0x65a   : > { %3087 = vmatmul.msk.f32.gmra.mxu0 %vm368_vm0, %v3039_v43  ;;  %v3073_v43 = vld [vmem:[%s3472_s9 + $0x348] sm:$0xff] }
 0x65b   : > { %1871 = vmatpush.msrb.mxu1 %v1810_v22 }
 0x65c   : > { %2080 = vmatmul.f32.gmra.mxu3 %v3050_v59 }
 0x65d   : > { %1872 = vmatpush.msrb.mxu1 %v1807_v42 }
 0x65f   : > { %1873 = vmatpush.msrb.mxu1 %v1804_v32 }
 0x660   : > { %v4616_v51 = vpop.f32.mrf.mxu3 }
 0x661   : > { %1874 = vmatpush.msrb.mxu1 %v1801_v58  ;;  %v3075_v58 = vld [vmem:[%s3472_s9 + $0x358] sm:$0xff] }
 0x662   : > { %3088 = vmatmul.msk.f32.gmra.mxu0 %vm368_vm0, %v3041_v14  ;;  %3022 = vmatmul.msk.f32.vlgmr.msrb.gmra.mxu1 %vm368_vm0, %v4350_v35  ;;  %v3056_v35 = vld [vmem:[%s3472_s9 + $0x2c0] sm:$0xff] }
 0x664   : > { %2083 = vmatmul.f32.gmra.mxu3 %v3052_v44 }
 0x66a   : > { %3089 = vmatmul.msk.f32.gmra.mxu0 %vm368_vm0, %v3043_v10  ;;  %3023 = vmatmul.msk.f32.gmra.mxu1 %vm368_vm0, %v4362_v25  ;;  %v3058_v25 = vld [vmem:[%s3472_s9 + $0x2d0] sm:$0xff] }
 0x66c   : > { %2086 = vmatmul.f32.gmra.mxu3 %v3054_v0  ;;  %v3077_v0 = vld [vmem:[%s3472_s9 + $0x368] sm:$0xff] }
 0x672   : > { %3090 = vmatmul.msk.f32.gmra.mxu0 %vm368_vm0, %v3045_v1 }
 0x674   : > { %2089 = vmatmul.f32.gmra.mxu3 %v3056_v35 }
 0x67a   : > { %3091 = vmatmul.msk.f32.gmra.mxu0 %vm368_vm0, %v3047_v11 }
 0x67c   : > { %2092 = vmatmul.f32.gmra.mxu3 %v3058_v25 }
 0x682   : > { %3092 = vmatmul.msk.f32.gmra.mxu0 %vm368_vm0, %v3049_v50  ;;  %v3079_v50 = vld [vmem:[%s3472_s9 + $0x378] sm:$0xff] }
 0x684   : > { %2095 = vmatmul.f32.gmra.mxu3 %v3060_v47 }
 0x687   : > { %v4613_v15 = vpop.f32.mrf.mxu0 }
 0x68a   : > { %3093 = vmatmul.msk.f32.gmra.mxu0 %vm368_vm0, %v3051_v62 }
 0x68c   : > { %2098 = vmatmul.f32.gmra.mxu3 %v3062_v63 }
 0x68f   : > { %v4620_v21 = vpop.f32.mrf.mxu0  ;;  %v4623_v37 = vpop.f32.mrf.mxu3 }
 0x692   : > { %3094 = vmatmul.msk.f32.gmra.mxu0 %vm368_vm0, %v3053_v12 }
 0x694   : > { %2101 = vmatmul.f32.gmra.mxu3 %v3064_v45 }
 0x697   : > { %v4630_v26 = vpop.f32.mrf.mxu3 }
 0x69a   : > { %3095 = vmatmul.msk.f32.gmra.mxu0 %vm368_vm0, %v3055_v33 }
 0x69c   : > { %2104 = vmatmul.f32.gmra.mxu3 %v3066_v6 }
 0x69f   : > { %v4627_v53 = vpop.f32.mrf.mxu0  ;;  %v4637_v28 = vpop.f32.mrf.mxu3 }
 0x6a2   : > { %3096 = vmatmul.msk.f32.gmra.mxu0 %vm368_vm0, %v3057_v55 }
 0x6a4   : > { %2107 = vmatmul.f32.gmra.mxu3 %v3068_v23 }
 0x6a7   : > { %v4634_v39 = vpop.f32.mrf.mxu0  ;;  %v2060_v31 = vpop.f32.mrf.mxu3 }
 0x6aa   : > { %3097 = vmatmul.msk.f32.gmra.mxu0 %vm368_vm0, %v3059_v24 }
 0x6ac   : > { %2110 = vmatmul.f32.gmra.mxu3 %v3070_v52 }
 0x6af   : > { %v4641_v27 = vpop.f32.mrf.mxu0  ;;  %v2063_v46 = vpop.f32.mrf.mxu3 }
 0x6b2   : > { %3098 = vmatmul.msk.f32.gmra.mxu0 %vm368_vm0, %v3061_v49 }
 0x6b4   : > { %2113 = vmatmul.f32.gmra.mxu3 %v3072_v5 }
 0x6b7   : > { %v4646_v38 = vpop.f32.mrf.mxu0  ;;  %v2066_v41 = vpop.f32.mrf.mxu3 }
 0x6ba   : > { %3099 = vmatmul.msk.f32.gmra.mxu0 %vm368_vm0, %v3063_v56 }
 0x6bc   : > { %2116 = vmatmul.f32.gmra.mxu3 %v3074_v36 }
 0x6bf   : > { %v4651_v9 = vpop.f32.mrf.mxu0  ;;  %v2069_v13 = vpop.f32.mrf.mxu3 }
 0x6c0   : > { %v2156_v36 = vadd.f32 %v4651_v9, %v4630_v26  ;;  %v2144_v26 = vadd.f32 %v4627_v53, %v4604_v17  ;;  %v3282_v17 = vld [vmem:[%s4940_s3 + $0x68] sm:$0xff]  ;;  %v3283_v53 = vld [vmem:[%s4940_s3 + $0x60] sm:$0xff] }
 0x6c2   : > { %3100 = vmatmul.msk.f32.gmra.mxu0 %vm368_vm0, %v3065_v30 }
 0x6c4   : > { %2119 = vmatmul.f32.gmra.mxu3 %v3076_v3 }
 0x6c7   : > { %v4656_v8 = vpop.f32.mrf.mxu0  ;;  %v2072_v57 = vpop.f32.mrf.mxu3 }
 0x6ca   : > { %3101 = vmatmul.msk.f32.gmra.mxu0 %vm368_vm0, %v3067_v16 }
 0x6cc   : > { %2122 = vmatmul.f32.gmra.mxu3 %v3078_v40  ;;  %v3286_v40 = vld [vmem:[%s4940_s3 + $0x48] sm:$0xff] }
 0x6cf   : > { %v2161_v19 = vpop.f32.mrf.mxu0  ;;  %v2075_v60 = vpop.f32.mrf.mxu3 }
 0x6d0   : > { %v2162_v18 = vadd.f32 %v2161_v19, %v2060_v31 }
 0x6d2   : > { %3102 = vmatmul.msk.f32.gmra.mxu0 %vm368_vm0, %v3069_v61  ;;  %v2150_v61 = vadd.f32 %v4641_v27, %v4616_v51  ;;  %v3284_v27 = vld [vmem:[%s4940_s3 + $0x58] sm:$0xff] }
 0x6d7   : > { %v2164_v4 = vpop.f32.mrf.mxu0  ;;  %v2078_v22 = vpop.f32.mrf.mxu3 }
 0x6d8   : > { %v2165_v48 = vadd.f32 %v2164_v4, %v2063_v46 }
 0x6da   : > { %3103 = vmatmul.msk.f32.gmra.mxu0 %vm368_vm0, %v3071_v54  ;;  %v3287_v54 = vld [vmem:[%s4940_s3 + $0x40] sm:$0xff] }
 0x6df   : > { %v2167_v34 = vpop.f32.mrf.mxu0  ;;  %v1876_v42 = vpop.f32.mrf.mxu1 }
 0x6e0   : > { %v2168_v7 = vadd.f32 %v2167_v34, %v2066_v41  ;;  %v1877_v32 = vadd.f32 %v1876_v42, %v4613_v15  ;;  %v2081_v44 = vpop.f32.mrf.mxu3  ;;  %v2159_v41 = vadd.f32 %v4656_v8, %v4637_v28  ;;  %v2147_v28 = vadd.f32 %v4634_v39, %v4609_v20  ;;  %v3281_v20 = vld [vmem:[%s4940_s3 + $0x70] sm:$0xff]  ;;  %v3292_v42 = vld [vmem:[%s4940_s3 + $0x18] sm:$0xff] }
 0x6e2   : > { %3104 = vmatmul.msk.f32.gmra.mxu0 %vm368_vm0, %v3073_v43  ;;  %1882 = vst.msk [vmem:[%s4672_s28] sm:$0xff] %vm707_vm1, %v1877_v32  ;;  %v3290_v43 = vld [vmem:[%s4940_s3 + $0x28] sm:$0xff]  ;;  %v3293_v32 = vld [vmem:[%s4940_s3 + $0x10] sm:$0xff] }
 0x6e7   : > { %v2170_v14 = vpop.f32.mrf.mxu0  ;;  %v1879_v59 = vpop.f32.mrf.mxu1 }
 0x6e8   : > { %v1880_v10 = vadd.f32 %v1879_v59, %v4620_v21  ;;  %v2084_v11 = vpop.f32.mrf.mxu3  ;;  %v2171_v56 = vadd.f32 %v2170_v14, %v2069_v13  ;;  %v2153_v13 = vadd.f32 %v4646_v38, %v4623_v37  ;;  %v3280_v38 = vld [vmem:[%s4940_s3 + $0x78] sm:$0xff]  ;;  %v3294_v14 = vld [vmem:[%s4940_s3 + $0x8] sm:$0xff] }
 0x6ea   : > { %3105 = vmatmul.msk.f32.gmra.mxu0 %vm368_vm0, %v3075_v58  ;;  %1883 = vst.msk [vmem:[%s4672_s28 + $0x8] sm:$0xff] %vm707_vm1, %v1880_v10  ;;  %v3295_v10 = vld [vmem:[%s4940_s3] sm:$0xff] }
 0x6ef   : > { %v2173_v1 = vpop.f32.mrf.mxu0 }
 0x6f0   : > { %v2087_v25 = vpop.f32.mrf.mxu3  ;;  %v2174_v52 = vadd.f32 %v2173_v1, %v2072_v57 }
 0x6f2   : > { %3106 = vmatmul.msk.f32.gmra.mxu0 %vm368_vm0, %v3077_v0 }
 0x6f7   : > { %v2176_v35 = vpop.f32.mrf.mxu0 }
 0x6f8   : > { %v2090_v15 = vpop.f32.mrf.mxu3  ;;  %v2177_v49 = vadd.f32 %v2176_v35, %v2075_v60  ;;  %v3288_v60 = vld [vmem:[%s4940_s3 + $0x38] sm:$0xff] }
 0x6fa   : > { %3107 = vmatmul.msk.f32.gmra.mxu0 %vm368_vm0, %v3079_v50 }
 0x6ff   : > { %v2179_v62 = vpop.f32.mrf.mxu0 }
 0x700   : > { %v2093_v63 = vpop.f32.mrf.mxu3  ;;  %v2180_v24 = vadd.f32 %v2179_v62, %v2078_v22 }
 0x707   : > { %v2182_v47 = vpop.f32.mrf.mxu0 }
 0x708   : > { %v2096_v55 = vpop.f32.mrf.mxu3  ;;  %v2183_v6 = vadd.f32 %v2182_v47, %v2081_v44 }
 0x70f   : > { %v2185_v12 = vpop.f32.mrf.mxu0 }
 0x710   : > { %v2186_v45 = vadd.f32 %v2185_v12, %v2084_v11  ;;  %v2099_v46 = vpop.f32.mrf.mxu3 }
 0x717   : > { %v2188_v21 = vpop.f32.mrf.mxu0 }
 0x718   : > { %v2189_v33 = vadd.f32 %v2188_v21, %v2087_v25  ;;  %v2102_v3 = vpop.f32.mrf.mxu3 }
 0x71a   : > { %2227 = vmatpush.msra.mxu1 %v2189_v33 }
 0x71c   : > { %2228 = vmatpush.msra.mxu1 %v2186_v45  ;;  %v3112_v45 = vld [vmem:[%s3472_s9 + $0x380] sm:$0xff] }
 0x71e   : > { %2229 = vmatpush.msra.mxu1 %v2183_v6  ;;  %v3296_v6 = vld [vmem:[%s4940_s3 + $0xd8] sm:$0xff] }
 0x71f   : > { %v2191_v23 = vpop.f32.mrf.mxu0 }
 0x720   : > { %v4687_v31 = vadd.f32 %v2191_v23, %v2090_v15  ;;  %2230 = vmatpush.msra.mxu1 %v2180_v24  ;;  %v2105_v37 = vpop.f32.mrf.mxu3  ;;  %v4769_v24 = vld [vmem:[%s4939_s2 + $0x8] sm:$0xff]  ;;  %v3298_v23 = vld [vmem:[%s4940_s3 + $0xd0] sm:$0xff] }
 0x722   : > { %2231 = vmatpush.msra.mxu1 %v2177_v49  ;;  %v3299_v49 = vld [vmem:[%s4940_s3 + $0xc8] sm:$0xff] }
 0x724   : > { %2232 = vmatpush.msra.mxu1 %v2174_v52  ;;  %v3116_v52 = vld [vmem:[%s3472_s9 + $0x3a0] sm:$0xff] }
 0x726   : > { %2233 = vmatpush.msra.mxu1 %v2171_v56  ;;  %v3301_v56 = vld [vmem:[%s4940_s3 + $0xb8] sm:$0xff] }
 0x727   : > { %v2194_v5 = vpop.f32.mrf.mxu0 }
 0x728   : > { %v4689_v30 = vadd.f32 %v2194_v5, %v2093_v63  ;;  %2234 = vmatpush.msra.mxu1 %v2168_v7  ;;  %v2108_v57 = vpop.f32.mrf.mxu3  ;;  %v3291_v7 = vld [vmem:[%s4940_s3 + $0x20] sm:$0xff]  ;;  %v3303_v5 = vld [vmem:[%s4940_s3 + $0xb0] sm:$0xff] }
 0x72a   : > { %2235 = vmatpush.msra.mxu1 %v2165_v48  ;;  %v3289_v48 = vld [vmem:[%s4940_s3 + $0x30] sm:$0xff] }
 0x72c   : > { %2236 = vmatpush.msra.mxu1 %v2162_v18  ;;  %v3285_v18 = vld [vmem:[%s4940_s3 + $0x50] sm:$0xff] }
 0x72e   : > { %2237 = vmatpush.msra.mxu1 %v2159_v41  ;;  %v3305_v41 = vld [vmem:[%s4940_s3 + $0xa0] sm:$0xff] }
 0x72f   : > { %v2197_v16 = vpop.f32.mrf.mxu0 }
 0x730   : > { %v4697_v19 = vadd.f32 %v2197_v16, %v2096_v55  ;;  %2238 = vmatpush.msra.mxu1 %v2156_v36  ;;  %v2111_v34 = vpop.f32.mrf.mxu3  ;;  %v3114_v55 = vld [vmem:[%s3472_s9 + $0x390] sm:$0xff]  ;;  %v3306_v16 = vld [vmem:[%s4940_s3 + $0x98] sm:$0xff] }
 0x731   : > { %v3118_v36 = vld [vmem:[%s3472_s9 + $0x3b0] sm:$0xff] }
 0x732   : > { %2239 = vmatpush.msra.mxu1 %v2153_v13  ;;  %v3308_v13 = vld [vmem:[%s4940_s3 + $0x88] sm:$0xff] }
 0x734   : > { %2240 = vmatpush.msra.mxu1 %v2150_v61  ;;  %v3309_v61 = vld [vmem:[%s4940_s3 + $0x80] sm:$0xff] }
 0x736   : > { %2241 = vmatpush.msra.mxu1 %v2147_v28  ;;  %v3120_v28 = vld [vmem:[%s3472_s9 + $0x3c0] sm:$0xff] }
 0x737   : > { %v2200_v9 = vpop.f32.mrf.mxu0 }
 0x738   : > { %v4705_v8 = vadd.f32 %v2200_v9, %v2099_v46  ;;  %2242 = vmatpush.msra.mxu1 %v2144_v26  ;;  %v2114_v59 = vpop.f32.mrf.mxu3  ;;  %v4789_v46 = vld [vmem:[%s4939_s2 + $0x18] sm:$0xff]  ;;  %v3122_v9 = vld [vmem:[%s3472_s9 + $0x3d0] sm:$0xff] }
 0x739   : > { %2243 = vmatmul.f32.vlgmr.msra.gmra.mxu1 %v4528_v29  ;;  %v3115_v26 = vld [vmem:[%s3472_s9 + $0x398] sm:$0xff] }
 0x73a   : > { %2417 = vmatpush.msrb.mxu1 %v3280_v38  ;;  %v3119_v38 = vld [vmem:[%s3472_s9 + $0x3b8] sm:$0xff] }
 0x73c   : > { %2418 = vmatpush.msrb.mxu1 %v3281_v20  ;;  %v3126_v20 = vld [vmem:[%s3472_s9 + $0x3f0] sm:$0xff] }
 0x73e   : > { %2419 = vmatpush.msrb.mxu1 %v3282_v17  ;;  %v3121_v17 = vld [vmem:[%s3472_s9 + $0x3c8] sm:$0xff] }
 0x73f   : > { %v2203_v51 = vpop.f32.mrf.mxu0 }
 0x740   : > { %2420 = vmatpush.msrb.mxu1 %v3283_v53  ;;  %v2204_v39 = vadd.f32 %v2203_v51, %v2102_v3  ;;  %v2117_v1 = vpop.f32.mrf.mxu3  ;;  %v3307_v3 = vld [vmem:[%s4940_s3 + $0x90] sm:$0xff]  ;;  %v3128_v51 = vld [vmem:[%s3472_s9 + $0x400] sm:$0xff]  ;;  %v3123_v53 = vld [vmem:[%s3472_s9 + $0x3d8] sm:$0xff] }
 0x741   : > { %2246 = vmatmul.f32.gmra.mxu1 %v4541_v2 }
 0x742   : > { %2421 = vmatpush.msrb.mxu1 %v3284_v27  ;;  %v3125_v27 = vld [vmem:[%s3472_s9 + $0x3e8] sm:$0xff] }
 0x744   : > { %2422 = vmatpush.msrb.mxu1 %v3285_v18  ;;  %v3127_v18 = vld [vmem:[%s3472_s9 + $0x3f8] sm:$0xff] }
 0x746   : > { %2423 = vmatpush.msrb.mxu1 %v3286_v40  ;;  %v3134_v40 = vld [vmem:[%s3472_s9 + $0x430] sm:$0xff] }
 0x747   : > { %v2206_v4 = vpop.f32.mrf.mxu0 }
 0x748   : > { %2424 = vmatpush.msrb.mxu1 %v3287_v54  ;;  %v2120_v11 = vpop.f32.mrf.mxu3  ;;  %v2207_v33 = vadd.f32 %v2206_v4, %v2105_v37  ;;  %v3124_v37 = vld [vmem:[%s3472_s9 + $0x3e0] sm:$0xff]  ;;  %v3129_v4 = vld [vmem:[%s3472_s9 + $0x408] sm:$0xff] }
 0x749   : > { %v3136_v54 = vld [vmem:[%s3472_s9 + $0x440] sm:$0xff] }
 0x74a   : > { %2425 = vmatpush.msrb.mxu1 %v3288_v60  ;;  %v3131_v60 = vld [vmem:[%s3472_s9 + $0x418] sm:$0xff] }
 0x74c   : > { %2426 = vmatpush.msrb.mxu1 %v3289_v48  ;;  %v3138_v48 = vld [vmem:[%s3472_s9 + $0x450] sm:$0xff] }
 0x74e   : > { %2427 = vmatpush.msrb.mxu1 %v3290_v43 }
 0x74f   : > { %v2209_v22 = vpop.f32.mrf.mxu0 }
 0x750   : > { %2428 = vmatpush.msrb.mxu1 %v3291_v7  ;;  %v2123_v50 = vpop.f32.mrf.mxu3  ;;  %v2210_v21 = vadd.f32 %v2209_v22, %v2108_v57  ;;  %v3132_v57 = vld [vmem:[%s3472_s9 + $0x420] sm:$0xff]  ;;  %v3135_v7 = vld [vmem:[%s3472_s9 + $0x438] sm:$0xff] }
 0x751   : > { %v3140_v22 = vld [vmem:[%s3472_s9 + $0x460] sm:$0xff] }
 0x752   : > { %2429 = vmatpush.msrb.mxu1 %v3292_v42 }
 0x754   : > { %2430 = vmatpush.msrb.mxu1 %v3293_v32  ;;  %v3142_v32 = vld [vmem:[%s3472_s9 + $0x470] sm:$0xff] }
 0x756   : > { %2431 = vmatpush.msrb.mxu1 %v3294_v14  ;;  %v3137_v14 = vld [vmem:[%s3472_s9 + $0x448] sm:$0xff] }
 0x757   : > { %v2212_v58 = vpop.f32.mrf.mxu0 }
 0x758   : > { %2432 = vmatpush.msrb.mxu1 %v3295_v10  ;;  %v2213_v63 = vadd.f32 %v2212_v58, %v2111_v34  ;;  %v3133_v34 = vld [vmem:[%s3472_s9 + $0x428] sm:$0xff]  ;;  %v3139_v10 = vld [vmem:[%s3472_s9 + $0x458] sm:$0xff] }
 0x759   : > { %2433 = vmatmul.f32.vlgmr.msrb.gmra.mxu1 %v3112_v45 }
 0x75f   : > { %v2215_v44 = vpop.f32.mrf.mxu0 }
 0x760   : > { %v2216_v12 = vadd.f32 %v2215_v44, %v2114_v59  ;;  %v3144_v59 = vld [vmem:[%s3472_s9 + $0x480] sm:$0xff] }
 0x761   : > { %2436 = vmatmul.f32.gmra.mxu1 %v3114_v55 }
 0x767   : > { %v2218_v0 = vpop.f32.mrf.mxu0 }
 0x768   : > { %v2219_v15 = vadd.f32 %v2218_v0, %v2117_v1  ;;  %v3146_v1 = vld [vmem:[%s3472_s9 + $0x490] sm:$0xff]  ;;  %v3141_v0 = vld [vmem:[%s3472_s9 + $0x468] sm:$0xff] }
 0x769   : > { %2439 = vmatmul.f32.gmra.mxu1 %v3116_v52 }
 0x76f   : > { %v2221_v35 = vpop.f32.mrf.mxu0 }
 0x770   : > { %v2222_v47 = vadd.f32 %v2221_v35, %v2120_v11 }
 0x771   : > { %2442 = vmatmul.f32.gmra.mxu1 %v3118_v36 }
 0x777   : > { %v2224_v25 = vpop.f32.mrf.mxu0 }
 0x778   : > { %v2225_v62 = vadd.f32 %v2224_v25, %v2123_v50  ;;  %v3148_v25 = vld [vmem:[%s3472_s9 + $0x4a0] sm:$0xff] }
 0x779   : > { %2445 = vmatmul.f32.gmra.mxu1 %v3120_v28  ;;  %v3158_v28 = vld [vmem:[%s3472_s9 + $0x4f0] sm:$0xff] }
 0x77a   : > { %2254 = vmatpush.msra.mxu2 %v2225_v62  ;;  %v3143_v62 = vld [vmem:[%s3472_s9 + $0x478] sm:$0xff] }
 0x77c   : > { %2255 = vmatpush.msra.mxu2 %v2222_v47 }
 0x77e   : > { %2256 = vmatpush.msra.mxu2 %v2219_v15 }
 0x780   : > { %2257 = vmatpush.msra.mxu2 %v2216_v12 }
 0x781   : > { %2448 = vmatmul.f32.gmra.mxu1 %v3122_v9 }
 0x782   : > { %2258 = vmatpush.msra.mxu2 %v2213_v63  ;;  %v3150_v63 = vld [vmem:[%s3472_s9 + $0x4b0] sm:$0xff] }
 0x784   : > { %2259 = vmatpush.msra.mxu2 %v2210_v21  ;;  %v3145_v21 = vld [vmem:[%s3472_s9 + $0x488] sm:$0xff] }
 0x786   : > { %2260 = vmatpush.msra.mxu2 %v2207_v33 }
 0x788   : > { %2261 = vmatpush.msra.mxu2 %v2204_v39  ;;  %v3130_v39 = vld [vmem:[%s3472_s9 + $0x410] sm:$0xff] }
 0x789   : > { %2451 = vmatmul.f32.gmra.mxu1 %v3124_v37 }
 0x78a   : > { %2262 = vmatpush.msra.mxu2 %v4705_v8  ;;  %v3117_v8 = vld [vmem:[%s3472_s9 + $0x3a8] sm:$0xff] }
 0x78c   : > { %2263 = vmatpush.msra.mxu2 %v4697_v19  ;;  %v3113_v19 = vld [vmem:[%s3472_s9 + $0x388] sm:$0xff] }
 0x78e   : > { %2264 = vmatpush.msra.mxu2 %v4689_v30  ;;  %v3304_v30 = vld [vmem:[%s4940_s3 + $0xa8] sm:$0xff] }
 0x790   : > { %2265 = vmatpush.msra.mxu2 %v4687_v31  ;;  %v3300_v31 = vld [vmem:[%s4940_s3 + $0xc0] sm:$0xff] }
 0x791   : > { %3108 = vmatmul.msk.f32.vlgmr.msra.gmra.mxu2 %vm368_vm0, %v4769_v24  ;;  %2454 = vmatmul.f32.gmra.mxu1 %v3126_v20  ;;  %v3155_v20 = vld [vmem:[%s3472_s9 + $0x4d8] sm:$0xff] }
 0x792   : > { %2522 = vmatpush.msrb.mxu2 %v3296_v6  ;;  %v3152_v6 = vld [vmem:[%s3472_s9 + $0x4c0] sm:$0xff] }
 0x794   : > { %2523 = vmatpush.msrb.mxu2 %v3298_v23  ;;  %v3147_v23 = vld [vmem:[%s3472_s9 + $0x498] sm:$0xff] }
 0x796   : > { %2524 = vmatpush.msrb.mxu2 %v3299_v49 }
 0x798   : > { %2525 = vmatpush.msrb.mxu2 %v3300_v31 }
 0x799   : > { %3109 = vmatmul.msk.f32.gmra.mxu2 %vm368_vm0, %v4789_v46  ;;  %2457 = vmatmul.f32.gmra.mxu1 %v3128_v51 }
 0x79a   : > { %2526 = vmatpush.msrb.mxu2 %v3301_v56  ;;  %v3154_v56 = vld [vmem:[%s3472_s9 + $0x4d0] sm:$0xff] }
 0x79c   : > { %2527 = vmatpush.msrb.mxu2 %v3303_v5  ;;  %v3149_v5 = vld [vmem:[%s3472_s9 + $0x4a8] sm:$0xff] }
 0x79e   : > { %2528 = vmatpush.msrb.mxu2 %v3304_v30 }
 0x7a0   : > { %2529 = vmatpush.msrb.mxu2 %v3305_v41 }
 0x7a1   : > { %2460 = vmatmul.f32.gmra.mxu1 %v3130_v39  ;;  %v3162_v39 = vld [vmem:[%s3472_s9 + $0x510] sm:$0xff] }
 0x7a2   : > { %2530 = vmatpush.msrb.mxu2 %v3306_v16  ;;  %v3156_v16 = vld [vmem:[%s3472_s9 + $0x4e0] sm:$0xff] }
 0x7a4   : > { %2531 = vmatpush.msrb.mxu2 %v3307_v3  ;;  %v3151_v3 = vld [vmem:[%s3472_s9 + $0x4b8] sm:$0xff] }
 0x7a6   : > { %2532 = vmatpush.msrb.mxu2 %v3308_v13 }
 0x7a8   : > { %2533 = vmatpush.msrb.mxu2 %v3309_v61 }
 0x7a9   : > { %3168 = vmatmul.msk.f32.vlgmr.msrb.gmra.mxu2 %vm368_vm0, %v3113_v19  ;;  %2463 = vmatmul.f32.gmra.mxu1 %v3132_v57 }
 0x7b1   : > { %3169 = vmatmul.msk.f32.gmra.mxu2 %vm368_vm0, %v3115_v26  ;;  %2466 = vmatmul.f32.gmra.mxu1 %v3134_v40  ;;  %v3153_v26 = vld [vmem:[%s3472_s9 + $0x4c8] sm:$0xff] }
 0x7b6   : > { %v2244_v43 = vpop.f32.mrf.mxu1 }
 0x7b9   : > { %3170 = vmatmul.msk.f32.gmra.mxu2 %vm368_vm0, %v3117_v8  ;;  %2469 = vmatmul.f32.gmra.mxu1 %v3136_v54  ;;  %v3159_v54 = vld [vmem:[%s3472_s9 + $0x4f8] sm:$0xff] }
 0x7be   : > { %v2247_v42 = vpop.f32.mrf.mxu1 }
 0x7c1   : > { %3171 = vmatmul.msk.f32.gmra.mxu2 %vm368_vm0, %v3119_v38  ;;  %2472 = vmatmul.f32.gmra.mxu1 %v3138_v48  ;;  %v3160_v38 = vld [vmem:[%s3472_s9 + $0x500] sm:$0xff] }
 0x7c9   : > { %3172 = vmatmul.msk.f32.gmra.mxu2 %vm368_vm0, %v3121_v17  ;;  %2475 = vmatmul.f32.gmra.mxu1 %v3140_v22  ;;  %v3161_v22 = vld [vmem:[%s3472_s9 + $0x508] sm:$0xff] }
 0x7d1   : > { %3173 = vmatmul.msk.f32.gmra.mxu2 %vm368_vm0, %v3123_v53  ;;  %2478 = vmatmul.f32.gmra.mxu1 %v3142_v32 }
 0x7d6   : > { %v2434_v58 = vpop.f32.mrf.mxu1 }
 0x7d9   : > { %3174 = vmatmul.msk.f32.gmra.mxu2 %vm368_vm0, %v3125_v27  ;;  %2481 = vmatmul.f32.gmra.mxu1 %v3144_v59  ;;  %v3157_v27 = vld [vmem:[%s3472_s9 + $0x4e8] sm:$0xff] }
 0x7da   : > { %v3165_v59 = vld [vmem:[%s3472_s9 + $0x528] sm:$0xff] }
 0x7de   : > { %v2437_v44 = vpop.f32.mrf.mxu1 }
 0x7e1   : > { %3175 = vmatmul.msk.f32.gmra.mxu2 %vm368_vm0, %v3127_v18  ;;  %2484 = vmatmul.f32.gmra.mxu1 %v3146_v1  ;;  %v3167_v1 = vld [vmem:[%s3472_s9 + $0x538] sm:$0xff] }
 0x7e6   : > { %v2440_v50 = vpop.f32.mrf.mxu1 }
 0x7e9   : > { %3176 = vmatmul.msk.f32.gmra.mxu2 %vm368_vm0, %v3129_v4  ;;  %2487 = vmatmul.f32.gmra.mxu1 %v3148_v25  ;;  %v3164_v4 = vld [vmem:[%s3472_s9 + $0x520] sm:$0xff] }
 0x7ee   : > { %v2443_v12 = vpop.f32.mrf.mxu1 }
 0x7f1   : > { %3177 = vmatmul.msk.f32.gmra.mxu2 %vm368_vm0, %v3131_v60  ;;  %2490 = vmatmul.f32.gmra.mxu1 %v3150_v63 }
 0x7f6   : > { %v2446_v33 = vpop.f32.mrf.mxu1 }
 0x7f9   : > { %3178 = vmatmul.msk.f32.gmra.mxu2 %vm368_vm0, %v3133_v34  ;;  %2493 = vmatmul.f32.gmra.mxu1 %v3152_v6 }
 0x7fe   : > { %v2449_v49 = vpop.f32.mrf.mxu1 }
 0x801   : > { %3179 = vmatmul.msk.f32.gmra.mxu2 %vm368_vm0, %v3135_v7  ;;  %2496 = vmatmul.f32.gmra.mxu1 %v3154_v56 }
 0x806   : > { %v2452_v30 = vpop.f32.mrf.mxu1 }
 0x809   : > { %3180 = vmatmul.msk.f32.gmra.mxu2 %vm368_vm0, %v3137_v14  ;;  %2499 = vmatmul.f32.gmra.mxu1 %v3156_v16  ;;  %v3163_v14 = vld [vmem:[%s3472_s9 + $0x518] sm:$0xff] }
 0x80e   : > { %v2455_v13 = vpop.f32.mrf.mxu1 }
 0x811   : > { %3181 = vmatmul.msk.f32.gmra.mxu2 %vm368_vm0, %v3139_v10  ;;  %2502 = vmatmul.f32.gmra.mxu1 %v3158_v28 }
 0x814   : > { %v2267_v11 = vpop.f32.mrf.mxu2 }
 0x815   : > { %v2268_v35 = vadd.f32 %v2267_v11, %v2244_v43  ;;  %v3166_v43 = vld [vmem:[%s3472_s9 + $0x530] sm:$0xff] }
 0x816   : > { %v2458_v9 = vpop.f32.mrf.mxu1 }
 0x817   : > { %3110 = vst.msk [vmem:[%s4672_s28 + $0x10] sm:$0xff] %vm707_vm1, %v2268_v35 }
 0x819   : > { %3182 = vmatmul.msk.f32.gmra.mxu2 %vm368_vm0, %v3141_v0  ;;  %2505 = vmatmul.f32.gmra.mxu1 %v3160_v38 }
 0x81c   : > { %v2270_v47 = vpop.f32.mrf.mxu2 }
 0x81d   : > { %v2271_v15 = vadd.f32 %v2270_v47, %v2247_v42 }
 0x81e   : > { %v2461_v17 = vpop.f32.mrf.mxu1 }
 0x81f   : > { %3111 = vst.msk [vmem:[%s4672_s28 + $0x18] sm:$0xff] %vm707_vm1, %v2271_v15 }
 0x821   : > { %3183 = vmatmul.msk.f32.gmra.mxu2 %vm368_vm0, %v3143_v62  ;;  %2508 = vmatmul.f32.gmra.mxu1 %v3162_v39 }
 0x826   : > { %v2464_v57 = vpop.f32.mrf.mxu1 }
 0x829   : > { %3184 = vmatmul.msk.f32.gmra.mxu2 %vm368_vm0, %v3145_v21  ;;  %2511 = vmatmul.f32.gmra.mxu1 %v3164_v4 }
 0x82c   : > { %v2535_v45 = vpop.f32.mrf.mxu2 }
 0x82d   : > { %v4869_v55 = vadd.f32 %v2535_v45, %v2434_v58 }
 0x82e   : > { %v2467_v60 = vpop.f32.mrf.mxu1 }
 0x831   : > { %3185 = vmatmul.msk.f32.gmra.mxu2 %vm368_vm0, %v3147_v23  ;;  %2514 = vmatmul.f32.gmra.mxu1 %v3166_v43 }
 0x834   : > { %v2538_v31 = vpop.f32.mrf.mxu2 }
 0x835   : > { %v4874_v52 = vadd.f32 %v2538_v31, %v2437_v44 }
 0x836   : > { %v2470_v42 = vpop.f32.mrf.mxu1 }
 0x839   : > { %3186 = vmatmul.msk.f32.gmra.mxu2 %vm368_vm0, %v3149_v5 }
 0x83c   : > { %v2541_v41 = vpop.f32.mrf.mxu2 }
 0x83d   : > { %v4879_v36 = vadd.f32 %v2541_v41, %v2440_v50 }
 0x83e   : > { %v2473_v10 = vpop.f32.mrf.mxu1 }
 0x841   : > { %3187 = vmatmul.msk.f32.gmra.mxu2 %vm368_vm0, %v3151_v3 }
 0x844   : > { %v2544_v19 = vpop.f32.mrf.mxu2 }
 0x845   : > { %v4884_v61 = vadd.f32 %v2544_v19, %v2443_v12 }
 0x846   : > { %v2476_v0 = vpop.f32.mrf.mxu1 }
 0x849   : > { %3188 = vmatmul.msk.f32.gmra.mxu2 %vm368_vm0, %v3153_v26 }
 0x84c   : > { %v2547_v8 = vpop.f32.mrf.mxu2 }
 0x84d   : > { %v4889_v37 = vadd.f32 %v2547_v8, %v2446_v33 }
 0x84e   : > { %v2479_v35 = vpop.f32.mrf.mxu1 }
 0x851   : > { %3189 = vmatmul.msk.f32.gmra.mxu2 %vm368_vm0, %v3155_v20 }
 0x854   : > { %v2550_v51 = vpop.f32.mrf.mxu2 }
 0x855   : > { %v2551_v53 = vadd.f32 %v2550_v51, %v2449_v49 }
 0x856   : > { %v2482_v62 = vpop.f32.mrf.mxu1 }
 0x859   : > { %3190 = vmatmul.msk.f32.gmra.mxu2 %vm368_vm0, %v3157_v27 }
 0x85c   : > { %v2553_v18 = vpop.f32.mrf.mxu2 }
 0x85d   : > { %v2554_v40 = vadd.f32 %v2553_v18, %v2452_v30 }
 0x85e   : > { %v2485_v15 = vpop.f32.mrf.mxu1 }
 0x861   : > { %3191 = vmatmul.msk.f32.gmra.mxu2 %vm368_vm0, %v3159_v54 }
 0x864   : > { %v2556_v48 = vpop.f32.mrf.mxu2 }
 0x865   : > { %v2557_v34 = vadd.f32 %v2556_v48, %v2455_v13 }
 0x866   : > { %v2488_v33 = vpop.f32.mrf.mxu1 }
 0x869   : > { %3192 = vmatmul.msk.f32.gmra.mxu2 %vm368_vm0, %v3161_v22 }
 0x86c   : > { %v2559_v7 = vpop.f32.mrf.mxu2 }
 0x86d   : > { %v2560_v32 = vadd.f32 %v2559_v7, %v2458_v9 }
 0x86e   : > { %v2491_v30 = vpop.f32.mrf.mxu1 }
 0x871   : > { %3193 = vmatmul.msk.f32.gmra.mxu2 %vm368_vm0, %v3163_v14 }
 0x874   : > { %v2562_v58 = vpop.f32.mrf.mxu2 }
 0x875   : > { %v2563_v5 = vadd.f32 %v2562_v58, %v2461_v17 }
 0x876   : > { %v2494_v13 = vpop.f32.mrf.mxu1 }
 0x879   : > { %3194 = vmatmul.msk.f32.gmra.mxu2 %vm368_vm0, %v3165_v59 }
 0x87c   : > { %v2565_v44 = vpop.f32.mrf.mxu2 }
 0x87d   : > { %v2566_v56 = vadd.f32 %v2565_v44, %v2464_v57 }
 0x87e   : > { %v2497_v9 = vpop.f32.mrf.mxu1 }
 0x881   : > { %3195 = vmatmul.msk.f32.gmra.mxu2 %vm368_vm0, %v3167_v1 }
 0x884   : > { %v2568_v11 = vpop.f32.mrf.mxu2 }
 0x885   : > { %v2569_v49 = vadd.f32 %v2568_v11, %v2467_v60 }
 0x886   : > { %v2500_v20 = vpop.f32.mrf.mxu1 }
 0x88c   : > { %v2571_v50 = vpop.f32.mrf.mxu2 }
 0x88d   : > { %v2572_v6 = vadd.f32 %v2571_v50, %v2470_v42 }
 0x894   : > { %v2574_v25 = vpop.f32.mrf.mxu2 }
 0x895   : > { %v2575_v45 = vadd.f32 %v2574_v25, %v2473_v10 }
 0x89c   : > { %v2577_v47 = vpop.f32.mrf.mxu2 }
 0x89d   : > { %v2578_v21 = vadd.f32 %v2577_v47, %v2476_v0 }
 0x8a4   : > { %v2580_v12 = vpop.f32.mrf.mxu2 }
 0x8a5   : > { %v2581_v63 = vadd.f32 %v2580_v12, %v2479_v35 }
 0x8a7   : > { %2619 = vmatpush.msrb.mxu0 %v2581_v63 }
 0x8a9   : > { %2620 = vmatpush.msrb.mxu0 %v2578_v21 }
 0x8ab   : > { %2621 = vmatpush.msrb.mxu0 %v2575_v45 }
 0x8ac   : > { %v2583_v23 = vpop.f32.mrf.mxu2 }
 0x8ad   : > { %v2584_v31 = vadd.f32 %v2583_v23, %v2482_v62  ;;  %2622 = vmatpush.msrb.mxu0 %v2572_v6 }
 0x8af   : > { %2623 = vmatpush.msrb.mxu0 %v2569_v49 }
 0x8b1   : > { %2624 = vmatpush.msrb.mxu0 %v2566_v56 }
 0x8b3   : > { %2625 = vmatpush.msrb.mxu0 %v2563_v5 }
 0x8b4   : > { %v2586_v41 = vpop.f32.mrf.mxu2 }
 0x8b5   : > { %v2587_v16 = vadd.f32 %v2586_v41, %v2485_v15  ;;  %2626 = vmatpush.msrb.mxu0 %v2560_v32 }
 0x8b7   : > { %2627 = vmatpush.msrb.mxu0 %v2557_v34 }
 0x8b9   : > { %2628 = vmatpush.msrb.mxu0 %v2554_v40 }
 0x8bb   : > { %2629 = vmatpush.msrb.mxu0 %v2551_v53 }
 0x8bc   : > { %v2589_v3 = vpop.f32.mrf.mxu2 }
 0x8bd   : > { %v2590_v19 = vadd.f32 %v2589_v3, %v2488_v33  ;;  %2630 = vmatpush.msrb.mxu0 %v4889_v37  ;;  %v2503_v37 = vpop.f32.mrf.mxu1 }
 0x8bf   : > { %2631 = vmatpush.msrb.mxu0 %v4884_v61 }
 0x8c1   : > { %2632 = vmatpush.msrb.mxu0 %v4879_v36 }
 0x8c3   : > { %2633 = vmatpush.msrb.mxu0 %v4874_v52 }
 0x8c4   : > { %v2592_v28 = vpop.f32.mrf.mxu2 }
 0x8c5   : > { %v2593_v26 = vadd.f32 %v2592_v28, %v2491_v30  ;;  %2634 = vmatpush.msrb.mxu0 %v4869_v55  ;;  %v2506_v53 = vpop.f32.mrf.mxu1 }
 0x8c6   : > { %2635 = vmatmul.f32.vlgmr.msrb.gmra.mxu0 %v4528_v29 }
 0x8cc   : > { %v2595_v8 = vpop.f32.mrf.mxu2 }
 0x8cd   : > { %v2596_v38 = vadd.f32 %v2595_v8, %v2494_v13  ;;  %v2509_v39 = vpop.f32.mrf.mxu1 }
 0x8ce   : > { %2638 = vmatmul.f32.gmra.mxu0 %v4541_v2 }
 0x8d4   : > { %v2598_v17 = vpop.f32.mrf.mxu2 }
 0x8d5   : > { %v2512_v27 = vpop.f32.mrf.mxu1  ;;  %v2599_v48 = vadd.f32 %v2598_v17, %v2497_v9 }
 0x8dc   : > { %v2601_v51 = vpop.f32.mrf.mxu2 }
 0x8dd   : > { %v2515_v18 = vpop.f32.mrf.mxu1  ;;  %v2602_v60 = vadd.f32 %v2601_v51, %v2500_v20 }
 0x8e4   : > { %v2604_v61 = vpop.f32.mrf.mxu2 }
 0x8e5   : > { %v2605_v2 = vadd.f32 %v2604_v61, %v2503_v37 }
 0x8ec   : > { %v2607_v36 = vpop.f32.mrf.mxu2 }
 0x8ed   : > { %v2608_v54 = vadd.f32 %v2607_v36, %v2506_v53 }
 0x8f4   : > { %v2610_v52 = vpop.f32.mrf.mxu2 }
 0x8f5   : > { %v2611_v29 = vadd.f32 %v2610_v52, %v2509_v39 }
 0x8fc   : > { %v2613_v57 = vpop.f32.mrf.mxu2 }
 0x8fd   : > { %v2614_v4 = vadd.f32 %v2613_v57, %v2512_v27 }
 0x904   : > { %v2616_v55 = vpop.f32.mrf.mxu2 }
 0x905   : > { %v2617_v40 = vadd.f32 %v2616_v55, %v2515_v18 }
 0x907   : > { %2646 = vmatpush.msrb.mxu3 %v2617_v40 }
 0x909   : > { %2647 = vmatpush.msrb.mxu3 %v2614_v4 }
 0x90b   : > { %2648 = vmatpush.msrb.mxu3 %v2611_v29 }
 0x90d   : > { %2649 = vmatpush.msrb.mxu3 %v2608_v54 }
 0x90f   : > { %2650 = vmatpush.msrb.mxu3 %v2605_v2 }
 0x911   : > { %2651 = vmatpush.msrb.mxu3 %v2602_v60 }
 0x913   : > { %2652 = vmatpush.msrb.mxu3 %v2599_v48 }
 0x915   : > { %2653 = vmatpush.msrb.mxu3 %v2596_v38 }
 0x917   : > { %2654 = vmatpush.msrb.mxu3 %v2593_v26 }
 0x919   : > { %2655 = vmatpush.msrb.mxu3 %v2590_v19 }
 0x91b   : > { %2656 = vmatpush.msrb.mxu3 %v2587_v16 }
 0x91d   : > { %2657 = vmatpush.msrb.mxu3 %v2584_v31 }
 0x91e   : > { %3196 = vmatmul.msk.f32.vlgmr.msrb.gmra.mxu3 %vm368_vm0, %v4769_v24 }
 0x926   : > { %3197 = vmatmul.msk.f32.gmra.mxu3 %vm368_vm0, %v4789_v46 }
 0x943   : > { %v2636_v34 = vpop.f32.mrf.mxu0 }
 0x94b   : > { %v2639_v7 = vpop.f32.mrf.mxu0 }
 0x9a1   : > { %v2659_v43 = vpop.f32.mrf.mxu3 }
 0x9a2   : > { %v2660_v22 = vadd.f32 %v2659_v43, %v2636_v34 }
 0x9a4   : > { %3198 = vst.msk [vmem:[%s4672_s28 + $0x20] sm:$0xff] %vm707_vm1, %v2660_v22 }
 0x9a9   : > { %v2662_v42 = vpop.f32.mrf.mxu3 }
 0x9aa   : > { %v2663_v32 = vadd.f32 %v2662_v42, %v2639_v7 }
 0x9ac   : > { %3199 = vst.msk [vmem:[%s4672_s28 + $0x28] sm:$0xff] %vm707_vm1, %v2663_v32 }
 0x9ad PF: > { %p16_p7 = scmp.ge.s32.totalorder %s3430_s23, 4   ;;  %s4969_s18 = smov %s3366_s19 }
 0x9ae   : > { %s4970_s19 = smov %s3370_s20  ;;  %s4971_s20 = smov %s3440_s26 }
 0x9af   : > { %s4972_s21 = smov %s3430_s23  ;;  %18 = sbr.rel (!%p16_p7) target bundleno = 3 (0x3), region = 99 }
 0x9b4   :  { %2705 = vsyncpa [#allocation3], 1 }
 0x9b5   :  { %2707 = vsyncpa [#allocation3 + $0x1], 1 }

// kernel: id_loss_forward.3
= control target key start
LH: loop header
LB: loop body
LE: loop exit
PB: predicated region body
PF: predicated region fallthrough
CT: control target
= control target key end

     0   :  { %s2247_s0 = inlined_call_operand.vmem [shape: f32[4,768], index: 0, kind: input, shape index: {}]   ;;  %s2248_s1 = inlined_call_operand.vmem [shape: f32[768,512], index: 1, kind: input, shape index: {}]   ;;  %s2249_s2 = inlined_call_operand.hbm [shape: f32[1,1], index: 2, kind: output, shape index: {}]  }
   0x1   :  { %v75_v0 = vld [vmem:[%s2248_s1 + $0x1e0] sm:$0xff]  ;;  %v76_v63 = vld [vmem:[%s2248_s1 + $0x1e8] sm:$0xff] }
   0x2   :  { %v203_v1 = vld [vmem:[%s2248_s1 + $0x5e0] sm:$0xff]  ;;  %419 = vmatpush.msra.mxu0 %v75_v0 }
   0x3   :  { %v71_v2 = vld [vmem:[%s2248_s1 + $0x1c0] sm:$0xff]  ;;  %459 = vmatpush.msra.mxu2 %v203_v1 }
   0x4   :  { %v139_v3 = vld [vmem:[%s2248_s1 + $0x3e0] sm:$0xff]  ;;  %420 = vmatpush.msra.mxu0 %v71_v2 }
   0x5   :  { %v199_v4 = vld [vmem:[%s2248_s1 + $0x5c0] sm:$0xff]  ;;  %439 = vmatpush.msra.mxu1 %v139_v3 }
   0x6   :  { %v267_v5 = vld [vmem:[%s2248_s1 + $0x7e0] sm:$0xff]  ;;  %460 = vmatpush.msra.mxu2 %v199_v4  ;;  %v72_v4 = vld [vmem:[%s2248_s1 + $0x1c8] sm:$0xff] }
   0x7   :  { %479 = vmatpush.msra.mxu3 %v267_v5  ;;  %v67_v6 = vld [vmem:[%s2248_s1 + $0x1a0] sm:$0xff]  ;;  %v140_v5 = vld [vmem:[%s2248_s1 + $0x3e8] sm:$0xff] }
   0x8   :  { %v135_v7 = vld [vmem:[%s2248_s1 + $0x3c0] sm:$0xff]  ;;  %421 = vmatpush.msra.mxu0 %v67_v6 }
   0x9   :  { %v195_v8 = vld [vmem:[%s2248_s1 + $0x5a0] sm:$0xff]  ;;  %440 = vmatpush.msra.mxu1 %v135_v7 }
   0xa   :  { %v263_v9 = vld [vmem:[%s2248_s1 + $0x7c0] sm:$0xff]  ;;  %461 = vmatpush.msra.mxu2 %v195_v8  ;;  %v68_v8 = vld [vmem:[%s2248_s1 + $0x1a8] sm:$0xff] }
   0xb   :  { %v131_v10 = vld [vmem:[%s2248_s1 + $0x3a0] sm:$0xff]  ;;  %480 = vmatpush.msra.mxu3 %v263_v9  ;;  %v136_v9 = vld [vmem:[%s2248_s1 + $0x3c8] sm:$0xff] }
   0xc   :  { %v63_v11 = vld [vmem:[%s2248_s1 + $0x180] sm:$0xff]  ;;  %441 = vmatpush.msra.mxu1 %v131_v10 }
   0xd   :  { %v191_v12 = vld [vmem:[%s2248_s1 + $0x580] sm:$0xff]  ;;  %422 = vmatpush.msra.mxu0 %v63_v11 }
   0xe   :  { %v259_v13 = vld [vmem:[%s2248_s1 + $0x7a0] sm:$0xff]  ;;  %462 = vmatpush.msra.mxu2 %v191_v12  ;;  %v64_v12 = vld [vmem:[%s2248_s1 + $0x188] sm:$0xff] }
   0xf   :  { %v127_v14 = vld [vmem:[%s2248_s1 + $0x380] sm:$0xff]  ;;  %481 = vmatpush.msra.mxu3 %v259_v13  ;;  %v132_v13 = vld [vmem:[%s2248_s1 + $0x3a8] sm:$0xff] }
  0x10   :  { %v255_v15 = vld [vmem:[%s2248_s1 + $0x780] sm:$0xff]  ;;  %442 = vmatpush.msra.mxu1 %v127_v14 }
  0x11   :  { %v59_v16 = vld [vmem:[%s2248_s1 + $0x160] sm:$0xff]  ;;  %482 = vmatpush.msra.mxu3 %v255_v15 }
  0x12   :  { %v187_v17 = vld [vmem:[%s2248_s1 + $0x560] sm:$0xff]  ;;  %423 = vmatpush.msra.mxu0 %v59_v16  ;;  %v60_v16 = vld [vmem:[%s2248_s1 + $0x168] sm:$0xff] }
  0x13   :  { %v123_v18 = vld [vmem:[%s2248_s1 + $0x360] sm:$0xff]  ;;  %463 = vmatpush.msra.mxu2 %v187_v17  ;;  %v128_v17 = vld [vmem:[%s2248_s1 + $0x388] sm:$0xff] }
  0x14   :  { %v251_v19 = vld [vmem:[%s2248_s1 + $0x760] sm:$0xff]  ;;  %443 = vmatpush.msra.mxu1 %v123_v18 }
  0x15   :  { %v55_v20 = vld [vmem:[%s2248_s1 + $0x140] sm:$0xff]  ;;  %483 = vmatpush.msra.mxu3 %v251_v19 }
  0x16   :  { %v183_v21 = vld [vmem:[%s2248_s1 + $0x540] sm:$0xff]  ;;  %424 = vmatpush.msra.mxu0 %v55_v20  ;;  %v56_v20 = vld [vmem:[%s2248_s1 + $0x148] sm:$0xff] }
  0x17   :  { %v119_v22 = vld [vmem:[%s2248_s1 + $0x340] sm:$0xff]  ;;  %464 = vmatpush.msra.mxu2 %v183_v21  ;;  %v124_v21 = vld [vmem:[%s2248_s1 + $0x368] sm:$0xff] }
  0x18   :  { %v247_v23 = vld [vmem:[%s2248_s1 + $0x740] sm:$0xff]  ;;  %444 = vmatpush.msra.mxu1 %v119_v22  ;;  %v13_v22 = vld [vmem:[%s2247_s0 + $0x8] sm:$0xff] }
  0x19   :  { %v51_v24 = vld [vmem:[%s2248_s1 + $0x120] sm:$0xff]  ;;  %484 = vmatpush.msra.mxu3 %v247_v23  ;;  %404 = vst [vmem:[#allocation1 + $0x10] ss:$2 sm:$0xff] %v13_v22 }
  0x1a   :  { %v179_v25 = vld [vmem:[%s2248_s1 + $0x520] sm:$0xff]  ;;  %425 = vmatpush.msra.mxu0 %v51_v24 }
  0x1b   :  { %v115_v26 = vld [vmem:[%s2248_s1 + $0x320] sm:$0xff]  ;;  %465 = vmatpush.msra.mxu2 %v179_v25  ;;  %v52_v25 = vld [vmem:[%s2248_s1 + $0x128] sm:$0xff] }
  0x1c   :  { %v243_v27 = vld [vmem:[%s2248_s1 + $0x720] sm:$0xff]  ;;  %445 = vmatpush.msra.mxu1 %v115_v26  ;;  %v120_v26 = vld [vmem:[%s2248_s1 + $0x348] sm:$0xff] }
  0x1d   :  { %v47_v28 = vld [vmem:[%s2248_s1 + $0x100] sm:$0xff]  ;;  %485 = vmatpush.msra.mxu3 %v243_v27 }
  0x1e   :  { %v175_v29 = vld [vmem:[%s2248_s1 + $0x500] sm:$0xff]  ;;  %426 = vmatpush.msra.mxu0 %v47_v28 }
  0x1f   :  { %v111_v30 = vld [vmem:[%s2248_s1 + $0x300] sm:$0xff]  ;;  %466 = vmatpush.msra.mxu2 %v175_v29 }
  0x20   :  { %v239_v31 = vld [vmem:[%s2248_s1 + $0x700] sm:$0xff]  ;;  %446 = vmatpush.msra.mxu1 %v111_v30  ;;  %v48_v30 = vld [vmem:[%s2248_s1 + $0x108] sm:$0xff] }
  0x21   :  { %v43_v32 = vld [vmem:[%s2248_s1 + $0xe0] sm:$0xff]  ;;  %486 = vmatpush.msra.mxu3 %v239_v31  ;;  %v116_v31 = vld [vmem:[%s2248_s1 + $0x328] sm:$0xff] }
  0x22   :  { %v171_v33 = vld [vmem:[%s2248_s1 + $0x4e0] sm:$0xff]  ;;  %427 = vmatpush.msra.mxu0 %v43_v32 }
  0x23   :  { %v107_v34 = vld [vmem:[%s2248_s1 + $0x2e0] sm:$0xff]  ;;  %467 = vmatpush.msra.mxu2 %v171_v33 }
  0x24   :  { %v235_v35 = vld [vmem:[%s2248_s1 + $0x6e0] sm:$0xff]  ;;  %447 = vmatpush.msra.mxu1 %v107_v34  ;;  %v44_v34 = vld [vmem:[%s2248_s1 + $0xe8] sm:$0xff] }
  0x25   :  { %v39_v36 = vld [vmem:[%s2248_s1 + $0xc0] sm:$0xff]  ;;  %487 = vmatpush.msra.mxu3 %v235_v35  ;;  %v112_v35 = vld [vmem:[%s2248_s1 + $0x308] sm:$0xff] }
  0x26   :  { %v167_v37 = vld [vmem:[%s2248_s1 + $0x4c0] sm:$0xff]  ;;  %428 = vmatpush.msra.mxu0 %v39_v36 }
  0x27   :  { %v103_v38 = vld [vmem:[%s2248_s1 + $0x2c0] sm:$0xff]  ;;  %468 = vmatpush.msra.mxu2 %v167_v37 }
  0x28   :  { %v231_v39 = vld [vmem:[%s2248_s1 + $0x6c0] sm:$0xff]  ;;  %448 = vmatpush.msra.mxu1 %v103_v38  ;;  %v40_v38 = vld [vmem:[%s2248_s1 + $0xc8] sm:$0xff] }
  0x29   :  { %v35_v40 = vld [vmem:[%s2248_s1 + $0xa0] sm:$0xff]  ;;  %488 = vmatpush.msra.mxu3 %v231_v39  ;;  %v108_v39 = vld [vmem:[%s2248_s1 + $0x2e8] sm:$0xff] }
  0x2a   :  { %v163_v41 = vld [vmem:[%s2248_s1 + $0x4a0] sm:$0xff]  ;;  %429 = vmatpush.msra.mxu0 %v35_v40 }
  0x2b   :  { %v99_v42 = vld [vmem:[%s2248_s1 + $0x2a0] sm:$0xff]  ;;  %469 = vmatpush.msra.mxu2 %v163_v41 }
  0x2c   :  { %v227_v43 = vld [vmem:[%s2248_s1 + $0x6a0] sm:$0xff]  ;;  %449 = vmatpush.msra.mxu1 %v99_v42  ;;  %v14_v42 = vld [vmem:[%s2247_s0 + $0x10] sm:$0xff] }
  0x2d   :  { %v31_v44 = vld [vmem:[%s2248_s1 + $0x80] sm:$0xff]  ;;  %489 = vmatpush.msra.mxu3 %v227_v43  ;;  %v36_v43 = vld [vmem:[%s2248_s1 + $0xa8] sm:$0xff]  ;;  %406 = vst [vmem:[#allocation1 + $0x20] ss:$2 sm:$0xff] %v14_v42 }
  0x2e   :  { %v159_v45 = vld [vmem:[%s2248_s1 + $0x480] sm:$0xff]  ;;  %430 = vmatpush.msra.mxu0 %v31_v44  ;;  %v104_v44 = vld [vmem:[%s2248_s1 + $0x2c8] sm:$0xff] }
  0x2f   :  { %v95_v46 = vld [vmem:[%s2248_s1 + $0x280] sm:$0xff]  ;;  %470 = vmatpush.msra.mxu2 %v159_v45 }
  0x30   :  { %v223_v47 = vld [vmem:[%s2248_s1 + $0x680] sm:$0xff]  ;;  %450 = vmatpush.msra.mxu1 %v95_v46 }
  0x31   :  { %v27_v48 = vld [vmem:[%s2248_s1 + $0x60] sm:$0xff]  ;;  %490 = vmatpush.msra.mxu3 %v223_v47  ;;  %v32_v47 = vld [vmem:[%s2248_s1 + $0x88] sm:$0xff] }
  0x32   :  { %v155_v49 = vld [vmem:[%s2248_s1 + $0x460] sm:$0xff]  ;;  %431 = vmatpush.msra.mxu0 %v27_v48  ;;  %v100_v48 = vld [vmem:[%s2248_s1 + $0x2a8] sm:$0xff] }
  0x33   :  { %v91_v50 = vld [vmem:[%s2248_s1 + $0x260] sm:$0xff]  ;;  %471 = vmatpush.msra.mxu2 %v155_v49 }
  0x34   :  { %v219_v51 = vld [vmem:[%s2248_s1 + $0x660] sm:$0xff]  ;;  %451 = vmatpush.msra.mxu1 %v91_v50 }
  0x35   :  { %v23_v52 = vld [vmem:[%s2248_s1 + $0x40] sm:$0xff]  ;;  %491 = vmatpush.msra.mxu3 %v219_v51  ;;  %v28_v51 = vld [vmem:[%s2248_s1 + $0x68] sm:$0xff] }
  0x36   :  { %v151_v53 = vld [vmem:[%s2248_s1 + $0x440] sm:$0xff]  ;;  %432 = vmatpush.msra.mxu0 %v23_v52  ;;  %v96_v52 = vld [vmem:[%s2248_s1 + $0x288] sm:$0xff] }
  0x37   :  { %v87_v54 = vld [vmem:[%s2248_s1 + $0x240] sm:$0xff]  ;;  %472 = vmatpush.msra.mxu2 %v151_v53 }
  0x38   :  { %v215_v55 = vld [vmem:[%s2248_s1 + $0x640] sm:$0xff]  ;;  %452 = vmatpush.msra.mxu1 %v87_v54 }
  0x39   :  { %v19_v56 = vld [vmem:[%s2248_s1 + $0x20] sm:$0xff]  ;;  %492 = vmatpush.msra.mxu3 %v215_v55  ;;  %v24_v55 = vld [vmem:[%s2248_s1 + $0x48] sm:$0xff] }
  0x3a   :  { %v147_v57 = vld [vmem:[%s2248_s1 + $0x420] sm:$0xff]  ;;  %433 = vmatpush.msra.mxu0 %v19_v56  ;;  %v92_v56 = vld [vmem:[%s2248_s1 + $0x268] sm:$0xff] }
  0x3b   :  { %v83_v58 = vld [vmem:[%s2248_s1 + $0x220] sm:$0xff]  ;;  %473 = vmatpush.msra.mxu2 %v147_v57 }
  0x3c   :  { %v211_v59 = vld [vmem:[%s2248_s1 + $0x620] sm:$0xff]  ;;  %453 = vmatpush.msra.mxu1 %v83_v58 }
  0x3d   :  { %v15_v60 = vld [vmem:[%s2248_s1] sm:$0xff]  ;;  %493 = vmatpush.msra.mxu3 %v211_v59  ;;  %v20_v59 = vld [vmem:[%s2248_s1 + $0x28] sm:$0xff] }
  0x3e   :  { %v143_v61 = vld [vmem:[%s2248_s1 + $0x400] sm:$0xff]  ;;  %434 = vmatpush.msra.mxu0 %v15_v60  ;;  %v88_v60 = vld [vmem:[%s2248_s1 + $0x248] sm:$0xff] }
  0x3f   :  { %v331_v62 = vld [vmem:[%s2248_s1 + $0x9e0] sm:$0xff]  ;;  %474 = vmatpush.msra.mxu2 %v143_v61  ;;  %v1425_v61 = vld.sshfl [vmem:[#allocation1 + $0x10] sm:$0xff pattern:$0x75316420] }
  0x40   :  { %v79_v0 = vld [vmem:[%s2248_s1 + $0x200] sm:$0xff]  ;;  %499 = vmatpush.msrb.mxu0 %v331_v62  ;;  %475 = vmatmul.f32.vlgmr.msra.gmra.mxu2 %v1425_v61 }
  0x41   :  { %v207_v1 = vld [vmem:[%s2248_s1 + $0x600] sm:$0xff]  ;;  %539 = vmatpush.msrb.mxu2 %v76_v63  ;;  %454 = vmatpush.msra.mxu1 %v79_v0  ;;  %v16_v0 = vld [vmem:[%s2248_s1 + $0x8] sm:$0xff] }
  0x42   :  { %v327_v2 = vld [vmem:[%s2248_s1 + $0x9c0] sm:$0xff]  ;;  %494 = vmatpush.msra.mxu3 %v207_v1  ;;  %v84_v1 = vld [vmem:[%s2248_s1 + $0x228] sm:$0xff] }
  0x43   :  { %v395_v3 = vld [vmem:[%s2248_s1 + $0xbe0] sm:$0xff]  ;;  %500 = vmatpush.msrb.mxu0 %v327_v2  ;;  %540 = vmatpush.msrb.mxu2 %v72_v4  ;;  %v204_v4 = vld [vmem:[%s2248_s1 + $0x5e8] sm:$0xff] }
  0x44   :  { %v323_v6 = vld [vmem:[%s2248_s1 + $0x9a0] sm:$0xff]  ;;  %519 = vmatpush.msrb.mxu1 %v395_v3  ;;  %559 = vmatpush.msrb.mxu3 %v140_v5  ;;  %v1442_v3 = vld.sshfl [vmem:[#allocation1 + $0x18] sm:$0xff pattern:$0x75316420]  ;;  %v332_v5 = vld [vmem:[%s2248_s1 + $0x9e8] sm:$0xff] }
  0x45   :  { %v391_v7 = vld [vmem:[%s2248_s1 + $0xbc0] sm:$0xff]  ;;  %501 = vmatpush.msrb.mxu0 %v323_v6  ;;  %541 = vmatpush.msrb.mxu2 %v68_v8 }
  0x46   :  { %v319_v10 = vld [vmem:[%s2248_s1 + $0x980] sm:$0xff]  ;;  %520 = vmatpush.msrb.mxu1 %v391_v7  ;;  %560 = vmatpush.msrb.mxu3 %v136_v9  ;;  %v80_v7 = vld [vmem:[%s2248_s1 + $0x208] sm:$0xff] }
  0x47   :  { %v387_v11 = vld [vmem:[%s2248_s1 + $0xba0] sm:$0xff]  ;;  %502 = vmatpush.msrb.mxu0 %v319_v10  ;;  %542 = vmatpush.msrb.mxu2 %v64_v12  ;;  %v200_v9 = vld [vmem:[%s2248_s1 + $0x5c8] sm:$0xff] }
  0x48   :  { %v315_v14 = vld [vmem:[%s2248_s1 + $0x960] sm:$0xff]  ;;  %521 = vmatpush.msrb.mxu1 %v387_v11  ;;  %561 = vmatpush.msrb.mxu3 %v132_v13  ;;  %v268_v10 = vld [vmem:[%s2248_s1 + $0x7e8] sm:$0xff] }
  0x49   :  { %v383_v15 = vld [vmem:[%s2248_s1 + $0xb80] sm:$0xff]  ;;  %503 = vmatpush.msrb.mxu0 %v315_v14  ;;  %543 = vmatpush.msrb.mxu2 %v60_v16  ;;  %v328_v11 = vld [vmem:[%s2248_s1 + $0x9c8] sm:$0xff] }
  0x4a   :  { %v311_v18 = vld [vmem:[%s2248_s1 + $0x940] sm:$0xff]  ;;  %522 = vmatpush.msrb.mxu1 %v383_v15  ;;  %562 = vmatpush.msrb.mxu3 %v128_v17  ;;  %v396_v12 = vld [vmem:[%s2248_s1 + $0xbe8] sm:$0xff] }
  0x4b   :  { %v379_v19 = vld [vmem:[%s2248_s1 + $0xb60] sm:$0xff]  ;;  %504 = vmatpush.msrb.mxu0 %v311_v18  ;;  %544 = vmatpush.msrb.mxu2 %v56_v20  ;;  %v196_v13 = vld [vmem:[%s2248_s1 + $0x5a8] sm:$0xff] }
  0x4c   :  { %v307_v23 = vld [vmem:[%s2248_s1 + $0x920] sm:$0xff]  ;;  %523 = vmatpush.msrb.mxu1 %v379_v19  ;;  %563 = vmatpush.msrb.mxu3 %v124_v21  ;;  %v264_v14 = vld [vmem:[%s2248_s1 + $0x7c8] sm:$0xff] }
  0x4d   :  { %v375_v24 = vld [vmem:[%s2248_s1 + $0xb40] sm:$0xff]  ;;  %505 = vmatpush.msrb.mxu0 %v307_v23  ;;  %545 = vmatpush.msrb.mxu2 %v52_v25  ;;  %v324_v15 = vld [vmem:[%s2248_s1 + $0x9a8] sm:$0xff] }
  0x4e   :  { %v12_v27 = vld [vmem:[%s2247_s0] sm:$0xff]  ;;  %524 = vmatpush.msrb.mxu1 %v375_v24  ;;  %564 = vmatpush.msrb.mxu3 %v120_v26  ;;  %v392_v16 = vld [vmem:[%s2248_s1 + $0xbc8] sm:$0xff] }
  0x4f   :  { %v303_v28 = vld [vmem:[%s2248_s1 + $0x900] sm:$0xff]  ;;  %402 = vst [vmem:[#allocation1] ss:$2 sm:$0xff] %v12_v27  ;;  %546 = vmatpush.msrb.mxu2 %v48_v30  ;;  %495 = vmatmul.f32.vlgmr.msra.gmra.mxu3 %v1442_v3 }
  0x50   :  { %v371_v29 = vld [vmem:[%s2248_s1 + $0xb20] sm:$0xff]  ;;  %506 = vmatpush.msrb.mxu0 %v303_v28  ;;  %565 = vmatpush.msrb.mxu3 %v116_v31 }
  0x51   :  { %v299_v32 = vld [vmem:[%s2248_s1 + $0x8e0] sm:$0xff]  ;;  %525 = vmatpush.msrb.mxu1 %v371_v29  ;;  %547 = vmatpush.msrb.mxu2 %v44_v34 }
  0x52   :  { %v367_v33 = vld [vmem:[%s2248_s1 + $0xb00] sm:$0xff]  ;;  %507 = vmatpush.msrb.mxu0 %v299_v32  ;;  %566 = vmatpush.msrb.mxu3 %v112_v35 }
  0x53   :  { %v295_v36 = vld [vmem:[%s2248_s1 + $0x8c0] sm:$0xff]  ;;  %526 = vmatpush.msrb.mxu1 %v367_v33  ;;  %548 = vmatpush.msrb.mxu2 %v40_v38 }
  0x54   :  { %v363_v37 = vld [vmem:[%s2248_s1 + $0xae0] sm:$0xff]  ;;  %508 = vmatpush.msrb.mxu0 %v295_v36  ;;  %567 = vmatpush.msrb.mxu3 %v108_v39 }
  0x55   :  { %v291_v40 = vld [vmem:[%s2248_s1 + $0x8a0] sm:$0xff]  ;;  %527 = vmatpush.msrb.mxu1 %v363_v37  ;;  %549 = vmatpush.msrb.mxu2 %v36_v43 }
  0x56   :  { %v359_v41 = vld [vmem:[%s2248_s1 + $0xac0] sm:$0xff]  ;;  %509 = vmatpush.msrb.mxu0 %v291_v40  ;;  %568 = vmatpush.msrb.mxu3 %v104_v44  ;;  %v1457_v8 = vld.sshfl [vmem:[#allocation1 + $0x8] sm:$0xff pattern:$0x75316420] }
  0x57   :  { %v287_v45 = vld [vmem:[%s2248_s1 + $0x880] sm:$0xff]  ;;  %528 = vmatpush.msrb.mxu1 %v359_v41  ;;  %550 = vmatpush.msrb.mxu2 %v32_v47 }
  0x58   :  { %v355_v46 = vld [vmem:[%s2248_s1 + $0xaa0] sm:$0xff]  ;;  %510 = vmatpush.msrb.mxu0 %v287_v45  ;;  %569 = vmatpush.msrb.mxu3 %v100_v48 }
  0x59   :  { %v283_v49 = vld [vmem:[%s2248_s1 + $0x860] sm:$0xff]  ;;  %529 = vmatpush.msrb.mxu1 %v355_v46  ;;  %551 = vmatpush.msrb.mxu2 %v28_v51 }
  0x5a   :  { %v351_v50 = vld [vmem:[%s2248_s1 + $0xa80] sm:$0xff]  ;;  %511 = vmatpush.msrb.mxu0 %v283_v49  ;;  %570 = vmatpush.msrb.mxu3 %v96_v52 }
  0x5b   :  { %v279_v53 = vld [vmem:[%s2248_s1 + $0x840] sm:$0xff]  ;;  %530 = vmatpush.msrb.mxu1 %v351_v50  ;;  %552 = vmatpush.msrb.mxu2 %v24_v55 }
  0x5c   :  { %v347_v54 = vld [vmem:[%s2248_s1 + $0xa60] sm:$0xff]  ;;  %512 = vmatpush.msrb.mxu0 %v279_v53  ;;  %571 = vmatpush.msrb.mxu3 %v92_v56 }
  0x5d   :  { %v275_v57 = vld [vmem:[%s2248_s1 + $0x820] sm:$0xff]  ;;  %531 = vmatpush.msrb.mxu1 %v347_v54  ;;  %553 = vmatpush.msrb.mxu2 %v20_v59 }
  0x5e   :  { %v343_v58 = vld [vmem:[%s2248_s1 + $0xa40] sm:$0xff]  ;;  %513 = vmatpush.msrb.mxu0 %v275_v57  ;;  %572 = vmatpush.msrb.mxu3 %v88_v60 }
  0x5f   :  { %v271_v62 = vld [vmem:[%s2248_s1 + $0x800] sm:$0xff]  ;;  %532 = vmatpush.msrb.mxu1 %v343_v58  ;;  %554 = vmatpush.msrb.mxu2 %v16_v0 }
  0x60   :  { %v339_v63 = vld [vmem:[%s2248_s1 + $0xa20] sm:$0xff]  ;;  %514 = vmatpush.msrb.mxu0 %v271_v62  ;;  %573 = vmatpush.msrb.mxu3 %v84_v1 }
  0x61   :  { %v1439_v2 = vld.sshfl [vmem:[#allocation1] sm:$0xff pattern:$0x75316420]  ;;  %533 = vmatpush.msrb.mxu1 %v339_v63  ;;  %619 = vmatpush.msra.mxu2 %v332_v5 }
  0x62   :  { %v335_v6 = vld [vmem:[%s2248_s1 + $0xa00] sm:$0xff]  ;;  %435 = vmatmul.f32.vlgmr.msra.gmra.mxu0 %v1439_v2  ;;  %574 = vmatpush.msrb.mxu3 %v80_v7 }
  0x63   :  { %579 = vmatpush.msra.mxu0 %v204_v4  ;;  %534 = vmatpush.msrb.mxu1 %v335_v6 }
  0x64   :  { %455 = vmatmul.f32.vlgmr.msra.gmra.mxu1 %v1457_v8 }
  0x65   :  { %580 = vmatpush.msra.mxu0 %v200_v9  ;;  %599 = vmatpush.msra.mxu1 %v268_v10 }
  0x66   :  { %7 = vsyncpa [#allocation3], 0  ;;  %620 = vmatpush.msra.mxu2 %v328_v11  ;;  %639 = vmatpush.msra.mxu3 %v396_v12  ;;  %v192_v17 = vld [vmem:[%s2248_s1 + $0x588] sm:$0xff]  ;;  %v1497_v21 = vld.sshfl [vmem:[#allocation1 + $0x20] sm:$0xff pattern:$0x75316420] }
  0x67   :  { %v260_v18 = vld [vmem:[%s2248_s1 + $0x7a8] sm:$0xff]  ;;  %581 = vmatpush.msra.mxu0 %v196_v13  ;;  %600 = vmatpush.msra.mxu1 %v264_v14  ;;  %v77_v11 = vld [vmem:[%s2248_s1 + $0x1f0] sm:$0xff]  ;;  %vm903_vm0 = vcmask 1043456   ;;  %vm944_vm4 = vcmask 1041408   ;;  %vm955_vm5 = vcmask 1024   ;;  %s985_s11 = sshll.u32 %s2249_s2, 4  ;;  %s986_s11 = int_to_ptr.hbm [resolvable:$true] %s985_s11 }
  0x68   :  { %v320_v19 = vld [vmem:[%s2248_s1 + $0x988] sm:$0xff]  ;;  %621 = vmatpush.msra.mxu2 %v324_v15  ;;  %640 = vmatpush.msra.mxu3 %v392_v16  ;;  %v205_v12 = vld [vmem:[%s2248_s1 + $0x5f0] sm:$0xff]  ;;  %vm976_vm7 = vcmask 0  }
  0x69   :  { %v388_v20 = vld [vmem:[%s2248_s1 + $0xba8] sm:$0xff]  ;;  %582 = vmatpush.msra.mxu0 %v192_v17  ;;  %601 = vmatpush.msra.mxu1 %v260_v18  ;;  %v73_v15 = vld [vmem:[%s2248_s1 + $0x1d0] sm:$0xff] }
  0x6a   :  { %v256_v22 = vld [vmem:[%s2248_s1 + $0x788] sm:$0xff]  ;;  %622 = vmatpush.msra.mxu2 %v320_v19  ;;  %641 = vmatpush.msra.mxu3 %v388_v20  ;;  %v141_v16 = vld [vmem:[%s2248_s1 + $0x3f0] sm:$0xff] }
  0x6b   :  { %v188_v23 = vld [vmem:[%s2248_s1 + $0x568] sm:$0xff]  ;;  %515 = vmatmul.f32.vlgmr.msrb.gmra.mxu0 %v1497_v21  ;;  %602 = vmatpush.msra.mxu1 %v256_v22  ;;  %v201_v17 = vld [vmem:[%s2248_s1 + $0x5d0] sm:$0xff] }
  0x6c   :  { %v316_v24 = vld [vmem:[%s2248_s1 + $0x968] sm:$0xff]  ;;  %583 = vmatpush.msra.mxu0 %v188_v23  ;;  %555 = vmatmul.f32.vlgmr.msrb.gmra.mxu2 %v1439_v2  ;;  %v269_v18 = vld [vmem:[%s2248_s1 + $0x7f0] sm:$0xff] }
  0x6d   :  { %v384_v25 = vld [vmem:[%s2248_s1 + $0xb88] sm:$0xff]  ;;  %623 = vmatpush.msra.mxu2 %v316_v24  ;;  %575 = vmatmul.f32.vlgmr.msrb.gmra.mxu3 %v1457_v8  ;;  %v69_v19 = vld [vmem:[%s2248_s1 + $0x1b0] sm:$0xff] }
  0x6e   :  { %v1511_v26 = vld.sshfl [vmem:[#allocation1 + $0x28] sm:$0xff pattern:$0x75316420]  ;;  %642 = vmatpush.msra.mxu3 %v384_v25  ;;  %v137_v20 = vld [vmem:[%s2248_s1 + $0x3d0] sm:$0xff] }
  0x6f   :  { %v184_v27 = vld [vmem:[%s2248_s1 + $0x548] sm:$0xff]  ;;  %535 = vmatmul.f32.vlgmr.msrb.gmra.mxu1 %v1511_v26  ;;  %v197_v22 = vld [vmem:[%s2248_s1 + $0x5b0] sm:$0xff] }
  0x70   :  { %v252_v28 = vld [vmem:[%s2248_s1 + $0x768] sm:$0xff]  ;;  %584 = vmatpush.msra.mxu0 %v184_v27  ;;  %v265_v23 = vld [vmem:[%s2248_s1 + $0x7d0] sm:$0xff] }
  0x71   :  { %v312_v29 = vld [vmem:[%s2248_s1 + $0x948] sm:$0xff]  ;;  %603 = vmatpush.msra.mxu1 %v252_v28  ;;  %v65_v24 = vld [vmem:[%s2248_s1 + $0x190] sm:$0xff] }
  0x72   :  { %v380_v30 = vld [vmem:[%s2248_s1 + $0xb68] sm:$0xff]  ;;  %624 = vmatpush.msra.mxu2 %v312_v29  ;;  %v133_v25 = vld [vmem:[%s2248_s1 + $0x3b0] sm:$0xff] }
  0x73   :  { %v180_v31 = vld [vmem:[%s2248_s1 + $0x528] sm:$0xff]  ;;  %643 = vmatpush.msra.mxu3 %v380_v30  ;;  %v193_v27 = vld [vmem:[%s2248_s1 + $0x590] sm:$0xff] }
  0x74   :  { %v248_v32 = vld [vmem:[%s2248_s1 + $0x748] sm:$0xff]  ;;  %585 = vmatpush.msra.mxu0 %v180_v31  ;;  %v261_v28 = vld [vmem:[%s2248_s1 + $0x7b0] sm:$0xff] }
  0x75   :  { %v308_v33 = vld [vmem:[%s2248_s1 + $0x928] sm:$0xff]  ;;  %604 = vmatpush.msra.mxu1 %v248_v32  ;;  %v61_v29 = vld [vmem:[%s2248_s1 + $0x170] sm:$0xff] }
  0x76   :  { %v376_v34 = vld [vmem:[%s2248_s1 + $0xb48] sm:$0xff]  ;;  %625 = vmatpush.msra.mxu2 %v308_v33  ;;  %v129_v30 = vld [vmem:[%s2248_s1 + $0x390] sm:$0xff] }
  0x77   :  { %v176_v35 = vld [vmem:[%s2248_s1 + $0x508] sm:$0xff]  ;;  %644 = vmatpush.msra.mxu3 %v376_v34  ;;  %v189_v31 = vld [vmem:[%s2248_s1 + $0x570] sm:$0xff] }
  0x78   :  { %v244_v36 = vld [vmem:[%s2248_s1 + $0x728] sm:$0xff]  ;;  %586 = vmatpush.msra.mxu0 %v176_v35  ;;  %v257_v32 = vld [vmem:[%s2248_s1 + $0x790] sm:$0xff] }
  0x79   :  { %v304_v37 = vld [vmem:[%s2248_s1 + $0x908] sm:$0xff]  ;;  %605 = vmatpush.msra.mxu1 %v244_v36  ;;  %v57_v33 = vld [vmem:[%s2248_s1 + $0x150] sm:$0xff] }
  0x7a   :  { %v372_v38 = vld [vmem:[%s2248_s1 + $0xb28] sm:$0xff]  ;;  %626 = vmatpush.msra.mxu2 %v304_v37  ;;  %v125_v34 = vld [vmem:[%s2248_s1 + $0x370] sm:$0xff] }
  0x7b   :  { %v172_v39 = vld [vmem:[%s2248_s1 + $0x4e8] sm:$0xff]  ;;  %645 = vmatpush.msra.mxu3 %v372_v38  ;;  %v185_v35 = vld [vmem:[%s2248_s1 + $0x550] sm:$0xff] }
  0x7c   :  { %v240_v40 = vld [vmem:[%s2248_s1 + $0x708] sm:$0xff]  ;;  %587 = vmatpush.msra.mxu0 %v172_v39  ;;  %v253_v36 = vld [vmem:[%s2248_s1 + $0x770] sm:$0xff] }
  0x7d   :  { %v300_v41 = vld [vmem:[%s2248_s1 + $0x8e8] sm:$0xff]  ;;  %606 = vmatpush.msra.mxu1 %v240_v40  ;;  %v53_v37 = vld [vmem:[%s2248_s1 + $0x130] sm:$0xff] }
  0x7e   :  { %v368_v42 = vld [vmem:[%s2248_s1 + $0xb08] sm:$0xff]  ;;  %627 = vmatpush.msra.mxu2 %v300_v41  ;;  %v121_v38 = vld [vmem:[%s2248_s1 + $0x350] sm:$0xff] }
  0x7f   :  { %v168_v43 = vld [vmem:[%s2248_s1 + $0x4c8] sm:$0xff]  ;;  %646 = vmatpush.msra.mxu3 %v368_v42  ;;  %v181_v39 = vld [vmem:[%s2248_s1 + $0x530] sm:$0xff] }
  0x80   :  { %v236_v44 = vld [vmem:[%s2248_s1 + $0x6e8] sm:$0xff]  ;;  %588 = vmatpush.msra.mxu0 %v168_v43  ;;  %v249_v40 = vld [vmem:[%s2248_s1 + $0x750] sm:$0xff] }
  0x81   :  { %v296_v45 = vld [vmem:[%s2248_s1 + $0x8c8] sm:$0xff]  ;;  %607 = vmatpush.msra.mxu1 %v236_v44  ;;  %v49_v41 = vld [vmem:[%s2248_s1 + $0x110] sm:$0xff] }
  0x82   :  { %v364_v46 = vld [vmem:[%s2248_s1 + $0xae8] sm:$0xff]  ;;  %628 = vmatpush.msra.mxu2 %v296_v45  ;;  %v117_v42 = vld [vmem:[%s2248_s1 + $0x330] sm:$0xff] }
  0x83   :  { %v164_v47 = vld [vmem:[%s2248_s1 + $0x4a8] sm:$0xff]  ;;  %647 = vmatpush.msra.mxu3 %v364_v46  ;;  %v177_v43 = vld [vmem:[%s2248_s1 + $0x510] sm:$0xff] }
  0x84   :  { %v232_v48 = vld [vmem:[%s2248_s1 + $0x6c8] sm:$0xff]  ;;  %589 = vmatpush.msra.mxu0 %v164_v47  ;;  %v245_v44 = vld [vmem:[%s2248_s1 + $0x730] sm:$0xff] }
  0x85   :  { %v292_v49 = vld [vmem:[%s2248_s1 + $0x8a8] sm:$0xff]  ;;  %608 = vmatpush.msra.mxu1 %v232_v48  ;;  %v45_v45 = vld [vmem:[%s2248_s1 + $0xf0] sm:$0xff] }
  0x86   :  { %v360_v50 = vld [vmem:[%s2248_s1 + $0xac8] sm:$0xff]  ;;  %629 = vmatpush.msra.mxu2 %v292_v49  ;;  %v113_v46 = vld [vmem:[%s2248_s1 + $0x310] sm:$0xff] }
  0x87   :  { %v160_v51 = vld [vmem:[%s2248_s1 + $0x488] sm:$0xff]  ;;  %648 = vmatpush.msra.mxu3 %v360_v50  ;;  %v173_v47 = vld [vmem:[%s2248_s1 + $0x4f0] sm:$0xff] }
  0x88   :  { %v228_v52 = vld [vmem:[%s2248_s1 + $0x6a8] sm:$0xff]  ;;  %590 = vmatpush.msra.mxu0 %v160_v51  ;;  %v241_v48 = vld [vmem:[%s2248_s1 + $0x710] sm:$0xff] }
  0x89   :  { %v288_v53 = vld [vmem:[%s2248_s1 + $0x888] sm:$0xff]  ;;  %609 = vmatpush.msra.mxu1 %v228_v52  ;;  %v41_v49 = vld [vmem:[%s2248_s1 + $0xd0] sm:$0xff] }
  0x8a   :  { %v356_v54 = vld [vmem:[%s2248_s1 + $0xaa8] sm:$0xff]  ;;  %630 = vmatpush.msra.mxu2 %v288_v53  ;;  %v109_v50 = vld [vmem:[%s2248_s1 + $0x2f0] sm:$0xff] }
  0x8b   :  { %v156_v55 = vld [vmem:[%s2248_s1 + $0x468] sm:$0xff]  ;;  %649 = vmatpush.msra.mxu3 %v356_v54  ;;  %v169_v51 = vld [vmem:[%s2248_s1 + $0x4d0] sm:$0xff] }
  0x8c   :  { %v224_v56 = vld [vmem:[%s2248_s1 + $0x688] sm:$0xff]  ;;  %591 = vmatpush.msra.mxu0 %v156_v55  ;;  %v237_v52 = vld [vmem:[%s2248_s1 + $0x6f0] sm:$0xff] }
  0x8d   :  { %v284_v57 = vld [vmem:[%s2248_s1 + $0x868] sm:$0xff]  ;;  %610 = vmatpush.msra.mxu1 %v224_v56  ;;  %v37_v53 = vld [vmem:[%s2248_s1 + $0xb0] sm:$0xff] }
  0x8e   :  { %v352_v58 = vld [vmem:[%s2248_s1 + $0xa88] sm:$0xff]  ;;  %631 = vmatpush.msra.mxu2 %v284_v57  ;;  %v105_v54 = vld [vmem:[%s2248_s1 + $0x2d0] sm:$0xff] }
  0x8f   :  { %v152_v59 = vld [vmem:[%s2248_s1 + $0x448] sm:$0xff]  ;;  %650 = vmatpush.msra.mxu3 %v352_v58  ;;  %v165_v55 = vld [vmem:[%s2248_s1 + $0x4b0] sm:$0xff] }
  0x90   :  { %v220_v60 = vld [vmem:[%s2248_s1 + $0x668] sm:$0xff]  ;;  %592 = vmatpush.msra.mxu0 %v152_v59  ;;  %v233_v56 = vld [vmem:[%s2248_s1 + $0x6d0] sm:$0xff] }
  0x91   :  { %v280_v62 = vld [vmem:[%s2248_s1 + $0x848] sm:$0xff]  ;;  %611 = vmatpush.msra.mxu1 %v220_v60  ;;  %v33_v57 = vld [vmem:[%s2248_s1 + $0x90] sm:$0xff] }
  0x92   :  { %v348_v63 = vld [vmem:[%s2248_s1 + $0xa68] sm:$0xff]  ;;  %632 = vmatpush.msra.mxu2 %v280_v62  ;;  %v101_v58 = vld [vmem:[%s2248_s1 + $0x2b0] sm:$0xff] }
  0x93   :  { %v148_v0 = vld [vmem:[%s2248_s1 + $0x428] sm:$0xff]  ;;  %651 = vmatpush.msra.mxu3 %v348_v63  ;;  %v161_v59 = vld [vmem:[%s2248_s1 + $0x490] sm:$0xff] }
  0x94   :  { %v216_v1 = vld [vmem:[%s2248_s1 + $0x648] sm:$0xff]  ;;  %593 = vmatpush.msra.mxu0 %v148_v0  ;;  %v229_v60 = vld [vmem:[%s2248_s1 + $0x6b0] sm:$0xff] }
  0x95   :  { %v276_v4 = vld [vmem:[%s2248_s1 + $0x828] sm:$0xff]  ;;  %612 = vmatpush.msra.mxu1 %v216_v1  ;;  %v29_v62 = vld [vmem:[%s2248_s1 + $0x70] sm:$0xff] }
  0x96   :  { %v344_v5 = vld [vmem:[%s2248_s1 + $0xa48] sm:$0xff]  ;;  %633 = vmatpush.msra.mxu2 %v276_v4  ;;  %v97_v63 = vld [vmem:[%s2248_s1 + $0x290] sm:$0xff] }
  0x97   :  { %v144_v6 = vld [vmem:[%s2248_s1 + $0x408] sm:$0xff]  ;;  %652 = vmatpush.msra.mxu3 %v344_v5  ;;  %v157_v0 = vld [vmem:[%s2248_s1 + $0x470] sm:$0xff] }
  0x98   :  { %v212_v7 = vld [vmem:[%s2248_s1 + $0x628] sm:$0xff]  ;;  %594 = vmatpush.msra.mxu0 %v144_v6  ;;  %v225_v1 = vld [vmem:[%s2248_s1 + $0x690] sm:$0xff] }
  0x99   :  { %v272_v9 = vld [vmem:[%s2248_s1 + $0x808] sm:$0xff]  ;;  %613 = vmatpush.msra.mxu1 %v212_v7  ;;  %595 = vmatmul.f32.vlgmr.msra.gmra.mxu0 %v1425_v61  ;;  %v25_v4 = vld [vmem:[%s2248_s1 + $0x50] sm:$0xff] }
  0x9a   :  { %v340_v10 = vld [vmem:[%s2248_s1 + $0xa28] sm:$0xff]  ;;  %634 = vmatpush.msra.mxu2 %v272_v9  ;;  %659 = vmatpush.msrb.mxu0 %v77_v11  ;;  %v93_v5 = vld [vmem:[%s2248_s1 + $0x270] sm:$0xff] }
  0x9b   :  { %v208_v13 = vld [vmem:[%s2248_s1 + $0x608] sm:$0xff]  ;;  %653 = vmatpush.msra.mxu3 %v340_v10  ;;  %635 = vmatmul.f32.vlgmr.msra.gmra.mxu2 %v1497_v21  ;;  %v153_v6 = vld [vmem:[%s2248_s1 + $0x450] sm:$0xff] }
  0x9c   :  { %v336_v14 = vld [vmem:[%s2248_s1 + $0xa08] sm:$0xff]  ;;  %699 = vmatpush.msrb.mxu2 %v205_v12  ;;  %614 = vmatpush.msra.mxu1 %v208_v13  ;;  %v221_v7 = vld [vmem:[%s2248_s1 + $0x670] sm:$0xff] }
  0x9d   :  { %654 = vmatpush.msra.mxu3 %v336_v14  ;;  %660 = vmatpush.msrb.mxu0 %v73_v15  ;;  %v21_v9 = vld [vmem:[%s2248_s1 + $0x30] sm:$0xff] }
  0x9e   :  { %655 = vmatmul.f32.vlgmr.msra.gmra.mxu3 %v1511_v26  ;;  %679 = vmatpush.msrb.mxu1 %v141_v16  ;;  %v89_v10 = vld [vmem:[%s2248_s1 + $0x250] sm:$0xff] }
  0x9f   :  { %700 = vmatpush.msrb.mxu2 %v201_v17  ;;  %719 = vmatpush.msrb.mxu3 %v269_v18  ;;  %v149_v11 = vld [vmem:[%s2248_s1 + $0x430] sm:$0xff]  ;;  %v78_v18 = vld [vmem:[%s2248_s1 + $0x1f8] sm:$0xff] }
  0xa0   :  { %615 = vmatmul.f32.vlgmr.msra.gmra.mxu1 %v1442_v3  ;;  %661 = vmatpush.msrb.mxu0 %v69_v19  ;;  %v217_v12 = vld [vmem:[%s2248_s1 + $0x650] sm:$0xff] }
  0xa1   :  { %680 = vmatpush.msrb.mxu1 %v137_v20  ;;  %701 = vmatpush.msrb.mxu2 %v197_v22  ;;  %v17_v13 = vld [vmem:[%s2248_s1 + $0x10] sm:$0xff] }
  0xa2   :  { %720 = vmatpush.msrb.mxu3 %v265_v23  ;;  %662 = vmatpush.msrb.mxu0 %v65_v24  ;;  %v85_v14 = vld [vmem:[%s2248_s1 + $0x230] sm:$0xff]  ;;  %v74_v24 = vld [vmem:[%s2248_s1 + $0x1d8] sm:$0xff] }
  0xa3   :  { %681 = vmatpush.msrb.mxu1 %v133_v25  ;;  %702 = vmatpush.msrb.mxu2 %v193_v27  ;;  %v145_v15 = vld [vmem:[%s2248_s1 + $0x410] sm:$0xff]  ;;  %v142_v25 = vld [vmem:[%s2248_s1 + $0x3f8] sm:$0xff] }
  0xa4   :  { %721 = vmatpush.msrb.mxu3 %v261_v28  ;;  %663 = vmatpush.msrb.mxu0 %v61_v29  ;;  %v213_v16 = vld [vmem:[%s2248_s1 + $0x630] sm:$0xff]  ;;  %v70_v29 = vld [vmem:[%s2248_s1 + $0x1b8] sm:$0xff] }
  0xa5   :  { %682 = vmatpush.msrb.mxu1 %v129_v30  ;;  %703 = vmatpush.msrb.mxu2 %v189_v31  ;;  %v333_v17 = vld [vmem:[%s2248_s1 + $0x9f0] sm:$0xff]  ;;  %v138_v30 = vld [vmem:[%s2248_s1 + $0x3d8] sm:$0xff] }
  0xa6   :  { %722 = vmatpush.msrb.mxu3 %v257_v32  ;;  %664 = vmatpush.msrb.mxu0 %v57_v33  ;;  %v81_v19 = vld [vmem:[%s2248_s1 + $0x210] sm:$0xff]  ;;  %v66_v33 = vld [vmem:[%s2248_s1 + $0x198] sm:$0xff] }
  0xa7   :  { %683 = vmatpush.msrb.mxu1 %v125_v34  ;;  %704 = vmatpush.msrb.mxu2 %v185_v35  ;;  %v209_v20 = vld [vmem:[%s2248_s1 + $0x610] sm:$0xff]  ;;  %v134_v34 = vld [vmem:[%s2248_s1 + $0x3b8] sm:$0xff] }
  0xa8   :  { %723 = vmatpush.msrb.mxu3 %v253_v36  ;;  %665 = vmatpush.msrb.mxu0 %v53_v37  ;;  %v329_v22 = vld [vmem:[%s2248_s1 + $0x9d0] sm:$0xff]  ;;  %v62_v37 = vld [vmem:[%s2248_s1 + $0x178] sm:$0xff] }
  0xa9   :  { %684 = vmatpush.msrb.mxu1 %v121_v38  ;;  %705 = vmatpush.msrb.mxu2 %v181_v39  ;;  %v397_v23 = vld [vmem:[%s2248_s1 + $0xbf0] sm:$0xff]  ;;  %v130_v38 = vld [vmem:[%s2248_s1 + $0x398] sm:$0xff] }
  0xaa   :  { %724 = vmatpush.msrb.mxu3 %v249_v40  ;;  %666 = vmatpush.msrb.mxu0 %v49_v41  ;;  %v325_v27 = vld [vmem:[%s2248_s1 + $0x9b0] sm:$0xff]  ;;  %v58_v41 = vld [vmem:[%s2248_s1 + $0x158] sm:$0xff] }
  0xab   :  { %685 = vmatpush.msrb.mxu1 %v117_v42  ;;  %706 = vmatpush.msrb.mxu2 %v177_v43  ;;  %v393_v28 = vld [vmem:[%s2248_s1 + $0xbd0] sm:$0xff]  ;;  %v126_v42 = vld [vmem:[%s2248_s1 + $0x378] sm:$0xff] }
  0xac   :  { %725 = vmatpush.msrb.mxu3 %v245_v44  ;;  %667 = vmatpush.msrb.mxu0 %v45_v45  ;;  %v321_v31 = vld [vmem:[%s2248_s1 + $0x990] sm:$0xff]  ;;  %v54_v45 = vld [vmem:[%s2248_s1 + $0x138] sm:$0xff] }
  0xad   :  { %686 = vmatpush.msrb.mxu1 %v113_v46  ;;  %707 = vmatpush.msrb.mxu2 %v173_v47  ;;  %v389_v32 = vld [vmem:[%s2248_s1 + $0xbb0] sm:$0xff]  ;;  %v122_v46 = vld [vmem:[%s2248_s1 + $0x358] sm:$0xff] }
  0xae   :  { %726 = vmatpush.msrb.mxu3 %v241_v48  ;;  %668 = vmatpush.msrb.mxu0 %v41_v49  ;;  %v317_v35 = vld [vmem:[%s2248_s1 + $0x970] sm:$0xff]  ;;  %v50_v49 = vld [vmem:[%s2248_s1 + $0x118] sm:$0xff] }
  0xaf   :  { %687 = vmatpush.msrb.mxu1 %v109_v50  ;;  %708 = vmatpush.msrb.mxu2 %v169_v51  ;;  %v385_v36 = vld [vmem:[%s2248_s1 + $0xb90] sm:$0xff]  ;;  %v118_v50 = vld [vmem:[%s2248_s1 + $0x338] sm:$0xff] }
  0xb0   :  { %727 = vmatpush.msrb.mxu3 %v237_v52  ;;  %669 = vmatpush.msrb.mxu0 %v37_v53  ;;  %v313_v39 = vld [vmem:[%s2248_s1 + $0x950] sm:$0xff]  ;;  %v46_v53 = vld [vmem:[%s2248_s1 + $0xf8] sm:$0xff] }
  0xb1   :  { %688 = vmatpush.msrb.mxu1 %v105_v54  ;;  %709 = vmatpush.msrb.mxu2 %v165_v55  ;;  %v381_v40 = vld [vmem:[%s2248_s1 + $0xb70] sm:$0xff]  ;;  %v114_v54 = vld [vmem:[%s2248_s1 + $0x318] sm:$0xff] }
  0xb2   :  { %728 = vmatpush.msrb.mxu3 %v233_v56  ;;  %670 = vmatpush.msrb.mxu0 %v33_v57  ;;  %v309_v43 = vld [vmem:[%s2248_s1 + $0x930] sm:$0xff]  ;;  %v42_v57 = vld [vmem:[%s2248_s1 + $0xd8] sm:$0xff] }
  0xb3   :  { %689 = vmatpush.msrb.mxu1 %v101_v58  ;;  %710 = vmatpush.msrb.mxu2 %v161_v59  ;;  %v377_v44 = vld [vmem:[%s2248_s1 + $0xb50] sm:$0xff]  ;;  %v110_v58 = vld [vmem:[%s2248_s1 + $0x2f8] sm:$0xff] }
  0xb4   :  { %729 = vmatpush.msrb.mxu3 %v229_v60  ;;  %671 = vmatpush.msrb.mxu0 %v29_v62  ;;  %v305_v47 = vld [vmem:[%s2248_s1 + $0x910] sm:$0xff]  ;;  %v38_v62 = vld [vmem:[%s2248_s1 + $0xb8] sm:$0xff] }
  0xb5   :  { %690 = vmatpush.msrb.mxu1 %v97_v63  ;;  %711 = vmatpush.msrb.mxu2 %v157_v0  ;;  %v373_v48 = vld [vmem:[%s2248_s1 + $0xb30] sm:$0xff]  ;;  %v106_v63 = vld [vmem:[%s2248_s1 + $0x2d8] sm:$0xff] }
  0xb6   :  { %730 = vmatpush.msrb.mxu3 %v225_v1  ;;  %672 = vmatpush.msrb.mxu0 %v25_v4  ;;  %v301_v51 = vld [vmem:[%s2248_s1 + $0x8f0] sm:$0xff]  ;;  %v34_v4 = vld [vmem:[%s2248_s1 + $0x98] sm:$0xff] }
  0xb7   :  { %691 = vmatpush.msrb.mxu1 %v93_v5  ;;  %712 = vmatpush.msrb.mxu2 %v153_v6  ;;  %v369_v52 = vld [vmem:[%s2248_s1 + $0xb10] sm:$0xff]  ;;  %v102_v5 = vld [vmem:[%s2248_s1 + $0x2b8] sm:$0xff] }
  0xb8   :  { %731 = vmatpush.msrb.mxu3 %v221_v7  ;;  %673 = vmatpush.msrb.mxu0 %v21_v9  ;;  %v297_v55 = vld [vmem:[%s2248_s1 + $0x8d0] sm:$0xff]  ;;  %v30_v9 = vld [vmem:[%s2248_s1 + $0x78] sm:$0xff] }
  0xb9   :  { %692 = vmatpush.msrb.mxu1 %v89_v10  ;;  %713 = vmatpush.msrb.mxu2 %v149_v11  ;;  %v365_v56 = vld [vmem:[%s2248_s1 + $0xaf0] sm:$0xff] }
  0xba   :  { %732 = vmatpush.msrb.mxu3 %v217_v12  ;;  %674 = vmatpush.msrb.mxu0 %v17_v13  ;;  %v293_v59 = vld [vmem:[%s2248_s1 + $0x8b0] sm:$0xff]  ;;  %v94_v12 = vld [vmem:[%s2248_s1 + $0x278] sm:$0xff] }
  0xbb   :  { %693 = vmatpush.msrb.mxu1 %v85_v14  ;;  %714 = vmatpush.msrb.mxu2 %v145_v15  ;;  %v361_v60 = vld [vmem:[%s2248_s1 + $0xad0] sm:$0xff]  ;;  %v22_v14 = vld [vmem:[%s2248_s1 + $0x38] sm:$0xff] }
  0xbc   :  { %733 = vmatpush.msrb.mxu3 %v213_v16  ;;  %739 = vmatpush.msra.mxu0 %v333_v17  ;;  %v289_v0 = vld [vmem:[%s2248_s1 + $0x890] sm:$0xff]  ;;  %v90_v15 = vld [vmem:[%s2248_s1 + $0x258] sm:$0xff] }
  0xbd   :  { %779 = vmatpush.msra.mxu2 %v78_v18  ;;  %694 = vmatpush.msrb.mxu1 %v81_v19  ;;  %v357_v1 = vld [vmem:[%s2248_s1 + $0xab0] sm:$0xff]  ;;  %v18_v18 = vld [vmem:[%s2248_s1 + $0x18] sm:$0xff] }
  0xbe   :  { %734 = vmatpush.msrb.mxu3 %v209_v20  ;;  %740 = vmatpush.msra.mxu0 %v329_v22  ;;  %v285_v6 = vld [vmem:[%s2248_s1 + $0x870] sm:$0xff]  ;;  %v86_v19 = vld [vmem:[%s2248_s1 + $0x238] sm:$0xff] }
  0xbf   :  { %759 = vmatpush.msra.mxu1 %v397_v23  ;;  %780 = vmatpush.msra.mxu2 %v74_v24  ;;  %v353_v7 = vld [vmem:[%s2248_s1 + $0xa90] sm:$0xff]  ;;  %v334_v20 = vld [vmem:[%s2248_s1 + $0x9f8] sm:$0xff] }
  0xc0   :  { %799 = vmatpush.msra.mxu3 %v142_v25  ;;  %741 = vmatpush.msra.mxu0 %v325_v27  ;;  %v281_v10 = vld [vmem:[%s2248_s1 + $0x850] sm:$0xff]  ;;  %v206_v22 = vld [vmem:[%s2248_s1 + $0x5f8] sm:$0xff] }
  0xc1   :  { %760 = vmatpush.msra.mxu1 %v393_v28  ;;  %781 = vmatpush.msra.mxu2 %v70_v29  ;;  %v349_v11 = vld [vmem:[%s2248_s1 + $0xa70] sm:$0xff]  ;;  %v82_v24 = vld [vmem:[%s2248_s1 + $0x218] sm:$0xff] }
  0xc2   :  { %800 = vmatpush.msra.mxu3 %v138_v30  ;;  %742 = vmatpush.msra.mxu0 %v321_v31  ;;  %v345_v13 = vld [vmem:[%s2248_s1 + $0xa50] sm:$0xff]  ;;  %v202_v25 = vld [vmem:[%s2248_s1 + $0x5d8] sm:$0xff] }
  0xc3   :  { %761 = vmatpush.msra.mxu1 %v389_v32  ;;  %782 = vmatpush.msra.mxu2 %v66_v33  ;;  %v273_v16 = vld [vmem:[%s2248_s1 + $0x810] sm:$0xff]  ;;  %v270_v27 = vld [vmem:[%s2248_s1 + $0x7f8] sm:$0xff] }
  0xc4   :  { %801 = vmatpush.msra.mxu3 %v134_v34  ;;  %743 = vmatpush.msra.mxu0 %v317_v35  ;;  %v341_v17 = vld [vmem:[%s2248_s1 + $0xa30] sm:$0xff]  ;;  %v330_v28 = vld [vmem:[%s2248_s1 + $0x9d8] sm:$0xff] }
  0xc5   :  { %762 = vmatpush.msra.mxu1 %v385_v36  ;;  %783 = vmatpush.msra.mxu2 %v62_v37  ;;  %v337_v23 = vld [vmem:[%s2248_s1 + $0xa10] sm:$0xff]  ;;  %v398_v29 = vld [vmem:[%s2248_s1 + $0xbf8] sm:$0xff] }
  0xc6   :  { %802 = vmatpush.msra.mxu3 %v130_v38  ;;  %744 = vmatpush.msra.mxu0 %v313_v39  ;;  %v198_v30 = vld [vmem:[%s2248_s1 + $0x5b8] sm:$0xff] }
  0xc7   :  { %763 = vmatpush.msra.mxu1 %v381_v40  ;;  %784 = vmatpush.msra.mxu2 %v58_v41  ;;  %v266_v31 = vld [vmem:[%s2248_s1 + $0x7d8] sm:$0xff] }
  0xc8   :  { %803 = vmatpush.msra.mxu3 %v126_v42  ;;  %745 = vmatpush.msra.mxu0 %v309_v43  ;;  %v326_v32 = vld [vmem:[%s2248_s1 + $0x9b8] sm:$0xff] }
  0xc9   :  { %764 = vmatpush.msra.mxu1 %v377_v44  ;;  %785 = vmatpush.msra.mxu2 %v54_v45  ;;  %v394_v33 = vld [vmem:[%s2248_s1 + $0xbd8] sm:$0xff] }
  0xca   :  { %804 = vmatpush.msra.mxu3 %v122_v46  ;;  %746 = vmatpush.msra.mxu0 %v305_v47  ;;  %v194_v34 = vld [vmem:[%s2248_s1 + $0x598] sm:$0xff] }
  0xcb   :  { %765 = vmatpush.msra.mxu1 %v373_v48  ;;  %786 = vmatpush.msra.mxu2 %v50_v49  ;;  %v262_v35 = vld [vmem:[%s2248_s1 + $0x7b8] sm:$0xff] }
  0xcc   :  { %805 = vmatpush.msra.mxu3 %v118_v50  ;;  %747 = vmatpush.msra.mxu0 %v301_v51  ;;  %v322_v36 = vld [vmem:[%s2248_s1 + $0x998] sm:$0xff] }
  0xcd   :  { %766 = vmatpush.msra.mxu1 %v369_v52  ;;  %787 = vmatpush.msra.mxu2 %v46_v53  ;;  %v390_v37 = vld [vmem:[%s2248_s1 + $0xbb8] sm:$0xff] }
  0xce   :  { %806 = vmatpush.msra.mxu3 %v114_v54  ;;  %748 = vmatpush.msra.mxu0 %v297_v55  ;;  %v190_v38 = vld [vmem:[%s2248_s1 + $0x578] sm:$0xff] }
  0xcf   :  { %767 = vmatpush.msra.mxu1 %v365_v56  ;;  %788 = vmatpush.msra.mxu2 %v42_v57  ;;  %v258_v39 = vld [vmem:[%s2248_s1 + $0x798] sm:$0xff] }
  0xd0   :  { %807 = vmatpush.msra.mxu3 %v110_v58  ;;  %749 = vmatpush.msra.mxu0 %v293_v59  ;;  %v318_v40 = vld [vmem:[%s2248_s1 + $0x978] sm:$0xff] }
  0xd1   :  { %768 = vmatpush.msra.mxu1 %v361_v60  ;;  %789 = vmatpush.msra.mxu2 %v38_v62  ;;  %v386_v41 = vld [vmem:[%s2248_s1 + $0xb98] sm:$0xff] }
  0xd2   :  { %808 = vmatpush.msra.mxu3 %v106_v63  ;;  %715 = vmatmul.f32.vlgmr.msrb.gmra.mxu2 %v1425_v61  ;;  %v98_v61 = vld [vmem:[%s2248_s1 + $0x298] sm:$0xff] }
  0xd3   :  { %750 = vmatpush.msra.mxu0 %v289_v0  ;;  %769 = vmatpush.msra.mxu1 %v357_v1  ;;  %v186_v42 = vld [vmem:[%s2248_s1 + $0x558] sm:$0xff] }
  0xd4   :  { %790 = vmatpush.msra.mxu2 %v34_v4  ;;  %809 = vmatpush.msra.mxu3 %v102_v5  ;;  %v254_v43 = vld [vmem:[%s2248_s1 + $0x778] sm:$0xff] }
  0xd5   :  { %675 = vmatmul.f32.vlgmr.msrb.gmra.mxu0 %v1439_v2  ;;  %735 = vmatmul.f32.vlgmr.msrb.gmra.mxu3 %v1442_v3  ;;  %v26_v2 = vld [vmem:[%s2248_s1 + $0x58] sm:$0xff]  ;;  %v277_v3 = vld [vmem:[%s2248_s1 + $0x830] sm:$0xff] }
  0xd6   :  { %751 = vmatpush.msra.mxu0 %v285_v6  ;;  %770 = vmatpush.msra.mxu1 %v353_v7  ;;  %v314_v44 = vld [vmem:[%s2248_s1 + $0x958] sm:$0xff] }
  0xd7   :  { %791 = vmatpush.msra.mxu2 %v30_v9  ;;  %810 = vmatpush.msra.mxu3 %v98_v61  ;;  %v382_v45 = vld [vmem:[%s2248_s1 + $0xb78] sm:$0xff] }
  0xd8   :  { %695 = vmatmul.f32.vlgmr.msrb.gmra.mxu1 %v1457_v8  ;;  %752 = vmatpush.msra.mxu0 %v281_v10  ;;  %v182_v46 = vld [vmem:[%s2248_s1 + $0x538] sm:$0xff] }
  0xd9   :  { %771 = vmatpush.msra.mxu1 %v349_v11  ;;  %792 = vmatpush.msra.mxu2 %v26_v2  ;;  %v250_v47 = vld [vmem:[%s2248_s1 + $0x758] sm:$0xff] }
  0xda   :  { %811 = vmatpush.msra.mxu3 %v94_v12  ;;  %753 = vmatpush.msra.mxu0 %v277_v3  ;;  %v310_v48 = vld [vmem:[%s2248_s1 + $0x938] sm:$0xff]  ;;  %v1004_v12 = vld.sshfl [vmem:[#allocation1] sm:$0xff pattern:$0x75316420] }
  0xdb   :  { %772 = vmatpush.msra.mxu1 %v345_v13  ;;  %793 = vmatpush.msra.mxu2 %v22_v14  ;;  %v378_v49 = vld [vmem:[%s2248_s1 + $0xb58] sm:$0xff] }
  0xdc   :  { %812 = vmatpush.msra.mxu3 %v90_v15  ;;  %754 = vmatpush.msra.mxu0 %v273_v16  ;;  %v178_v50 = vld [vmem:[%s2248_s1 + $0x518] sm:$0xff] }
  0xdd   :  { %773 = vmatpush.msra.mxu1 %v341_v17  ;;  %794 = vmatpush.msra.mxu2 %v18_v18  ;;  %v246_v51 = vld [vmem:[%s2248_s1 + $0x738] sm:$0xff] }
  0xde   :  { %813 = vmatpush.msra.mxu3 %v86_v19  ;;  %755 = vmatmul.f32.vlgmr.msra.gmra.mxu0 %v1497_v21  ;;  %v306_v52 = vld [vmem:[%s2248_s1 + $0x918] sm:$0xff] }
  0xdf   :  { %859 = vmatpush.msrb.mxu2 %v334_v20  ;;  %819 = vmatpush.msrb.mxu0 %v206_v22  ;;  %v374_v53 = vld [vmem:[%s2248_s1 + $0xb38] sm:$0xff] }
  0xe0   :  { %774 = vmatpush.msra.mxu1 %v337_v23  ;;  %814 = vmatpush.msra.mxu3 %v82_v24  ;;  %v174_v54 = vld [vmem:[%s2248_s1 + $0x4f8] sm:$0xff] }
  0xe1   :  { %775 = vmatmul.f32.vlgmr.msra.gmra.mxu1 %v1511_v26  ;;  %820 = vmatpush.msrb.mxu0 %v202_v25  ;;  %v242_v55 = vld [vmem:[%s2248_s1 + $0x718] sm:$0xff] }
  0xe2   :  { %839 = vmatpush.msrb.mxu1 %v270_v27  ;;  %860 = vmatpush.msrb.mxu2 %v330_v28  ;;  %v302_v56 = vld [vmem:[%s2248_s1 + $0x8f8] sm:$0xff]  ;;  %v1005_v27 = vld.sshfl [vmem:[#allocation1 + $0x10] sm:$0xff pattern:$0x75316420] }
  0xe3   :  { %879 = vmatpush.msrb.mxu3 %v398_v29  ;;  %821 = vmatpush.msrb.mxu0 %v198_v30  ;;  %v370_v57 = vld [vmem:[%s2248_s1 + $0xb18] sm:$0xff]  ;;  %v436_v29 = vpop.f32.mrf.mxu0  ;;  %v456_v30 = vpop.f32.mrf.mxu1 }
  0xe4   :  { %840 = vmatpush.msrb.mxu1 %v266_v31  ;;  %861 = vmatpush.msrb.mxu2 %v326_v32  ;;  %v170_v58 = vld [vmem:[%s2248_s1 + $0x4d8] sm:$0xff]  ;;  %v476_v31 = vpop.f32.mrf.mxu2  ;;  %v496_v32 = vpop.f32.mrf.mxu3 }
  0xe5   :  { %880 = vmatpush.msrb.mxu3 %v394_v33  ;;  %822 = vmatpush.msrb.mxu0 %v194_v34  ;;  %v238_v59 = vld [vmem:[%s2248_s1 + $0x6f8] sm:$0xff] }
  0xe6   :  { %841 = vmatpush.msrb.mxu1 %v262_v35  ;;  %862 = vmatpush.msrb.mxu2 %v322_v36  ;;  %v298_v60 = vld [vmem:[%s2248_s1 + $0x8d8] sm:$0xff] }
  0xe7   :  { %881 = vmatpush.msrb.mxu3 %v390_v37  ;;  %823 = vmatpush.msrb.mxu0 %v190_v38  ;;  %v366_v62 = vld [vmem:[%s2248_s1 + $0xaf8] sm:$0xff] }
  0xe8   :  { %842 = vmatpush.msrb.mxu1 %v258_v39  ;;  %863 = vmatpush.msrb.mxu2 %v318_v40  ;;  %v166_v63 = vld [vmem:[%s2248_s1 + $0x4b8] sm:$0xff] }
  0xe9   :  { %882 = vmatpush.msrb.mxu3 %v386_v41  ;;  %824 = vmatpush.msrb.mxu0 %v186_v42  ;;  %v234_v0 = vld [vmem:[%s2248_s1 + $0x6d8] sm:$0xff] }
  0xea   :  { %843 = vmatpush.msrb.mxu1 %v254_v43  ;;  %864 = vmatpush.msrb.mxu2 %v314_v44  ;;  %v294_v1 = vld [vmem:[%s2248_s1 + $0x8b8] sm:$0xff]  ;;  %v457_v43 = vadd.f32 %v456_v30, %v436_v29 }
  0xeb   :  { %883 = vmatpush.msrb.mxu3 %v382_v45  ;;  %825 = vmatpush.msrb.mxu0 %v182_v46  ;;  %v362_v4 = vld [vmem:[%s2248_s1 + $0xad8] sm:$0xff]  ;;  %v516_v33 = vpop.f32.mrf.mxu0 }
  0xec   :  { %844 = vmatpush.msrb.mxu1 %v250_v47  ;;  %865 = vmatpush.msrb.mxu2 %v310_v48  ;;  %v162_v5 = vld [vmem:[%s2248_s1 + $0x498] sm:$0xff]  ;;  %v536_v34 = vpop.f32.mrf.mxu1 }
  0xed   :  { %884 = vmatpush.msrb.mxu3 %v378_v49  ;;  %826 = vmatpush.msrb.mxu0 %v178_v50  ;;  %v230_v6 = vld [vmem:[%s2248_s1 + $0x6b8] sm:$0xff] }
  0xee   :  { %845 = vmatpush.msrb.mxu1 %v246_v51  ;;  %866 = vmatpush.msrb.mxu2 %v306_v52  ;;  %v290_v7 = vld [vmem:[%s2248_s1 + $0x898] sm:$0xff] }
  0xef   :  { %885 = vmatpush.msrb.mxu3 %v374_v53  ;;  %827 = vmatpush.msrb.mxu0 %v174_v54  ;;  %v358_v9 = vld [vmem:[%s2248_s1 + $0xab8] sm:$0xff]  ;;  %v556_v35 = vpop.f32.mrf.mxu2 }
  0xf0   :  { %846 = vmatpush.msrb.mxu1 %v242_v55  ;;  %867 = vmatpush.msrb.mxu2 %v302_v56  ;;  %v158_v61 = vld [vmem:[%s2248_s1 + $0x478] sm:$0xff]  ;;  %v576_v36 = vpop.f32.mrf.mxu3 }
  0xf1   :  { %886 = vmatpush.msrb.mxu3 %v370_v57  ;;  %828 = vmatpush.msrb.mxu0 %v170_v58  ;;  %v226_v10 = vld [vmem:[%s2248_s1 + $0x698] sm:$0xff]  ;;  %v577_v42 = vadd.f32 %v576_v36, %v556_v35 }
  0xf2   :  { %847 = vmatpush.msrb.mxu1 %v238_v59  ;;  %868 = vmatpush.msrb.mxu2 %v298_v60  ;;  %v286_v11 = vld [vmem:[%s2248_s1 + $0x878] sm:$0xff] }
  0xf3   :  { %887 = vmatpush.msrb.mxu3 %v366_v62  ;;  %829 = vmatpush.msrb.mxu0 %v166_v63  ;;  %v354_v2 = vld [vmem:[%s2248_s1 + $0xa98] sm:$0xff] }
  0xf4   :  { %848 = vmatpush.msrb.mxu1 %v234_v0  ;;  %869 = vmatpush.msrb.mxu2 %v294_v1  ;;  %v154_v3 = vld [vmem:[%s2248_s1 + $0x458] sm:$0xff] }
  0xf5   :  { %888 = vmatpush.msrb.mxu3 %v362_v4  ;;  %830 = vmatpush.msrb.mxu0 %v162_v5  ;;  %v222_v13 = vld [vmem:[%s2248_s1 + $0x678] sm:$0xff] }
  0xf6   :  { %849 = vmatpush.msrb.mxu1 %v230_v6  ;;  %870 = vmatpush.msrb.mxu2 %v290_v7  ;;  %v282_v14 = vld [vmem:[%s2248_s1 + $0x858] sm:$0xff] }
  0xf7   :  { %889 = vmatpush.msrb.mxu3 %v358_v9  ;;  %795 = vmatmul.f32.vlgmr.msra.gmra.mxu2 %v1004_v12  ;;  %v350_v15 = vld [vmem:[%s2248_s1 + $0xa78] sm:$0xff] }
  0xf8   :  { %815 = vmatmul.f32.vlgmr.msra.gmra.mxu3 %v1457_v8  ;;  %831 = vmatpush.msrb.mxu0 %v158_v61  ;;  %v150_v8 = vld [vmem:[%s2248_s1 + $0x438] sm:$0xff] }
  0xf9   :  { %850 = vmatpush.msrb.mxu1 %v226_v10  ;;  %871 = vmatpush.msrb.mxu2 %v286_v11  ;;  %v218_v16 = vld [vmem:[%s2248_s1 + $0x658] sm:$0xff] }
  0xfa   :  { %890 = vmatpush.msrb.mxu3 %v354_v2  ;;  %832 = vmatpush.msrb.mxu0 %v154_v3  ;;  %v278_v17 = vld [vmem:[%s2248_s1 + $0x838] sm:$0xff] }
  0xfb   :  { %851 = vmatpush.msrb.mxu1 %v222_v13  ;;  %v346_v18 = vld [vmem:[%s2248_s1 + $0xa58] sm:$0xff]  ;;  %872 = vmatpush.msrb.mxu2 %v282_v14 }
  0xfc   :  { %891 = vmatpush.msrb.mxu3 %v350_v15  ;;  %v146_v19 = vld [vmem:[%s2248_s1 + $0x418] sm:$0xff]  ;;  %833 = vmatpush.msrb.mxu0 %v150_v8 }
  0xfd   :  { %v214_v20 = vld [vmem:[%s2248_s1 + $0x638] sm:$0xff]  ;;  %852 = vmatpush.msrb.mxu1 %v218_v16  ;;  %873 = vmatpush.msrb.mxu2 %v278_v17 }
  0xfe   :  { %v274_v22 = vld [vmem:[%s2248_s1 + $0x818] sm:$0xff]  ;;  %892 = vmatpush.msrb.mxu3 %v346_v18  ;;  %834 = vmatpush.msrb.mxu0 %v146_v19 }
  0xff   :  { %v342_v23 = vld [vmem:[%s2248_s1 + $0xa38] sm:$0xff]  ;;  %853 = vmatpush.msrb.mxu1 %v214_v20  ;;  %874 = vmatpush.msrb.mxu2 %v274_v22 }
 0x100   :  { %v210_v24 = vld [vmem:[%s2248_s1 + $0x618] sm:$0xff]  ;;  %893 = vmatpush.msrb.mxu3 %v342_v23  ;;  %835 = vmatmul.f32.vlgmr.msrb.gmra.mxu0 %v1005_v27 }
 0x101   :  { %v338_v25 = vld [vmem:[%s2248_s1 + $0xa18] sm:$0xff]  ;;  %875 = vmatmul.f32.vlgmr.msrb.gmra.mxu2 %v1497_v21  ;;  %854 = vmatpush.msrb.mxu1 %v210_v24  ;;  %s1034_s1 = smov [#allocation2]  }
 0x102   :  { %894 = vmatpush.msrb.mxu3 %v338_v25  ;;  %v1006_v28 = vld.sshfl [vmem:[#allocation1 + $0x18] sm:$0xff pattern:$0x75316420]  ;;  %s983_s7 = sshll.u32 %s1034_s1, 4  ;;  %s984_s7 = int_to_ptr.vmem [resolvable:$true] %s983_s7 }
 0x103   :  { %855 = vmatmul.f32.vlgmr.msrb.gmra.mxu1 %v1006_v28  ;;  %895 = vmatmul.f32.vlgmr.msrb.gmra.mxu3 %v1511_v26  ;;  %v477_v26 = vadd.f32 %v476_v31, %v457_v43 }
 0x105   :  { %v497_v51 = vadd.f32 %v496_v32, %v477_v26 }
 0x107   :  { %v517_v55 = vadd.f32 %v516_v33, %v497_v51 }
 0x109   :  { %v537_v63 = vadd.f32 %v536_v34, %v517_v55 }
 0x10b   :  { %v899_v6 = vmul.f32 %v537_v63, %v537_v63 }
 0x10d   :  { %v904_v12 = vsel %vm903_vm0, %v899_v6, 0.0 }
 0x116   :  { %v596_v37 = vpop.f32.mrf.mxu0 }
 0x117   :  { %v597_v46 = vadd.f32 %v596_v37, %v577_v42 }
 0x11d   :  { %v616_v38 = vpop.f32.mrf.mxu1 }
 0x11e   :  { %v636_v39 = vpop.f32.mrf.mxu2  ;;  %v617_v49 = vadd.f32 %v616_v38, %v597_v46 }
 0x120   :  { %v637_v54 = vadd.f32 %v636_v39, %v617_v49  ;;  %v1033_v49 = vmov 2.0  }
 0x121   :  { %v656_v40 = vpop.f32.mrf.mxu3 }
 0x122   :  { %v657_v60 = vadd.f32 %v656_v40, %v637_v54 }
 0x124   :  { %v900_v5 = vmul.f32 %v657_v60, %v657_v60 }
 0x126   :  { %v905_v10 = vsel %vm903_vm0, %v900_v5, 0.0 }
 0x127   :  { %v906_v14 = vadd.f32 %v905_v10, %v904_v12 }
 0x152   :  { %v676_v41 = vpop.f32.mrf.mxu0 }
 0x155   :  { %v696_v21 = vpop.f32.mrf.mxu1  ;;  %v716_v45 = vpop.f32.mrf.mxu2 }
 0x156   :  { %v697_v44 = vadd.f32 %v696_v21, %v676_v41 }
 0x158   :  { %v717_v47 = vadd.f32 %v716_v45, %v697_v44  ;;  %v736_v48 = vpop.f32.mrf.mxu3 }
 0x15a   :  { %v737_v52 = vadd.f32 %v736_v48, %v717_v47 }
 0x15b   :  { %v756_v50 = vpop.f32.mrf.mxu0 }
 0x15c   :  { %v757_v56 = vadd.f32 %v756_v50, %v737_v52 }
 0x15e   :  { %v776_v53 = vpop.f32.mrf.mxu1 }
 0x15f   :  { %v777_v0 = vadd.f32 %v776_v53, %v757_v56 }
 0x161   :  { %v901_v7 = vmul.f32 %v777_v0, %v777_v0 }
 0x163   :  { %v907_v13 = vsel %vm903_vm0, %v901_v7, 0.0 }
 0x164   :  { %v908_v8 = vadd.f32 %v907_v13, %v906_v14 }
 0x17a   :  { %v796_v57 = vpop.f32.mrf.mxu2 }
 0x17b   :  { %v816_v58 = vpop.f32.mrf.mxu3 }
 0x17c   :  { %v817_v59 = vadd.f32 %v816_v58, %v796_v57 }
 0x17d   :  { %v836_v62 = vpop.f32.mrf.mxu0 }
 0x17e   :  { %v837_v1 = vadd.f32 %v836_v62, %v817_v59 }
 0x180   :  { %v856_v4 = vpop.f32.mrf.mxu1 }
 0x181   :  { %v857_v9 = vadd.f32 %v856_v4, %v837_v1 }
 0x184   :  { %v876_v61 = vpop.f32.mrf.mxu2 }
 0x185   :  { %v877_v11 = vadd.f32 %v876_v61, %v857_v9 }
 0x186   :  { %v896_v2 = vpop.f32.mrf.mxu3 }
 0x187   :  { %v897_v3 = vadd.f32 %v896_v2, %v877_v11 }
 0x189   :  { %v902_v15 = vmul.f32 %v897_v3, %v897_v3 }
 0x18b   :  { %v909_v16 = vsel %vm903_vm0, %v902_v15, 0.0 }
 0x18c   :  { %v910_v17 = vadd.f32 %v909_v16, %v908_v8 }
 0x18e   :  { %911 = vadd.xlane.f32.xlu0 %v910_v17 }
 0x201   :  { %v912_v18 = vpop.xlane.xlu0 %911 }
 0x202   :  { %v913_v19 = vadd.f32 1e-12, %v912_v18 }
 0x204   :  { %1000 = vrsqrt.f32 %v913_v19  ;;  %vm920_vm2 = vweird.f32 %v913_v19 }
 0x205   :  { %1002 = vrcp.f32 %v1033_v49 }
 0x20a   :  { %v1001_v20 = vpop.eup %1000 }
 0x20b   :  { %v915_v22 = vmul.f32 %v1001_v20, %v913_v19  ;;  %vm921_vm1 = vweird.f32 %v1001_v20  ;;  %v1003_v50 = vpop.eup %1002 }
 0x20c   :  { %vm922_vm3 = vmor %vm920_vm2, %vm921_vm1  ;;  %v967_v51 = vmul.f32 2.0, %v1003_v50  ;;  %vm971_vm6 = vweird.f32 %v1003_v50 }
 0x20d   :  { %v916_v23 = vmul.f32 %v1001_v20, %v915_v22 }
 0x20e   :  { %v968_v52 = vsub.f32 1.0, %v967_v51 }
 0x20f   :  { %v917_v24 = vmul.f32 0.5, %v916_v23 }
 0x210   :  { %v969_v56 = vmul.f32 %v1003_v50, %v968_v52 }
 0x211   :  { %v918_v25 = vsub.f32 1.5, %v917_v24 }
 0x212   :  { %v970_v59 = vadd.f32 %v1003_v50, %v969_v56 }
 0x213   :  { %v919_v27 = vmul.f32 %v1001_v20, %v918_v25 }
 0x215   :  { %v923_v28 = vsel %vm922_vm3, %v1001_v20, %v919_v27 }
 0x216   :  { %v924_v29 = vmul.f32 %v923_v28, %v537_v63  ;;  %v925_v30 = vmul.f32 %v923_v28, %v657_v60  ;;  %v926_v31 = vmul.f32 %v923_v28, %v777_v0  ;;  %v927_v32 = vmul.f32 %v923_v28, %v897_v3 }
 0x217   :  { %v972_v63 = vsel %vm971_vm6, %v1003_v50, %v970_v59 }
 0x218   :  { %v932_v33 = vrot.slane %v924_v29, 2  ;;  %v933_v34 = vrot.slane %v925_v30, 2  ;;  %v934_v35 = vrot.slane %v926_v31, 2  ;;  %v935_v36 = vrot.slane %v927_v32, 2 }
 0x21a   :  { %v940_v37 = vmul.f32 %v932_v33, %v924_v29  ;;  %v941_v38 = vmul.f32 %v933_v34, %v925_v30  ;;  %v942_v39 = vmul.f32 %v934_v35, %v926_v31  ;;  %v943_v40 = vmul.f32 %v935_v36, %v927_v32 }
 0x21c   :  { %v945_v41 = vsel %vm944_vm4, %v940_v37, 0.0  ;;  %v946_v21 = vsel %vm944_vm4, %v941_v38, 0.0  ;;  %v948_v43 = vsel %vm944_vm4, %v942_v39, 0.0  ;;  %v950_v45 = vsel %vm944_vm4, %v943_v40, 0.0 }
 0x21d   :  { %v947_v42 = vadd.f32 %v946_v21, %v945_v41 }
 0x21f   :  { %v949_v44 = vadd.f32 %v948_v43, %v947_v42 }
 0x221   :  { %v951_v46 = vadd.f32 %v950_v45, %v949_v44 }
 0x223   :  { %952 = vadd.xlane.f32.xlu0 %v951_v46 }
 0x296   :  { %v953_v26 = vpop.xlane.xlu0 %952 }
 0x297   :  { %v954_v47 = vsub.f32 1.0, %v953_v26 }
 0x299   :  { %v956_v48 = vsel %vm955_vm5, %v954_v47, 0.0 }
 0x29a   :  { %957 = vadd.xlane.f32.xlu1 %v956_v48 }
 0x30d   :  { %v958_v53 = vpop.xlane.xlu1 %957 }
 0x30e   :  { %v959_v54 = vrot.slane %v958_v53, 4 }
 0x310   :  { %v960_v55 = vadd.f32 %v959_v54, %v958_v53 }
 0x312   :  { %v961_v57 = vrot.slane %v960_v55, 2 }
 0x314   :  { %v962_v58 = vadd.f32 %v961_v57, %v960_v55 }
 0x316   :  { %v963_v60 = vrot.slane %v962_v58, 1 }
 0x318   :  { %v964_v62 = vadd.f32 %v963_v60, %v962_v58 }
 0x31a   :  { %994 = vpush %v964_v62 }
 0x31b   :  { %996 = vpush %v972_v63 }
 0x34b   :  { %s995_s8 = spop %994 }
 0x34c   :  { %s997_s12 = spop %996 }
 0x34d   :  { %s974_s13 = smul.f32 %s997_s12, %s995_s8 }
 0x34f   :  { %v975_v0 = vstv %s974_s13 }
 0x350   :  { %977 = vst.msk [vmem:[#allocation2] sm:$0x1] %vm976_vm7, %v975_v0 }
 0x351   :  { %988 = dma.vmem_to_hbm [thread:$0]  %s984_s7, 16, %s986_s11, [#allocation3]  }
 0x352   :  { %1031 = dma.done.wait [#allocation3], 16  }
 0x353   :  { %1032 = vsyncadd [#allocation3], 4294967280 }
 0x354   :  { %993 = vsyncpa [#allocation3], 1 }

</bundles_post_ra>
